<compile_context>
chip_gen: v5e
topology: v5e:2x2
jax: 0.10.0
libtpu: 0.0.40
codegen_flags: <defaults>
</compile_context>

<pallas_src>
import functools
import math
import time

import numpy as np
import jax
import jax.numpy as jnp
from jax import lax
from jax.experimental import pallas as pl
from jax.experimental.pallas import tpu as pltpu

F32 = jnp.float32
BF16 = jnp.bfloat16
LN_EPS = 1e-5


def _detect_row_cap():
    # v5e/v6e have 128 MiB VMEM -> allow 1024-row tiles with a raised scoped
    # limit; v7x (64 MiB physical) and unknown targets keep 512 / default limit.
    try:
        kind = jax.devices()[0].device_kind.lower()
    except Exception:
        return 512, None
    if ("v5" in kind) or ("v6" in kind):
        return 1024, 96 * 1024 * 1024
    return 512, None


_TM_CAP, _VMEM_LIMIT = _detect_row_cap()


def _row_tiles(M):
    if M <= _TM_CAP:
        return M, 1
    return _TM_CAP, pl.cdiv(M, _TM_CAP)


def _mosaic(*sem):
    kw = {"dimension_semantics": tuple(sem)}
    if _VMEM_LIMIT is not None:
        kw["vmem_limit_bytes"] = _VMEM_LIMIT
    return pltpu.CompilerParams(**kw)


# --------------------------------------------------------------------------
# In-kernel helpers
# --------------------------------------------------------------------------
def _gelu(x):
    # tanh-approximate GELU (EUP path on all TPU generations).
    # TODO(synk): reference uses exact erf GELU; tanh form differs by <~1e-3.
    c0 = np.float32(0.7978845608028654)
    c1 = np.float32(0.044715)
    return 0.5 * x * (1.0 + jnp.tanh(c0 * (x + c1 * x * x * x)))


def _layernorm(x, g, b):
    mu = jnp.mean(x, axis=-1, keepdims=True)
    xc = x - mu
    var = jnp.mean(xc * xc, axis=-1, keepdims=True)
    return xc * lax.rsqrt(var + LN_EPS) * g + b


# --------------------------------------------------------------------------
# Pallas kernels
# --------------------------------------------------------------------------
def _fused_linear_kernel(*refs, has_ln, has_bias, act, has_res):
    it = iter(refs)
    x_ref = next(it)
    if has_ln:
        g_ref, bln_ref = next(it), next(it)
    w_ref = next(it)
    b_ref = next(it) if has_bias else None
    res_ref = next(it) if has_res else None
    o_ref = next(it)

    x = x_ref[...].astype(F32)
    if has_ln:
        x = _layernorm(x, g_ref[...], bln_ref[...])
    y = jnp.dot(x.astype(BF16), w_ref[...], preferred_element_type=F32)
    if has_bias:
        y = y + b_ref[...]
    if act == "gelu":
        y = _gelu(y)
    if has_res:
        y = y + res_ref[...].astype(F32)
    o_ref[...] = y.astype(o_ref.dtype)


def fused_linear(x, w, b=None, *, act=None, ln=None, residual=None, out_dtype=BF16):
    """y = [residual +] act( LN?(x) @ w [+ b] ), row tiled; bf16 HBM boundary."""
    K = x.shape[-1]
    N = w.shape[-1]
    lead = x.shape[:-1]
    x2 = x.reshape(-1, K)
    M = x2.shape[0]
    TM, gm = _row_tiles(M)

    has_ln = ln is not None
    has_bias = b is not None
    has_res = residual is not None

    inputs = [x2]
    in_specs = [pl.BlockSpec((TM, K), lambda i: (i, 0))]
    if has_ln:
        g, bln = ln
        inputs += [g.reshape(1, K), bln.reshape(1, K)]
        in_specs += [pl.BlockSpec((1, K), lambda i: (0, 0)),
                     pl.BlockSpec((1, K), lambda i: (0, 0))]
    inputs.append(w.astype(BF16))
    in_specs.append(pl.BlockSpec((K, N), lambda i: (0, 0)))
    if has_bias:
        inputs.append(b.reshape(1, N))
        in_specs.append(pl.BlockSpec((1, N), lambda i: (0, 0)))
    if has_res:
        inputs.append(residual.reshape(-1, N))
        in_specs.append(pl.BlockSpec((TM, N), lambda i: (i, 0)))

    out = pl.pallas_call(
        functools.partial(_fused_linear_kernel, has_ln=has_ln,
                          has_bias=has_bias, act=act, has_res=has_res),
        out_shape=jax.ShapeDtypeStruct((M, N), out_dtype),
        grid=(gm,),
        in_specs=in_specs,
        out_specs=pl.BlockSpec((TM, N), lambda i: (i, 0)),
        compiler_params=_mosaic("parallel"),
    )(*inputs)
    return out.reshape(lead + (N,))


def _fused_mlp_kernel(*refs, has_ln, has_extra, has_res):
    it = iter(refs)
    x_ref = next(it)
    if has_ln:
        g_ref, bln_ref = next(it), next(it)
    e_ref = next(it) if has_extra else None
    w1_ref, b1_ref = next(it), next(it)
    w1e_ref = next(it) if has_extra else None
    w2_ref, b2_ref = next(it), next(it)
    o_ref = next(it)

    x = x_ref[...].astype(F32)
    z = _layernorm(x, g_ref[...], bln_ref[...]) if has_ln else x
    h = jnp.dot(z.astype(BF16), w1_ref[...], preferred_element_type=F32)
    if has_extra:
        h = h + jnp.dot(e_ref[...].astype(BF16), w1e_ref[...],
                        preferred_element_type=F32)
    h = _gelu(h + b1_ref[...])          # hidden stays on-chip (never hits HBM)
    y = jnp.dot(h.astype(BF16), w2_ref[...], preferred_element_type=F32) + b2_ref[...]
    if has_res:
        y = y + x
    o_ref[...] = y.astype(o_ref.dtype)


def fused_mlp(x, w1, b1, w2, b2, *, ln=None, extra=None, w1_extra=None,
              residual=False, out_dtype=BF16):
    """out = [x +] ( GELU( LN?(x)@w1 [+ extra@w1_extra] + b1 ) @ w2 + b2 )."""
    K = x.shape[-1]
    H = w1.shape[-1]
    N = w2.shape[-1]
    if residual:
        assert N == K
    lead = x.shape[:-1]
    x2 = x.reshape(-1, K)
    M = x2.shape[0]
    TM, gm = _row_tiles(M)
    has_ln = ln is not None
    has_extra = extra is not None

    inputs = [x2]
    in_specs = [pl.BlockSpec((TM, K), lambda i: (i, 0))]
    if has_ln:
        g, bln = ln
        inputs += [g.reshape(1, K), bln.reshape(1, K)]
        in_specs += [pl.BlockSpec((1, K), lambda i: (0, 0)),
                     pl.BlockSpec((1, K), lambda i: (0, 0))]
    if has_extra:
        E = extra.shape[-1]
        inputs.append(extra.reshape(-1, E))
        in_specs.append(pl.BlockSpec((TM, E), lambda i: (i, 0)))
    inputs += [w1.astype(BF16), b1.reshape(1, H)]
    in_specs += [pl.BlockSpec((K, H), lambda i: (0, 0)),
                 pl.BlockSpec((1, H), lambda i: (0, 0))]
    if has_extra:
        inputs.append(w1_extra.astype(BF16))
        in_specs.append(pl.BlockSpec((extra.shape[-1], H), lambda i: (0, 0)))
    inputs += [w2.astype(BF16), b2.reshape(1, N)]
    in_specs += [pl.BlockSpec((H, N), lambda i: (0, 0)),
                 pl.BlockSpec((1, N), lambda i: (0, 0))]

    out = pl.pallas_call(
        functools.partial(_fused_mlp_kernel, has_ln=has_ln, has_extra=has_extra,
                          has_res=residual),
        out_shape=jax.ShapeDtypeStruct((M, N), out_dtype),
        grid=(gm,),
        in_specs=in_specs,
        out_specs=pl.BlockSpec((TM, N), lambda i: (i, 0)),
        compiler_params=_mosaic("parallel"),
    )(*inputs)
    return out.reshape(lead + (N,))


def _ln_kqv_prm_kernel(x_ref, g_ref, bln_ref, wk_ref, bk_ref, wp_ref, o_ref,
                       *, emb, m):
    xn = _layernorm(x_ref[...].astype(F32), g_ref[...], bln_ref[...])
    kqv = jnp.dot(xn.astype(BF16), wk_ref[...],
                  preferred_element_type=F32) + bk_ref[...]
    k = kqv[:, :emb]
    q = kqv[:, emb:2 * emb]
    v = kqv[:, 2 * emb:]
    wp = wp_ref[...]
    inv_sqrt_m = np.float32(1.0 / math.sqrt(m))
    kp = jnp.exp(jnp.dot(k, wp, preferred_element_type=F32)
                 - 0.5 * jnp.sum(k * k, axis=-1, keepdims=True)) * inv_sqrt_m
    qp = jnp.exp(jnp.dot(q, wp, preferred_element_type=F32)
                 - 0.5 * jnp.sum(q * q, axis=-1, keepdims=True)) * inv_sqrt_m
    # single lane-dense packed store [v | q' | k'] of width emb + 2*m (== 128)
    o_ref[...] = jnp.concatenate([v, qp, kp], axis=-1).astype(o_ref.dtype)


def ln_kqv_prm(x, ln, wkqv, bkqv, wprm, emb, m):
    """Token_performer front half, fused: LN -> kqv -> prm_exp(q), prm_exp(k)."""
    B, T, D = x.shape
    P = emb + 2 * m
    x2 = x.reshape(-1, D)
    M = x2.shape[0]
    TM, gm = _row_tiles(M)
    g, bln = ln
    out = pl.pallas_call(
        functools.partial(_ln_kqv_prm_kernel, emb=emb, m=m),
        out_shape=jax.ShapeDtypeStruct((M, P), BF16),
        grid=(gm,),
        in_specs=[
            pl.BlockSpec((TM, D), lambda i: (i, 0)),
            pl.BlockSpec((1, D), lambda i: (0, 0)),
            pl.BlockSpec((1, D), lambda i: (0, 0)),
            pl.BlockSpec((D, 3 * emb), lambda i: (0, 0)),
            pl.BlockSpec((1, 3 * emb), lambda i: (0, 0)),
            pl.BlockSpec((emb, m), lambda i: (0, 0)),
        ],
        out_specs=pl.BlockSpec((TM, P), lambda i: (i, 0)),
        compiler_params=_mosaic("parallel"),
    )(x2, g.reshape(1, D), bln.reshape(1, D), wkqv.astype(BF16),
      bkqv.reshape(1, 3 * emb), wprm)
    return out.reshape(B, T, P)


def _performer_block_kernel(pk_ref, wp_ref, bp_ref, g2_ref, b2ln_ref,
                            w1_ref, b1_ref, w2_ref, b2_ref, o_ref, *, emb, m):
    pk = pk_ref[...]                                          # (T, emb+2m) bf16
    v_bf = pk[:, :emb]
    qp_bf = pk[:, emb:emb + m]
    kp_bf = pk[:, emb + m:]
    qp = qp_bf.astype(F32)
    kp = kp_bf.astype(F32)
    # D = q' . sum_T(k'): VPU multiply + lane reduce (no (T,1) matmul)
    kp_sum = jnp.sum(kp, axis=0, keepdims=True)               # (1, m)
    D = jnp.sum(qp * kp_sum, axis=-1, keepdims=True)          # (T, 1)
    # A = k'^T v contracted over the token axis directly from the packed slab
    A = lax.dot_general(kp_bf, v_bf, (((0,), (0,)), ((), ())),
                        preferred_element_type=F32)           # (m, emb)
    y = jnp.dot(qp_bf, A.astype(BF16), preferred_element_type=F32)
    y = y / (D + 1e-8)
    x = v_bf.astype(F32) + jnp.dot(y.astype(BF16), wp_ref[...],
                                   preferred_element_type=F32) + bp_ref[...]
    # norm2 + MLP fused in: the (T, emb) intermediate never leaves VMEM
    z = _layernorm(x, g2_ref[...], b2ln_ref[...])
    h = _gelu(jnp.dot(z.astype(BF16), w1_ref[...],
                      preferred_element_type=F32) + b1_ref[...])
    out = x + jnp.dot(h.astype(BF16), w2_ref[...],
                      preferred_element_type=F32) + b2_ref[...]
    o_ref[...] = out.astype(o_ref.dtype)


def performer_block(packed, proj, norm2, fc1, fc2, emb, m):
    """Linear attention + proj + v-skip + norm2 + MLP, gridded over B."""
    B, T, P = packed.shape
    return pl.pallas_call(
        functools.partial(_performer_block_kernel, emb=emb, m=m),
        out_shape=jax.ShapeDtypeStruct((B, T, emb), BF16),
        grid=(B,),
        in_specs=[
            pl.BlockSpec((None, T, P), lambda b: (b, 0, 0)),
            pl.BlockSpec((emb, emb), lambda b: (0, 0)),
            pl.BlockSpec((1, emb), lambda b: (0, 0)),
            pl.BlockSpec((1, emb), lambda b: (0, 0)),
            pl.BlockSpec((1, emb), lambda b: (0, 0)),
            pl.BlockSpec((emb, emb), lambda b: (0, 0)),
            pl.BlockSpec((1, emb), lambda b: (0, 0)),
            pl.BlockSpec((emb, emb), lambda b: (0, 0)),
            pl.BlockSpec((1, emb), lambda b: (0, 0)),
        ],
        out_specs=pl.BlockSpec((None, T, emb), lambda b: (b, 0, 0)),
        compiler_params=_mosaic("parallel"),
    )(packed, proj["w"].astype(BF16), proj["b"].reshape(1, emb),
      norm2["g"].reshape(1, emb), norm2["b"].reshape(1, emb),
      fc1["w"].astype(BF16), fc1["b"].reshape(1, emb),
      fc2["w"].astype(BF16), fc2["b"].reshape(1, emb))


def _attn_kernel(*refs, scale, num_heads, dh, has_rel, want_rel):
    it = iter(refs)
    qkv_ref = next(it)                       # (N, 3C) bf16
    r_ref = next(it) if has_rel else None    # (H, N, N) bf16
    y_ref = next(it)                         # (N, C)   bf16
    rel_ref = next(it) if want_rel else None  # (H, N, N) bf16

    C = num_heads * dh
    qkv = qkv_ref[...]
    outs = []
    for h in range(num_heads):               # heads batched per grid step
        q = qkv[:, h * dh:(h + 1) * dh]
        k = qkv[:, C + h * dh:C + (h + 1) * dh]
        v = qkv[:, 2 * C + h * dh:2 * C + (h + 1) * dh]
        s = lax.dot_general(q, k, (((1,), (1,)), ((), ())),
                            preferred_element_type=F32) * scale
        if want_rel:
            rel_ref[h] = s.astype(rel_ref.dtype)   # recorded before the reuse add
        if has_rel:
            s = s + r_ref[h].astype(F32)
        s = s - jnp.max(s, axis=-1, keepdims=True)
        p = jnp.exp(s)
        p = p / jnp.sum(p, axis=-1, keepdims=True)
        outs.append(jnp.dot(p.astype(BF16), v, preferred_element_type=F32))
    y_ref[...] = jnp.concatenate(outs, axis=-1).astype(y_ref.dtype)


def mha_attention(qkv, rel=None, *, num_heads, scale, want_rel=True):
    """qkv: (B, N, 3C) packed [q|k|v] x [heads, Dh]; rel: (B, H, N, N) or None.

    Reads the qkv slab directly (no XLA head-split transpose) and writes a
    lane-dense (B, N, C) output; heads are looped inside the kernel.
    """
    B, N, threeC = qkv.shape
    C = threeC // 3
    Dh = C // num_heads
    has_rel = rel is not None

    inputs = [qkv]
    in_specs = [pl.BlockSpec((None, N, threeC), lambda b: (b, 0, 0))]
    if has_rel:
        inputs.append(rel)
        in_specs.append(pl.BlockSpec((None, num_heads, N, N),
                                     lambda b: (b, 0, 0, 0)))

    out_shapes = [jax.ShapeDtypeStruct((B, N, C), BF16)]
    out_specs = [pl.BlockSpec((None, N, C), lambda b: (b, 0, 0))]
    if want_rel:
        out_shapes.append(jax.ShapeDtypeStruct((B, num_heads, N, N), BF16))
        out_specs.append(pl.BlockSpec((None, num_heads, N, N),
                                      lambda b: (b, 0, 0, 0)))

    res = pl.pallas_call(
        functools.partial(_attn_kernel, scale=scale, num_heads=num_heads, dh=Dh,
                          has_rel=has_rel, want_rel=want_rel),
        out_shape=tuple(out_shapes),
        grid=(B,),
        in_specs=in_specs,
        out_specs=tuple(out_specs),
        compiler_params=_mosaic("parallel"),
    )(*inputs)
    if want_rel:
        return res[0], res[1]
    return res[0], None


def _rr_conv_kernel(r_ref, w1_ref, b1_ref, w2_ref, b2_ref, o_ref):
    r = r_ref[...]                                            # (ch, S) bf16
    h = jnp.dot(w1_ref[...], r, preferred_element_type=F32) + b1_ref[...]
    h = _gelu(h)
    o = jnp.dot(w2_ref[...], h.astype(BF16),
                preferred_element_type=F32) + b2_ref[...]
    o_ref[...] = o.astype(o_ref.dtype)


def rr_conv(rel, w1, b1, w2, b2):
    """relation_reuse_conv: 1x1 conv -> GELU -> 1x1 conv, implemented as
    left-multiplies with the flattened spatial dim as the lane axis."""
    B, ch, n, _ = rel.shape
    S = n * n
    ch3 = w1.shape[0]
    r2 = rel.reshape(B, ch, S)
    out = pl.pallas_call(
        _rr_conv_kernel,
        out_shape=jax.ShapeDtypeStruct((B, ch, S), BF16),
        grid=(B,),
        in_specs=[
            pl.BlockSpec((None, ch, S), lambda b: (b, 0, 0)),
            pl.BlockSpec((ch3, ch), lambda b: (0, 0)),
            pl.BlockSpec((ch3, 1), lambda b: (0, 0)),
            pl.BlockSpec((ch, ch3), lambda b: (0, 0)),
            pl.BlockSpec((ch, 1), lambda b: (0, 0)),
        ],
        out_specs=pl.BlockSpec((None, ch, S), lambda b: (b, 0, 0)),
        compiler_params=_mosaic("parallel"),
    )(r2, w1.astype(BF16), b1.reshape(ch3, 1), w2.astype(BF16), b2.reshape(ch, 1))
    return out.reshape(B, ch, n, n)


# --------------------------------------------------------------------------
# Plain-JAX glue ops
# --------------------------------------------------------------------------
def unfold(x, k, s, p):
    """PyTorch nn.Unfold semantics. x: (B,C,H,W) -> (B, C*k*k, L)."""
    B, C, H, W = x.shape
    xp = jnp.pad(x, ((0, 0), (0, 0), (p, p), (p, p)))
    Hp, Wp = H + 2 * p, W + 2 * p
    oh = (Hp - k) // s + 1
    ow = (Wp - k) // s + 1
    ri = (np.arange(oh) * s)[:, None] + np.arange(k)[None, :]
    ci = (np.arange(ow) * s)[:, None] + np.arange(k)[None, :]
    patches = xp[:, :, ri[:, :, None, None], ci[None, None, :, :]]  # (B,C,oh,k,ow,k)
    patches = jnp.transpose(patches, (0, 1, 3, 5, 2, 4))            # (B,C,k,k,oh,ow)
    return patches.reshape(B, C * k * k, oh * ow)


def nearest_resize_grid(tokens, s_src, s_dst):
    """Nearest-neighbor resize of a (B, s_src*s_src, C) token grid to s_dst."""
    B, _, C = tokens.shape
    g = tokens.reshape(B, s_src, s_src, C)
    idx = np.floor(np.arange(s_dst) * (s_src / s_dst)).astype(np.int32)
    g = g[:, idx][:, :, idx]
    return g.reshape(B, s_dst * s_dst, C)


def adaptive_avg_pool2d(x, out_size):
    """PyTorch AdaptiveAvgPool2d. x: (N, C, H, W) -> (N, C, out, out)."""
    _, _, H, W = x.shape

    def pool_matrix(in_sz, out_sz):
        P = np.zeros((out_sz, in_sz), np.float32)
        for i in range(out_sz):
            s = (i * in_sz) // out_sz
            e = -(-((i + 1) * in_sz) // out_sz)
            P[i, s:e] = 1.0 / (e - s)
        return jnp.asarray(P)

    Ph, Pw = pool_matrix(H, out_size), pool_matrix(W, out_size)
    return jnp.einsum('oi,ncij,pj->ncop', Ph, x.astype(F32), Pw)


def get_sinusoid_encoding(n_position, d_hid):
    position = np.arange(n_position)[:, None].astype(np.float64)
    hid = np.arange(d_hid)[None, :]
    angle = position / np.power(10000, 2 * (hid // 2) / d_hid)
    table = np.zeros((n_position, d_hid), np.float32)
    table[:, 0::2] = np.sin(angle[:, 0::2])
    table[:, 1::2] = np.cos(angle[:, 1::2])
    return jnp.asarray(table[None])  # (1, n_position, d_hid)


# --------------------------------------------------------------------------
# Parameter init (deterministic, synthetic)
# --------------------------------------------------------------------------
class KeyGen:
    def __init__(self, seed):
        self.key = jax.random.PRNGKey(seed)

    def __call__(self):
        self.key, k = jax.random.split(self.key)
        return k


def init_linear(kg, fan_in, fan_out, bias=True):
    # weights stored in bf16 (MXU operands); biases / LN params stay f32
    w = (0.02 * jax.random.normal(kg(), (fan_in, fan_out))).astype(BF16)
    b = jnp.zeros((fan_out,), F32) if bias else None
    return {"w": w, "b": b}


def init_ln(d):
    return {"g": jnp.ones((d,), F32), "b": jnp.zeros((d,), F32)}


def init_token_performer(kg, dim, in_dim=64, kernel_ratio=0.5):
    emb = in_dim
    m = int(emb * kernel_ratio)
    wr = jax.random.normal(kg(), (emb, m))
    q, _ = jnp.linalg.qr(wr)                        # orthonormal columns
    w = (q * math.sqrt(m)).astype(F32)              # stored as (emb, m): x @ w
    return {
        "norm1": init_ln(dim),
        "kqv": init_linear(kg, dim, 3 * emb),
        "proj": init_linear(kg, emb, emb),
        "norm2": init_ln(emb),
        "mlp_fc1": init_linear(kg, emb, emb),
        "mlp_fc2": init_linear(kg, emb, emb),
        "w": w, "emb": emb, "m": m,
    }


_T2T_CFG = {
    'performer': (7, 4, 2),
    'performer_less_token': (11, 6, 5),
    'performer_less_less_token': (14, 8, 3),
}


def _conv_out(size, k, s, p):
    return (size + 2 * p - k) // s + 1


def t2t_grids(img_size, tokens_type):
    k0, s0, p0 = _T2T_CFG[tokens_type]
    g0 = _conv_out(img_size, k0, s0, p0)
    g1 = _conv_out(g0, 3, 2, 1)
    g2 = _conv_out(g1, 3, 2, 1)
    return g0, g1, g2


def init_t2t_module(kg, tokens_type, in_chans=3, embed_dim=384, token_dim=64):
    k0, s0, p0 = _T2T_CFG[tokens_type]
    dim0 = in_chans * k0 * k0
    return {
        "cfg": (k0, s0, p0),
        "attention1": init_token_performer(kg, dim0, token_dim, 0.5),
        "attention2": init_token_performer(kg, token_dim * 3 * 3, token_dim, 0.5),
        "project": init_linear(kg, token_dim * 3 * 3, embed_dim),
    }


def init_block(kg, dim, num_heads, mlp_ratio, feature_reuse, reuse_dim=48):
    hidden = int(dim * mlp_ratio)
    p = {
        "norm1": init_ln(dim),
        "qkv": init_linear(kg, dim, dim * 3, bias=False),
        "proj": init_linear(kg, dim, dim),
        "norm2": init_ln(dim),
        "feature_reuse": feature_reuse,
    }
    if feature_reuse:
        # TODO(synk): exact DVT feature-reuse Mlp dims not in the provided reference.
        p["reuse_fc1"] = init_linear(kg, dim, dim // 2)
        p["reuse_fc2"] = init_linear(kg, dim // 2, reuse_dim)
        full = init_linear(kg, dim + reuse_dim, hidden)
        # pre-split fc1 weight so block_forward never slices weights on device
        p["mlp_fc1"] = {"w": full["w"][:dim], "b": full["b"]}
        p["mlp_fc1_extra_w"] = full["w"][dim:]
    else:
        p["mlp_fc1"] = init_linear(kg, dim, hidden)
    p["mlp_fc2"] = init_linear(kg, hidden, dim)
    return p


def init_t2t_vit(kg, img_size, tokens_type, num_classes, embed_dim=384, depth=14,
                 num_heads=6, mlp_ratio=3.0, token_dim=64, in_chans=3,
                 feature_reuse=False, relation_reuse=False):
    _, _, g2 = t2t_grids(img_size, tokens_type)
    num_patches = g2 * g2
    params = {
        "t2t": init_t2t_module(kg, tokens_type, in_chans, embed_dim, token_dim),
        "cls_token": (0.02 * jax.random.normal(kg(), (1, 1, embed_dim))).astype(F32),
        "pos_embed": get_sinusoid_encoding(num_patches + 1, embed_dim),
        "blocks": [init_block(kg, embed_dim, num_heads, mlp_ratio, feature_reuse)
                   for _ in range(depth)],
        "norm": init_ln(embed_dim),
        "head": init_linear(kg, embed_dim, num_classes),
        "num_heads": num_heads, "depth": depth, "num_patches": num_patches,
        "relation_reuse": relation_reuse, "feature_reuse": feature_reuse,
    }
    if relation_reuse:
        ch = num_heads * depth
        # stored (out, in) for the in-kernel left-multiplies over the spatial lane axis
        params["rr_conv1"] = {
            "w": (0.02 * jax.random.normal(kg(), (ch * 3, ch))).astype(BF16),
            "b": jnp.zeros((ch * 3,), F32)}
        params["rr_conv2"] = {
            "w": (0.02 * jax.random.normal(kg(), (ch, ch * 3))).astype(BF16),
            "b": jnp.zeros((ch,), F32)}
    return params


def init_dvt_t2t_vit_14(seed, img_size, num_classes):
    kg = KeyGen(seed)
    less_less = init_t2t_vit(kg, img_size, 'performer_less_less_token', num_classes,
                             feature_reuse=False, relation_reuse=False)
    less = init_t2t_vit(kg, img_size, 'performer_less_token', num_classes,
                        feature_reuse=True, relation_reuse=True)
    normal = init_t2t_vit(kg, img_size, 'performer', num_classes,
                          feature_reuse=True, relation_reuse=True)
    # dynamic_threshold: only T[7][stage] is ever read; 1.0 keeps every sample.
    T = {7: (1.0, 1.0)}
    return {"less_less": less_less, "less": less, "normal": normal, "T": T}


# --------------------------------------------------------------------------
# Forward passes
# --------------------------------------------------------------------------
def token_performer_forward(p, x):
    emb, m = p["emb"], p["m"]
    packed = ln_kqv_prm(x, (p["norm1"]["g"], p["norm1"]["b"]),
                        p["kqv"]["w"], p["kqv"]["b"], p["w"], emb, m)
    return performer_block(packed, p["proj"], p["norm2"],
                           p["mlp_fc1"], p["mlp_fc2"], emb, m)


def t2t_module_forward(p, x):
    k0, s0, p0 = p["cfg"]
    x = jnp.transpose(unfold(x, k0, s0, p0), (0, 2, 1)).astype(BF16)
    x = token_performer_forward(p["attention1"], x)
    B, L, C = x.shape
    g = int(round(math.sqrt(L)))
    x = jnp.transpose(x, (0, 2, 1)).reshape(B, C, g, g)
    x = jnp.transpose(unfold(x, 3, 2, 1), (0, 2, 1))
    x = token_performer_forward(p["attention2"], x)
    B, L, C = x.shape
    g = int(round(math.sqrt(L)))
    x = jnp.transpose(x, (0, 2, 1)).reshape(B, C, g, g)
    x = jnp.transpose(unfold(x, 3, 2, 1), (0, 2, 1))
    return fused_linear(x, p["project"]["w"], p["project"]["b"])


def block_forward(p, x, num_heads, features_to_be_reused=None,
                  relations_to_be_reused=None, want_rel=True):
    B, N, C = x.shape
    Dh = C // num_heads
    scale = Dh ** -0.5
    # LN1 fused into the qkv matmul; head split/merge folded into mha_attention
    qkv = fused_linear(x, p["qkv"]["w"], None,
                       ln=(p["norm1"]["g"], p["norm1"]["b"]))
    y, relation = mha_attention(qkv, relations_to_be_reused,
                                num_heads=num_heads, scale=scale, want_rel=want_rel)
    # proj + residual fused
    x = fused_linear(y, p["proj"]["w"], p["proj"]["b"], residual=x)

    extra, w1e = None, None
    if p["feature_reuse"] and features_to_be_reused is not None:
        # TODO(synk): DVT feature-reuse Block internals reconstructed (downsize +
        # nearest spatial upsample + concat at the MLP input).
        f = fused_mlp(features_to_be_reused,
                      p["reuse_fc1"]["w"], p["reuse_fc1"]["b"],
                      p["reuse_fc2"]["w"], p["reuse_fc2"]["b"])
        cls_f, patch_f = f[:, :1], f[:, 1:]
        s_src = int(round(math.sqrt(patch_f.shape[1])))
        s_dst = int(round(math.sqrt(N - 1)))
        patch_f = nearest_resize_grid(patch_f, s_src, s_dst)
        extra = jnp.concatenate([cls_f, patch_f], axis=1)
        w1e = p["mlp_fc1_extra_w"]
    # LN2 + fc1(+concat) + GELU + fc2 + residual in one kernel (hidden on-chip)
    x = fused_mlp(x, p["mlp_fc1"]["w"], p["mlp_fc1"]["b"],
                  p["mlp_fc2"]["w"], p["mlp_fc2"]["b"],
                  ln=(p["norm2"]["g"], p["norm2"]["b"]),
                  extra=extra, w1_extra=w1e, residual=True)
    return x, relation


def t2t_vit_forward(p, x, features_to_be_reused_list=None,
                    relations_to_be_reused_list=None, want_relation=True):
    B = x.shape[0]
    x = t2t_module_forward(p["t2t"], x)
    cls = jnp.broadcast_to(p["cls_token"].astype(x.dtype), (B, 1, x.shape[-1]))
    x = jnp.concatenate([cls, x], axis=1)
    x = (x.astype(F32) + p["pos_embed"]).astype(BF16)

    rel_chunks = None
    if relations_to_be_reused_list is not None:
        new_hw = x.shape[1] - 1
        r4 = rr_conv(relations_to_be_reused_list,              # (B, heads*depth, n, n)
                     p["rr_conv1"]["w"], p["rr_conv1"]["b"],
                     p["rr_conv2"]["w"], p["rr_conv2"]["b"])
        _, ch, n, _ = r4.shape
        hw = n - 1
        s_src = int(round(math.sqrt(hw)))
        s_dst = int(round(math.sqrt(new_hw)))
        rel_temp = r4[:, :, :, 1:].reshape(-1, n, s_src, s_src).astype(F32)
        rel_temp = jnp.repeat(jnp.repeat(rel_temp, 2, axis=-2), 2, axis=-1)  # nearest x2
        rel_temp = adaptive_avg_pool2d(rel_temp, s_dst).reshape(-1, n, new_hw)
        rel_temp = jnp.concatenate(
            [r4[:, :, :, 0].reshape(-1, n, 1).astype(F32), rel_temp], axis=2)
        rel_temp = jnp.transpose(rel_temp, (0, 2, 1))
        rel_cls = rel_temp[:, :, 0:1]
        rel_temp = rel_temp[:, :, 1:].reshape(-1, new_hw + 1, s_src, s_src)
        rel_temp = jnp.repeat(jnp.repeat(rel_temp, 2, axis=-2), 2, axis=-1)
        rel_temp = adaptive_avg_pool2d(rel_temp, s_dst).reshape(-1, new_hw + 1, new_hw)
        rel_temp = jnp.concatenate([rel_cls, rel_temp], axis=2)
        rel_temp = jnp.transpose(rel_temp, (0, 2, 1)).reshape(
            B, -1, new_hw + 1, new_hw + 1).astype(BF16)
        rel_chunks = jnp.split(rel_temp, p["depth"], axis=1)

    relation_list = []
    for i, blk in enumerate(p["blocks"]):
        feat = (features_to_be_reused_list[0]
                if features_to_be_reused_list is not None else None)
        rel = rel_chunks[i] if rel_chunks is not None else None
        x, relation = block_forward(blk, x, p["num_heads"], feat, rel,
                                    want_rel=want_relation)
        if want_relation:
            relation_list.append(relation)
    feature_list = [x]
    # final norm only needs the cls token for the head (identical result)
    logits = fused_linear(x[:, 0], p["head"]["w"], p["head"]["b"],
                          ln=(p["norm"]["g"], p["norm"]["b"]), out_dtype=F32)
    relation_cat = jnp.concatenate(relation_list, axis=1) if want_relation else None
    return logits, feature_list, relation_cat


def resize_batch(T, x, features_list, relations, output, n_stage):
    st = jax.nn.softmax(output, axis=1)
    max_preds = jnp.max(st, axis=1)
    # data-dependent batch filtering -> evaluated eagerly (not inside a kernel)
    idx = jnp.nonzero(max_preds <= T[7][n_stage])[0]
    return x[idx], [features_list[0][idx]], relations[idx]


def dvt_forward(params, x):
    # feature_reuse == True and relation_reuse == True branch of the reference.
    tl = []
    t0 = time.perf_counter()
    llt_out, f_list, r_cat = t2t_vit_forward(params["less_less"], x, None, None,
                                             want_relation=True)
    tl.append(time.perf_counter() - t0)
    x, f_list, r_cat = resize_batch(params["T"], x, f_list, r_cat, llt_out, 0)
    if x.shape[0] == 0:
        return llt_out, [], [], tl
    lt_out, f_list, r_cat = t2t_vit_forward(params["less"], x, f_list, r_cat,
                                            want_relation=True)
    tl.append(time.perf_counter() - t0)
    x, f_list, r_cat = resize_batch(params["T"], x, f_list, r_cat, lt_out, 1)
    if x.shape[0] == 0:
        return llt_out, lt_out, [], tl
    # the final stage's relation_cat is never consumed -> don't emit/store it
    normal_out, _, _ = t2t_vit_forward(params["normal"], x, f_list, r_cat,
                                       want_relation=False)
    tl.append(time.perf_counter() - t0)
    return llt_out, lt_out, normal_out, tl


# --------------------------------------------------------------------------
if __name__ == "__main__":
    # Small-but-consistent geometry: img_size=64 gives token grids
    #   less_less: 8->4->2 (4+1 tokens), less: 11->6->3 (9+1), normal: 16->8->4 (16+1).
    B, C, H, W = 2, 3, 64, 64
    key = jax.random.PRNGKey(0)
    x = jax.random.normal(key, (B, C, H, W), dtype=F32)   # layout: NCHW, like PyTorch

    params = init_dvt_t2t_vit_14(seed=0, img_size=H, num_classes=10)

    llt_out, lt_out, normal_out, tl = dvt_forward(params, x)
    jax.block_until_ready((llt_out, lt_out, normal_out))
    assert llt_out.shape == (B, 10) and lt_out.shape[1] == 10 and normal_out.shape[1] == 10
    print("KERNEL_OK")
</pallas_src>

<mosaic_0001>
module attributes {stable_mosaic.version = 11 : i64} {
  func.func @_ln_kqv_prm_kernel(%arg0: i32, %arg1: memref<128x588xbf16, #tpu.memory_space<vmem>>, %arg2: memref<1x588xf32, #tpu.memory_space<vmem>>, %arg3: memref<1x588xf32, #tpu.memory_space<vmem>>, %arg4: memref<588x192xbf16, #tpu.memory_space<vmem>>, %arg5: memref<1x192xf32, #tpu.memory_space<vmem>>, %arg6: memref<64x32xf32, #tpu.memory_space<vmem>>, %arg7: memref<128x128xbf16, #tpu.memory_space<vmem>>) attributes {dimension_semantics = [#tpu.dimension_semantics<parallel>], iteration_bounds = array<i64: 1>, scalar_prefetch = 0 : i64, scratch_operands = 0 : i64, tpu.core_type = #tpu.core_type<tc>, window_params = [{transform_indices = @transform_0, window_bounds = array<i64: 128, 588>}, {pipeline_mode = #tpu.pipeline_mode<synchronous>, transform_indices = @transform_1, window_bounds = array<i64: 1, 588>}, {pipeline_mode = #tpu.pipeline_mode<synchronous>, transform_indices = @transform_2, window_bounds = array<i64: 1, 588>}, {pipeline_mode = #tpu.pipeline_mode<synchronous>, transform_indices = @transform_3, window_bounds = array<i64: 588, 192>}, {pipeline_mode = #tpu.pipeline_mode<synchronous>, transform_indices = @transform_4, window_bounds = array<i64: 1, 192>}, {pipeline_mode = #tpu.pipeline_mode<synchronous>, transform_indices = @transform_5, window_bounds = array<i64: 64, 32>}, {transform_indices = @transform_6, window_bounds = array<i64: 128, 128>}]} {
    %c0 = arith.constant 0 : index
    %c0_0 = arith.constant 0 : index
    %0 = vector.load %arg1[%c0, %c0_0] : memref<128x588xbf16, #tpu.memory_space<vmem>>, vector<128x588xbf16>
    %1 = arith.extf %0 : vector<128x588xbf16> to vector<128x588xf32>
    %c0_1 = arith.constant 0 : index
    %c0_2 = arith.constant 0 : index
    %2 = vector.load %arg2[%c0_1, %c0_2] : memref<1x588xf32, #tpu.memory_space<vmem>>, vector<1x588xf32>
    %c0_3 = arith.constant 0 : index
    %c0_4 = arith.constant 0 : index
    %3 = vector.load %arg3[%c0_3, %c0_4] : memref<1x588xf32, #tpu.memory_space<vmem>>, vector<1x588xf32>
    %cst = arith.constant dense<0.000000e+00> : vector<128xf32>
    %4 = vector.multi_reduction <add>, %1, %cst [1] : vector<128x588xf32> to vector<128xf32>
    %5 = vector.shape_cast %4 : vector<128xf32> to vector<128x1xf32>
    %cst_5 = arith.constant 5.880000e+02 : f32
    %6 = vector.broadcast %cst_5 : f32 to vector<128x1xf32>
    %7 = arith.divf %5, %6 : vector<128x1xf32>
    %8 = vector.broadcast %7 : vector<128x1xf32> to vector<128x588xf32>
    %9 = arith.subf %1, %8 : vector<128x588xf32>
    %10 = arith.mulf %9, %9 : vector<128x588xf32>
    %cst_6 = arith.constant dense<0.000000e+00> : vector<128xf32>
    %11 = vector.multi_reduction <add>, %10, %cst_6 [1] : vector<128x588xf32> to vector<128xf32>
    %12 = vector.shape_cast %11 : vector<128xf32> to vector<128x1xf32>
    %cst_7 = arith.constant 5.880000e+02 : f32
    %13 = vector.broadcast %cst_7 : f32 to vector<128x1xf32>
    %14 = arith.divf %12, %13 : vector<128x1xf32>
    %cst_8 = arith.constant 9.99999974E-6 : f32
    %15 = vector.broadcast %cst_8 : f32 to vector<128x1xf32>
    %16 = arith.addf %14, %15 : vector<128x1xf32>
    %17 = math.rsqrt %16 : vector<128x1xf32>
    %18 = vector.broadcast %17 : vector<128x1xf32> to vector<128x588xf32>
    %19 = arith.mulf %9, %18 : vector<128x588xf32>
    %20 = vector.broadcast %2 : vector<1x588xf32> to vector<128x588xf32>
    %21 = arith.mulf %19, %20 : vector<128x588xf32>
    %22 = vector.broadcast %3 : vector<1x588xf32> to vector<128x588xf32>
    %23 = arith.addf %21, %22 : vector<128x588xf32>
    %24 = arith.truncf %23 : vector<128x588xf32> to vector<128x588xbf16>
    %c0_9 = arith.constant 0 : index
    %c0_10 = arith.constant 0 : index
    %25 = vector.load %arg4[%c0_9, %c0_10] : memref<588x192xbf16, #tpu.memory_space<vmem>>, vector<588x192xbf16>
    %cst_11 = arith.constant dense<0.000000e+00> : vector<128x192xf32>
    %26 = tpu.matmul %24, %25, %cst_11 {dimension_numbers = #tpu.dot_dimension_numbers<[1], [0], [0], [1], [0, 0, 1, 1], [], []>} : vector<128x588xbf16>, vector<588x192xbf16>, vector<128x192xf32> -> vector<128x192xf32>
    %c0_12 = arith.constant 0 : index
    %c0_13 = arith.constant 0 : index
    %27 = vector.load %arg5[%c0_12, %c0_13] : memref<1x192xf32, #tpu.memory_space<vmem>>, vector<1x192xf32>
    %28 = vector.broadcast %27 : vector<1x192xf32> to vector<128x192xf32>
    %29 = arith.addf %26, %28 : vector<128x192xf32>
    %30 = vector.extract_strided_slice %29 {offsets = [0, 0], sizes = [128, 64], strides = [1, 1]} : vector<128x192xf32> to vector<128x64xf32>
    %31 = vector.extract_strided_slice %29 {offsets = [0, 64], sizes = [128, 64], strides = [1, 1]} : vector<128x192xf32> to vector<128x64xf32>
    %32 = vector.extract_strided_slice %29 {offsets = [0, 128], sizes = [128, 64], strides = [1, 1]} : vector<128x192xf32> to vector<128x64xf32>
    %c0_14 = arith.constant 0 : index
    %c0_15 = arith.constant 0 : index
    %33 = vector.load %arg6[%c0_14, %c0_15] : memref<64x32xf32, #tpu.memory_space<vmem>>, vector<64x32xf32>
    %cst_16 = arith.constant dense<0.000000e+00> : vector<128x32xf32>
    %34 = tpu.matmul %30, %33, %cst_16 {dimension_numbers = #tpu.dot_dimension_numbers<[1], [0], [0], [1], [0, 0, 1, 1], [], []>} : vector<128x64xf32>, vector<64x32xf32>, vector<128x32xf32> -> vector<128x32xf32>
    %35 = arith.mulf %30, %30 : vector<128x64xf32>
    %cst_17 = arith.constant dense<0.000000e+00> : vector<128xf32>
    %36 = vector.multi_reduction <add>, %35, %cst_17 [1] : vector<128x64xf32> to vector<128xf32>
    %37 = vector.shape_cast %36 : vector<128xf32> to vector<128x1xf32>
    %cst_18 = arith.constant 5.000000e-01 : f32
    %38 = vector.broadcast %cst_18 : f32 to vector<128x1xf32>
    %39 = arith.mulf %38, %37 : vector<128x1xf32>
    %40 = vector.broadcast %39 : vector<128x1xf32> to vector<128x32xf32>
    %41 = arith.subf %34, %40 : vector<128x32xf32>
    %42 = math.exp %41 : vector<128x32xf32>
    %cst_19 = arith.constant 0.176776692 : f32
    %43 = vector.broadcast %cst_19 : f32 to vector<128x32xf32>
    %44 = arith.mulf %42, %43 : vector<128x32xf32>
    %cst_20 = arith.constant dense<0.000000e+00> : vector<128x32xf32>
    %45 = tpu.matmul %31, %33, %cst_20 {dimension_numbers = #tpu.dot_dimension_numbers<[1], [0], [0], [1], [0, 0, 1, 1], [], []>} : vector<128x64xf32>, vector<64x32xf32>, vector<128x32xf32> -> vector<128x32xf32>
    %46 = arith.mulf %31, %31 : vector<128x64xf32>
    %cst_21 = arith.constant dense<0.000000e+00> : vector<128xf32>
    %47 = vector.multi_reduction <add>, %46, %cst_21 [1] : vector<128x64xf32> to vector<128xf32>
    %48 = vector.shape_cast %47 : vector<128xf32> to vector<128x1xf32>
    %cst_22 = arith.constant 5.000000e-01 : f32
    %49 = vector.broadcast %cst_22 : f32 to vector<128x1xf32>
    %50 = arith.mulf %49, %48 : vector<128x1xf32>
    %51 = vector.broadcast %50 : vector<128x1xf32> to vector<128x32xf32>
    %52 = arith.subf %45, %51 : vector<128x32xf32>
    %53 = math.exp %52 : vector<128x32xf32>
    %cst_23 = arith.constant 0.176776692 : f32
    %54 = vector.broadcast %cst_23 : f32 to vector<128x32xf32>
    %55 = arith.mulf %53, %54 : vector<128x32xf32>
    %56 = tpu.concatenate %32, %55, %44 in 1 : vector<128x64xf32>, vector<128x32xf32>, vector<128x32xf32> -> vector<128x128xf32>
    %57 = arith.truncf %56 : vector<128x128xf32> to vector<128x128xbf16>
    %c0_24 = arith.constant 0 : index
    %c0_25 = arith.constant 0 : index
    %58 = vector.load %arg7[%c0_24, %c0_25] : memref<128x128xbf16, #tpu.memory_space<vmem>>, vector<128x128xbf16>
    tpu.vector_store %arg7[%c0_24, %c0_25], %57 {strides = array<i32>} : memref<128x128xbf16, #tpu.memory_space<vmem>>, vector<128x128xbf16>,
    return
  }
  func.func @transform_0(%arg0: i32) -> (i32, i32) {
    %c0_i32 = arith.constant 0 : i32
    %c0_i32_0 = arith.constant 0 : i32
    return %arg0, %c0_i32 : i32, i32
  }
  func.func @transform_1(%arg0: i32) -> (i32, i32) {
    %c0_i32 = arith.constant 0 : i32
    %c0_i32_0 = arith.constant 0 : i32
    %c0_i32_1 = arith.constant 0 : i32
    return %c0_i32, %c0_i32_0 : i32, i32
  }
  func.func @transform_2(%arg0: i32) -> (i32, i32) {
    %c0_i32 = arith.constant 0 : i32
    %c0_i32_0 = arith.constant 0 : i32
    %c0_i32_1 = arith.constant 0 : i32
    return %c0_i32, %c0_i32_0 : i32, i32
  }
  func.func @transform_3(%arg0: i32) -> (i32, i32) {
    %c0_i32 = arith.constant 0 : i32
    %c0_i32_0 = arith.constant 0 : i32
    %c0_i32_1 = arith.constant 0 : i32
    return %c0_i32, %c0_i32_0 : i32, i32
  }
  func.func @transform_4(%arg0: i32) -> (i32, i32) {
    %c0_i32 = arith.constant 0 : i32
    %c0_i32_0 = arith.constant 0 : i32
    %c0_i32_1 = arith.constant 0 : i32
    return %c0_i32, %c0_i32_0 : i32, i32
  }
  func.func @transform_5(%arg0: i32) -> (i32, i32) {
    %c0_i32 = arith.constant 0 : i32
    %c0_i32_0 = arith.constant 0 : i32
    %c0_i32_1 = arith.constant 0 : i32
    return %c0_i32, %c0_i32_0 : i32, i32
  }
  func.func @transform_6(%arg0: i32) -> (i32, i32) {
    %c0_i32 = arith.constant 0 : i32
    %c0_i32_0 = arith.constant 0 : i32
    return %arg0, %c0_i32 : i32, i32
  }
}

</mosaic_0001>

<bundles_post_ra>
// kernel: tpu_custom_call.1
= control target key start
LH: loop header
LB: loop body
LE: loop exit
PB: predicated region body
PF: predicated region fallthrough
CT: control target
= control target key end

     0   :  { %vm158_vm0 = vcmask 621568   ;;  %s6544_s0 = inlined_call_operand.vmem [shape: bf16[128,588], index: 0, kind: input, shape index: {}]   ;;  %s6545_s1 = inlined_call_operand.vmem [shape: f32[1,588], index: 1, kind: input, shape index: {}]   ;;  %s6546_s2 = inlined_call_operand.vmem [shape: f32[1,588], index: 2, kind: input, shape index: {}]   ;;  %s6547_s3 = inlined_call_operand.vmem [shape: bf16[588,192], index: 3, kind: input, shape index: {}]   ;;  %s6548_s4 = inlined_call_operand.vmem [shape: f32[1,192], index: 4, kind: input, shape index: {}]   ;;  %s6549_s5 = inlined_call_operand.vmem [shape: f32[64,32], index: 5, kind: input, shape index: {}]   ;;  %s6550_s6 = inlined_call_operand.hbm [shape: bf16[128,128], index: 6, kind: output, shape index: {}]  }
   0x1   :  { %v3542_v0 = vld [vmem:[%s6544_s0 + $0x28] sm:$0xff]  ;;  %v3547_v1 = vld [vmem:[%s6544_s0 + $0x30] sm:$0xff]  ;;  %v3552_v2 = vld [vmem:[%s6544_s0 + $0x38] sm:$0xf] }
   0x2   :  { %v83_v3 = vunpack.c.l.bf16 %v3542_v0  ;;  %v84_v4 = vunpack.c.h.bf16 %v3542_v0  ;;  %v85_v5 = vunpack.c.l.bf16 %v3547_v1  ;;  %v3560_v6 = vld [vmem:[%s6544_s0] sm:$0xff]  ;;  %v3565_v7 = vld [vmem:[%s6544_s0 + $0x8] sm:$0xff]  ;;  %v3570_v8 = vld [vmem:[%s6544_s0 + $0x10] sm:$0xf]  ;;  %v87_v9 = vunpack.c.l.bf16 %v3552_v2 }
   0x3   :  { %v73_v10 = vunpack.c.l.bf16 %v3560_v6  ;;  %v74_v11 = vunpack.c.h.bf16 %v3560_v6  ;;  %v75_v12 = vunpack.c.l.bf16 %v3565_v7  ;;  %v3579_v13 = vld [vmem:[%s6544_s0 + $0x3c] sm:$0xff]  ;;  %v3584_v14 = vld [vmem:[%s6544_s0 + $0x44] sm:$0xff]  ;;  %v3589_v15 = vld [vmem:[%s6544_s0 + $0x4c] sm:$0xf]  ;;  %v86_v16 = vunpack.c.h.bf16 %v3547_v1 }
   0x4   :  { %v170_v17 = vadd.f32 %v84_v4, %v83_v3  ;;  %v77_v18 = vunpack.c.l.bf16 %v3570_v8  ;;  %v6595_v19 = vunpack.c.l.bf16 %v3579_v13  ;;  %v3601_v20 = vld [vmem:[%s6544_s0 + $0x14] sm:$0xff]  ;;  %v76_v21 = vunpack.c.h.bf16 %v3565_v7  ;;  %v3613_v25 = vld [vmem:[%s6544_s0 + $0x1c] sm:$0xff]  ;;  %v3625_v30 = vld [vmem:[%s6544_s0 + $0x24] sm:$0xf] }
   0x5   :  { %v155_v22 = vadd.f32 %v74_v11, %v73_v10  ;;  %v6594_v23 = vunpack.c.h.bf16 %v3579_v13  ;;  %v6593_v24 = vunpack.c.l.bf16 %v3584_v14  ;;  %v173_v27 = vsel %vm158_vm0, %v87_v9, 0.0  ;;  %v3638_v35 = vld [vmem:[%s6544_s0 + $0x50] sm:$0xff]  ;;  %v3643_v36 = vld [vmem:[%s6544_s0 + $0x58] sm:$0xff]  ;;  %v3664_v45 = vld [vmem:[%s6544_s0 + $0x60] sm:$0xf] }
   0x6   :  { %v171_v26 = vadd.f32 %v170_v17, %v85_v5  ;;  %v6592_v28 = vunpack.c.h.bf16 %v3584_v14  ;;  %v6589_v29 = vunpack.c.l.bf16 %v3589_v15  ;;  %v6586_v33 = vunpack.c.l.bf16 %v3601_v20  ;;  %v3669_v46 = vld [vmem:[%s6544_s0 + $0x64] sm:$0xff]  ;;  %v3677_v51 = vld [vmem:[%s6544_s0 + $0x6c] sm:$0xff] }
   0x7   :  { %v156_v31 = vadd.f32 %v155_v22, %v75_v12  ;;  %v177_v32 = vadd.f32 %v6594_v23, %v6595_v19  ;;  %v6585_v34 = vunpack.c.h.bf16 %v3601_v20  ;;  %v159_v38 = vsel %vm158_vm0, %v77_v18, 0.0 }
   0x8   :  { %v172_v37 = vadd.f32 %v171_v26, %v86_v16  ;;  %v6583_v39 = vunpack.c.l.bf16 %v3613_v25  ;;  %v6562_v40 = vunpack.c.h.bf16 %v3613_v25  ;;  %v6561_v43 = vunpack.c.l.bf16 %v3625_v30 }
   0x9   :  { %v157_v41 = vadd.f32 %v156_v31, %v76_v21  ;;  %v178_v42 = vadd.f32 %v177_v32, %v6593_v24  ;;  %v163_v44 = vadd.f32 %v6585_v34, %v6586_v33  ;;  %v6560_v48 = vunpack.c.l.bf16 %v3638_v35 }
   0xa   :  { %v174_v47 = vadd.f32 %v173_v27, %v172_v37  ;;  %v6557_v49 = vunpack.c.h.bf16 %v3638_v35  ;;  %v6556_v50 = vunpack.c.l.bf16 %v3643_v36 }
   0xb   :  { %11 = vsyncpa [#allocation3], 0  ;;  %v160_v52 = vadd.f32 %v159_v38, %v157_v41  ;;  %v179_v53 = vadd.f32 %v178_v42, %v6592_v28  ;;  %v180_v54 = vsel %vm158_vm0, %v6589_v29, 0.0  ;;  %v164_v55 = vadd.f32 %v163_v44, %v6583_v39  ;;  %v3696_v60 = vld [vmem:[%s6544_s0 + $0x78] sm:$0xff]  ;;  %v3706_v63 = vld [vmem:[%s6544_s0 + $0x74] sm:$0xf] }
   0xc   :  { %175 = vadd.xlane.f32.xlu1 %v174_v47  ;;  %v6554_v56 = vunpack.c.h.bf16 %v3643_v36  ;;  %v6553_v57 = vunpack.c.l.bf16 %v3664_v45  ;;  %v184_v58 = vadd.f32 %v6557_v49, %v6560_v48  ;;  %v6552_v59 = vunpack.c.l.bf16 %v3669_v46  ;;  %v3713_v26 = vld [vmem:[%s6544_s0 + $0x80] sm:$0xff]  ;;  %v3723_v37 = vld [vmem:[%s6544_s0 + $0x8c] sm:$0xff]  ;;  %v3733_v42 = vld [vmem:[%s6544_s0 + $0x88] sm:$0xf]  ;;  %s3500_s24 = smov 64   ;;  %s3503_s28 = smov 4  }
   0xd   :  { %161 = vadd.xlane.f32.xlu0 %v160_v52  ;;  %v165_v61 = vadd.f32 %v164_v55, %v6562_v40  ;;  %v166_v62 = vsel %vm158_vm0, %v6561_v43, 0.0  ;;  %v6551_v17 = vunpack.c.h.bf16 %v3669_v46  ;;  %v6555_v22 = vunpack.c.l.bf16 %v3677_v51  ;;  %v3740_v52 = vld [vmem:[%s6544_s0 + $0x94] sm:$0xff] }
   0xe   :  { %v181_v27 = vadd.f32 %v180_v54, %v179_v53  ;;  %v185_v31 = vadd.f32 %v184_v58, %v6556_v50  ;;  %v187_v32 = vsel %vm158_vm0, %v6553_v57, 0.0  ;;  %v6570_v38 = vunpack.c.h.bf16 %v3677_v51 }
   0xf   :  { %v191_v41 = vadd.f32 %v6551_v17, %v6552_v59  ;;  %v6559_v44 = vunpack.c.l.bf16 %v3696_v60  ;;  %v6558_v47 = vunpack.c.h.bf16 %v3696_v60  ;;  %v167_v53 = vadd.f32 %v166_v62, %v165_v61  ;;  %v3749_v17 = vld [vmem:[%s6544_s0 + $0x9c] sm:$0xf] }
  0x10   :  { %v186_v54 = vadd.f32 %v185_v31, %v6554_v56  ;;  %v6569_v55 = vunpack.c.l.bf16 %v3706_v63  ;;  %v6568_v58 = vunpack.c.l.bf16 %v3713_v26  ;;  %v6565_v57 = vunpack.c.h.bf16 %v3713_v26  ;;  %v3762_v31 = vld [vmem:[%s6544_s0 + $0xa0] sm:$0xff]  ;;  %v3767_v56 = vld [vmem:[%s6544_s0 + $0xa8] sm:$0xff] }
  0x11   :  { %v192_v59 = vadd.f32 %v191_v41, %v6555_v22  ;;  %v198_v61 = vadd.f32 %v6558_v47, %v6559_v44  ;;  %v6564_v62 = vunpack.c.l.bf16 %v3723_v37  ;;  %v6566_v22 = vunpack.c.l.bf16 %v3733_v42 }
  0x12   :  { %v188_v41 = vadd.f32 %v187_v32, %v186_v54  ;;  %v6563_v50 = vunpack.c.h.bf16 %v3723_v37  ;;  %v6567_v49 = vunpack.c.l.bf16 %v3740_v52  ;;  %v6580_v48 = vunpack.c.h.bf16 %v3740_v52 }
  0x13   :  { %v193_v47 = vadd.f32 %v192_v59, %v6570_v38  ;;  %v199_v44 = vadd.f32 %v198_v61, %v6568_v58  ;;  %v6579_v43 = vunpack.c.l.bf16 %v3749_v17  ;;  %v6572_v54 = vunpack.c.l.bf16 %v3762_v31 }
  0x14   :  { %182 = vadd.xlane.f32.xlu1 %v181_v27  ;;  %189 = vadd.xlane.f32.xlu2 %v188_v41  ;;  %v205_v32 = vadd.f32 %v6563_v50, %v6564_v62  ;;  %v6571_v40 = vunpack.c.h.bf16 %v3762_v31  ;;  %v6577_v59 = vunpack.c.l.bf16 %v3767_v56  ;;  %v194_v61 = vsel %vm158_vm0, %v6569_v55, 0.0  ;;  %v3798_v62 = vld [vmem:[%s6544_s0 + $0xb0] sm:$0xf] }
  0x15   :  { %168 = vadd.xlane.f32.xlu0 %v167_v53  ;;  %v200_v27 = vadd.f32 %v199_v44, %v6565_v57  ;;  %v201_v41 = vsel %vm158_vm0, %v6566_v22, 0.0  ;;  %v208_v44 = vsel %vm158_vm0, %v6579_v43, 0.0  ;;  %v195_v57 = vadd.f32 %v194_v61, %v193_v47 }
  0x16   :  { %v206_v50 = vadd.f32 %v205_v32, %v6567_v49  ;;  %v212_v53 = vadd.f32 %v6571_v40, %v6572_v54  ;;  %v6576_v32 = vunpack.c.h.bf16 %v3767_v56  ;;  %v6575_v55 = vunpack.c.l.bf16 %v3798_v62 }
  0x17   :  { %v202_v58 = vadd.f32 %v201_v41, %v200_v27  ;;  %v3499_v61 = vmov 588.0   ;;  %v3821_v27 = vld [vmem:[%s6544_s0 + $0xb4] sm:$0xff] }
  0x18   :  { %v207_v22 = vadd.f32 %v206_v50, %v6580_v48  ;;  %v213_v49 = vadd.f32 %v212_v53, %v6577_v59  ;;  %v215_v47 = vsel %vm158_vm0, %v6575_v55, 0.0  ;;  %3374 = vrcp.f32 %v3499_v61 }
  0x1a   :  { %v209_v38 = vadd.f32 %v208_v44, %v207_v22  ;;  %v214_v40 = vadd.f32 %v213_v49, %v6576_v32  ;;  %v6574_v22 = vunpack.c.l.bf16 %v3821_v27  ;;  %v6573_v49 = vunpack.c.h.bf16 %v3821_v27  ;;  %v3838_v44 = vld [vmem:[%s6544_s0 + $0xc4] sm:$0xf] }
  0x1c   :  { %196 = vadd.xlane.f32.xlu2 %v195_v57  ;;  %210 = vadd.xlane.f32.xlu1 %v209_v38  ;;  %v216_v50 = vadd.f32 %v215_v47, %v214_v40  ;;  %v3828_v38 = vld [vmem:[%s6544_s0 + $0xbc] sm:$0xff]  ;;  %v219_v41 = vadd.f32 %v6573_v49, %v6574_v22  ;;  %v3843_v47 = vld [vmem:[%s6544_s0 + $0xc8] sm:$0xff]  ;;  %v3854_v22 = vld [vmem:[%s6544_s0 + $0xd0] sm:$0xff] }
  0x1d   :  { %203 = vadd.xlane.f32.xlu0 %v202_v58  ;;  %v6578_v58 = vunpack.c.l.bf16 %v3828_v38  ;;  %v6581_v49 = vunpack.c.h.bf16 %v3843_v47  ;;  %v6587_v32 = vunpack.c.l.bf16 %v3854_v22  ;;  %v6591_v43 = vunpack.c.h.bf16 %v3854_v22 }
  0x1e   :  { %v3375_v54 = vpop.eup %3374 }
  0x1f   :  { %v269_v57 = vmul.f32 588.0, %v3375_v54  ;;  %v220_v61 = vadd.f32 %v219_v41, %v6578_v58  ;;  %vm273_vm1 = vweird.f32 %v3375_v54  ;;  %v3866_v58 = vld [vmem:[%s6544_s0 + $0xd8] sm:$0xf] }
  0x21   :  { %v270_v40 = vsub.f32 1.0, %v269_v57  ;;  %v6582_v57 = vunpack.c.l.bf16 %v3843_v47 }
  0x23   :  { %v271_v53 = vmul.f32 %v3375_v54, %v270_v40  ;;  %v6588_v40 = vunpack.c.l.bf16 %v3838_v44  ;;  %v226_v59 = vadd.f32 %v6581_v49, %v6582_v57  ;;  %v6590_v49 = vunpack.c.l.bf16 %v3866_v58 }
  0x24   :  { %217 = vadd.xlane.f32.xlu1 %v216_v50  ;;  %v6584_v50 = vunpack.c.h.bf16 %v3828_v38 }
  0x25   :  { %v272_v55 = vadd.f32 %v3375_v54, %v271_v53  ;;  %v227_v53 = vadd.f32 %v226_v59, %v6587_v32  ;;  %v222_v48 = vsel %vm158_vm0, %v6588_v40, 0.0 }
  0x26   :  { %v221_v41 = vadd.f32 %v220_v61, %v6584_v50  ;;  %v3880_v61 = vld [vmem:[%s6544_s0 + $0x104] sm:$0xff] }
  0x27   :  { %v3875_v57 = vsel %vm273_vm1, %v3375_v54, %v272_v55  ;;  %v228_v59 = vadd.f32 %v227_v53, %v6591_v43  ;;  %v229_v55 = vsel %vm158_vm0, %v6590_v49, 0.0  ;;  %v6600_v54 = vunpack.c.l.bf16 %v3880_v61 }
  0x28   :  { %v3883_v33 = vadd.f32 %v222_v48, %v221_v41  ;;  %v6599_v40 = vunpack.c.h.bf16 %v3880_v61  ;;  %v3912_v41 = vld [vmem:[%s6544_s0 + $0x10c] sm:$0xff] }
  0x7f   :  { %v176_v39 = vpop.xlane.xlu1 %175 }
  0x80   :  { %v277_v50 = vmul.f32 %v3875_v57, %v176_v39  ;;  %v162_v34 = vpop.xlane.xlu0 %161 }
  0x81   :  { %v275_v32 = vmul.f32 %v3875_v57, %v162_v34 }
  0x82   :  { %v3895_v29 = vsub.f32 %v83_v3, %v277_v50  ;;  %v3899_v39 = vsub.f32 %v84_v4, %v277_v50  ;;  %v3903_v48 = vsub.f32 %v85_v5, %v277_v50  ;;  %v3907_v34 = vsub.f32 %v86_v16, %v277_v50  ;;  %v3933_v5 = vld [vmem:[%s6544_s0 + $0x114] sm:$0xf] }
  0x83   :  { %v3916_v3 = vsub.f32 %v73_v10, %v275_v32  ;;  %v3920_v0 = vsub.f32 %v74_v11, %v275_v32  ;;  %v3924_v4 = vsub.f32 %v75_v12, %v275_v32  ;;  %v3928_v1 = vsub.f32 %v76_v21, %v275_v32 }
  0x84   :  { %6685 = vst [vmem:[#allocation5_spill] sm:$0xff] %v3899_v39  ;;  %v3937_v10 = vsub.f32 %v77_v18, %v275_v32  ;;  %v3941_v6 = vsub.f32 %v87_v9, %v277_v50  ;;  %v381_v11 = vmul.f32 %v3895_v29, %v3895_v29  ;;  %v382_v7 = vmul.f32 %v3899_v39, %v3899_v39 }
  0x85   :  { %6686 = vst [vmem:[#allocation6_spill] sm:$0xff] %v3903_v48  ;;  %v371_v12 = vmul.f32 %v3916_v3, %v3916_v3  ;;  %v372_v16 = vmul.f32 %v3920_v0, %v3920_v0  ;;  %v3951_v21 = vadd.f32 %v229_v55, %v228_v59  ;;  %v373_v2 = vmul.f32 %v3924_v4, %v3924_v4 }
  0x86   :  { %6687 = vst [vmem:[#allocation7_spill] sm:$0xff] %v3907_v34  ;;  %v375_v9 = vmul.f32 %v3937_v10, %v3937_v10  ;;  %v374_v53 = vmul.f32 %v3928_v1, %v3928_v1  ;;  %v383_v59 = vmul.f32 %v3903_v48, %v3903_v48  ;;  %v3966_v55 = vmul.f32 %v3907_v34, %v3907_v34 }
  0x87   :  { %6688 = vst [vmem:[#allocation8_spill] sm:$0xff] %v3937_v10  ;;  %v183_v50 = vpop.xlane.xlu1 %182  ;;  %v451_v49 = vadd.f32 %v372_v16, %v371_v12  ;;  %v190_v43 = vpop.xlane.xlu2 %189  ;;  %v385_v18 = vmul.f32 %v3941_v6, %v3941_v6  ;;  %v465_v32 = vadd.f32 %v382_v7, %v381_v11  ;;  %v247_v12 = vadd.f32 %v6599_v40, %v6600_v54 }
  0x88   :  { %6689 = vst [vmem:[#allocation9_spill] sm:$0xff] %v3941_v6  ;;  %v278_v8 = vmul.f32 %v3875_v57, %v183_v50  ;;  %v169_v28 = vpop.xlane.xlu0 %168  ;;  %v454_v23 = vsel %vm158_vm0, %v375_v9, 0.0  ;;  %v279_v19 = vmul.f32 %v3875_v57, %v190_v43  ;;  %v6690_v10 = vunpack.c.l.bf16 %v3579_v13 }
  0x89   :  { %v276_v16 = vmul.f32 %v3875_v57, %v169_v28  ;;  %v452_v24 = vadd.f32 %v451_v49, %v373_v2  ;;  %v6691_v34 = vunpack.c.h.bf16 %v3579_v13  ;;  %v6693_v11 = vunpack.c.l.bf16 %v3584_v14 }
  0x8a   :  { %v3980_v50 = vsub.f32 %v6690_v10, %v278_v8  ;;  %v6695_v40 = vunpack.c.h.bf16 %v3584_v14  ;;  %v6697_v2 = vunpack.c.l.bf16 %v3589_v15  ;;  %v6699_v10 = vunpack.c.l.bf16 %v3601_v20 }
  0x8b   :  { %v3984_v6 = vsub.f32 %v6691_v34, %v278_v8  ;;  %v3988_v7 = vsub.f32 %v6693_v11, %v278_v8  ;;  %v453_v49 = vadd.f32 %v452_v24, %v374_v53  ;;  %v6700_v13 = vunpack.c.h.bf16 %v3601_v20 }
  0x8c   :  { %v3992_v28 = vsub.f32 %v6695_v40, %v278_v8  ;;  %v3996_v43 = vsub.f32 %v6697_v2, %v278_v8  ;;  %v4000_v9 = vsub.f32 %v6699_v10, %v276_v16  ;;  %v386_v11 = vmul.f32 %v3980_v50, %v3980_v50 }
  0x8d   :  { %6692 = vst [vmem:[#allocation10_spill] sm:$0xff] %v3984_v6  ;;  %v4004_v34 = vsub.f32 %v6700_v13, %v276_v16  ;;  %v387_v14 = vmul.f32 %v3984_v6, %v3984_v6  ;;  %v388_v24 = vmul.f32 %v3988_v7, %v3988_v7  ;;  %v455_v40 = vadd.f32 %v454_v23, %v453_v49 }
  0x8e   :  { %6694 = vst [vmem:[#allocation11_spill] sm:$0xff] %v3988_v7  ;;  %v389_v15 = vmul.f32 %v3992_v28, %v3992_v28  ;;  %v390_v8 = vmul.f32 %v3996_v43, %v3996_v43  ;;  %v6701_v20 = vunpack.c.l.bf16 %v3613_v25  ;;  %v6702_v2 = vunpack.c.h.bf16 %v3613_v25 }
  0x8f   :  { %6696 = vst [vmem:[#allocation12_spill] sm:$0xff] %v3992_v28  ;;  %v472_v13 = vadd.f32 %v387_v14, %v386_v11  ;;  %v6703_v54 = vunpack.c.l.bf16 %v3625_v30  ;;  %v376_v28 = vmul.f32 %v4000_v9, %v4000_v9  ;;  %v377_v23 = vmul.f32 %v4004_v34, %v4004_v34  ;;  %456 = vadd.xlane.f32.xlu2 %v455_v40  ;;  %v197_v25 = vpop.xlane.xlu2 %196 }
  0x90   :  { %6698 = vst [vmem:[#allocation13_spill] sm:$0xff] %v3996_v43  ;;  %v4018_v53 = vsub.f32 %v6701_v20, %v276_v16  ;;  %v4022_v10 = vsub.f32 %v6702_v2, %v276_v16  ;;  %v475_v49 = vsel %vm158_vm0, %v390_v8, 0.0  ;;  %v6705_v2 = vunpack.c.l.bf16 %v3638_v35 }
  0x91   :  { %v4026_v48 = vsub.f32 %v6703_v54, %v276_v16  ;;  %v466_v30 = vadd.f32 %v465_v32, %v383_v59  ;;  %v473_v54 = vadd.f32 %v472_v13, %v388_v24  ;;  %v458_v14 = vadd.f32 %v377_v23, %v376_v28 }
  0x92   :  { %v378_v20 = vmul.f32 %v4018_v53, %v4018_v53  ;;  %v4037_v11 = vsub.f32 %v6705_v2, %v279_v19  ;;  %v280_v43 = vmul.f32 %v3875_v57, %v197_v25  ;;  %v6707_v40 = vunpack.c.h.bf16 %v3638_v35 }
  0x93   :  { %6704 = vst [vmem:[#allocation14_spill] sm:$0xff] %v4026_v48  ;;  %v380_v16 = vmul.f32 %v4026_v48, %v4026_v48  ;;  %v6709_v8 = vunpack.c.l.bf16 %v3643_v36  ;;  %v6711_v39 = vunpack.c.h.bf16 %v3643_v36  ;;  %v6713_v32 = vunpack.c.l.bf16 %v3664_v45 }
  0x94   :  { %6706 = vst [vmem:[#allocation15_spill] sm:$0xff] %v4037_v11  ;;  %v4044_v7 = vsub.f32 %v6707_v40, %v279_v19  ;;  %v474_v24 = vadd.f32 %v473_v54, %v389_v15  ;;  %v379_v28 = vmul.f32 %v4022_v10, %v4022_v10  ;;  %v459_v13 = vadd.f32 %v458_v14, %v378_v20 }
  0x95   :  { %v4048_v6 = vsub.f32 %v6709_v8, %v279_v19  ;;  %v4052_v2 = vsub.f32 %v6711_v39, %v279_v19  ;;  %v4056_v59 = vsub.f32 %v6713_v32, %v279_v19  ;;  %v391_v35 = vmul.f32 %v4037_v11, %v4037_v11 }
  0x96   :  { %6708 = vst [vmem:[#allocation16_spill] sm:$0xff] %v4044_v7  ;;  %v392_v23 = vmul.f32 %v4044_v7, %v4044_v7  ;;  %v6715_v19 = vunpack.c.l.bf16 %v3933_v5  ;;  %v476_v15 = vadd.f32 %v475_v49, %v474_v24  ;;  %v460_v25 = vadd.f32 %v459_v13, %v379_v28  ;;  %v4084_v49 = vld [vmem:[%s6544_s0 + $0xdc] sm:$0xff] }
  0x97   :  { %6710 = vst [vmem:[#allocation17_spill] sm:$0xff] %v4048_v6  ;;  %v393_v36 = vmul.f32 %v4048_v6, %v4048_v6  ;;  %v395_v39 = vmul.f32 %v4056_v59, %v4056_v59  ;;  %v468_v20 = vsel %vm158_vm0, %v385_v18, 0.0  ;;  %v6716_v54 = vunpack.c.l.bf16 %v3912_v41  ;;  %224 = vadd.xlane.f32.xlu2 %v3883_v33 }
  0x98   :  { %6712 = vst [vmem:[#allocation18_spill] sm:$0xff] %v4052_v2  ;;  %v250_v45 = vsel %vm158_vm0, %v6715_v19, 0.0  ;;  %v461_v40 = vsel %vm158_vm0, %v380_v16, 0.0  ;;  %v394_v8 = vmul.f32 %v4052_v2, %v4052_v2  ;;  %v479_v32 = vadd.f32 %v392_v23, %v391_v35  ;;  %477 = vadd.xlane.f32.xlu1 %v476_v15  ;;  %v204_v23 = vpop.xlane.xlu0 %203 }
  0x99   :  { %6714 = vst [vmem:[#allocation19_spill] sm:$0xff] %v4056_v59  ;;  %v248_v14 = vadd.f32 %v247_v12, %v6716_v54  ;;  %v6717_v48 = vunpack.c.l.bf16 %v3669_v46  ;;  %v462_v18 = vadd.f32 %v461_v40, %v460_v25  ;;  %v467_v24 = vadd.f32 %v466_v30, %v3966_v55 }
  0x9a   :  { %v6719_v12 = vunpack.c.h.bf16 %v3669_v46  ;;  %v6721_v28 = vunpack.c.l.bf16 %v3677_v51  ;;  %v482_v35 = vsel %vm158_vm0, %v395_v39, 0.0  ;;  %v6723_v19 = vunpack.c.h.bf16 %v3677_v51  ;;  %v4108_v46 = vld [vmem:[%s6544_s0 + $0xe4] sm:$0xff] }
  0x9b   :  { %v4079_v59 = vsub.f32 %v6717_v48, %v280_v43  ;;  %v480_v48 = vadd.f32 %v479_v32, %v393_v36  ;;  %v6725_v55 = vunpack.c.l.bf16 %v3706_v63  ;;  %463 = vadd.xlane.f32.xlu0 %v462_v18  ;;  %v4119_v63 = vld [vmem:[%s6544_s0 + $0xec] sm:$0xf]  ;;  %v6727_v25 = vunpack.c.h.bf16 %v3912_v41  ;;  %v211_v18 = vpop.xlane.xlu1 %210 }
  0x9c   :  { %v4089_v16 = vsub.f32 %v6719_v12, %v280_v43  ;;  %v4093_v13 = vsub.f32 %v6721_v28, %v280_v43  ;;  %v4099_v15 = vsub.f32 %v6723_v19, %v280_v43  ;;  %v4130_v12 = vld [vmem:[%s6544_s0 + $0x118] sm:$0xff]  ;;  %v281_v28 = vmul.f32 %v3875_v57, %v204_v23 }
  0x9d   :  { %6718 = vst [vmem:[#allocation20_spill] sm:$0xff] %v4079_v59  ;;  %v4103_v30 = vsub.f32 %v6725_v55, %v280_v43  ;;  %v396_v33 = vmul.f32 %v4079_v59, %v4079_v59  ;;  %v6611_v43 = vunpack.c.l.bf16 %v4084_v49  ;;  %v481_v39 = vadd.f32 %v480_v48, %v394_v8 }
  0x9e   :  { %6720 = vst [vmem:[#allocation21_spill] sm:$0xff] %v4089_v16  ;;  %v397_v36 = vmul.f32 %v4089_v16, %v4089_v16  ;;  %v398_v51 = vmul.f32 %v4093_v13, %v4093_v13  ;;  %v249_v54 = vadd.f32 %v248_v14, %v6727_v25  ;;  %v399_v19 = vmul.f32 %v4099_v15, %v4099_v15  ;;  %v4139_v14 = vld [vmem:[%s6544_s0 + $0x120] sm:$0xff] }
  0x9f   :  { %6722 = vst [vmem:[#allocation22_spill] sm:$0xff] %v4093_v13  ;;  %v400_v40 = vmul.f32 %v4103_v30, %v4103_v30  ;;  %v483_v55 = vadd.f32 %v482_v35, %v481_v39  ;;  %v469_v25 = vadd.f32 %v468_v20, %v467_v24  ;;  %v6612_v35 = vunpack.c.h.bf16 %v4130_v12  ;;  %v4157_v20 = vld [vmem:[%s6544_s0 + $0xf8] sm:$0xff]  ;;  %231 = vadd.xlane.f32.xlu2 %v3951_v21 }
  0xa0   :  { %6724 = vst [vmem:[#allocation23_spill] sm:$0xff] %v4099_v15  ;;  %v486_v8 = vadd.f32 %v397_v36, %v396_v33  ;;  %v4149_v33 = vld [vmem:[%s6544_s0 + $0xf0] sm:$0xff]  ;;  %v6613_v15 = vunpack.c.l.bf16 %v4130_v12  ;;  %v251_v24 = vadd.f32 %v250_v45, %v249_v54  ;;  %v6729_v39 = vunpack.c.l.bf16 %v4108_v46 }
  0xa1   :  { %6726 = vst [vmem:[#allocation24_spill] sm:$0xff] %v4103_v30  ;;  %v6728_v30 = vunpack.c.h.bf16 %v4084_v49  ;;  %484 = vadd.xlane.f32.xlu1 %v483_v55  ;;  %v6618_v45 = vunpack.c.l.bf16 %v4149_v33  ;;  %v6617_v54 = vunpack.c.h.bf16 %v4149_v33  ;;  %v6732_v2 = vunpack.c.l.bf16 %v3696_v60 }
  0xa2   :  { %v487_v36 = vadd.f32 %v486_v8, %v398_v51  ;;  %v4165_v51 = vld [vmem:[%s6544_s0 + $0x128] sm:$0xf]  ;;  %v6616_v8 = vunpack.c.l.bf16 %v4139_v14  ;;  %v254_v32 = vadd.f32 %v6612_v35, %v6613_v15  ;;  %v6731_v35 = vunpack.c.h.bf16 %v4108_v46 }
  0xa3   :  { %v233_v23 = vadd.f32 %v6728_v30, %v6611_v43  ;;  %v489_v30 = vsel %vm158_vm0, %v400_v40, 0.0  ;;  %v6730_v40 = vunpack.c.l.bf16 %v4119_v63  ;;  %470 = vadd.xlane.f32.xlu0 %v469_v25  ;;  %v4198_v13 = vsub.f32 %v6732_v2, %v281_v28 }
  0xa4   :  { %v488_v48 = vadd.f32 %v487_v36, %v399_v19  ;;  %v4183_v19 = vld [vmem:[%s6544_s0 + $0x100] sm:$0xf]  ;;  %v6734_v25 = vunpack.c.h.bf16 %v3696_v60  ;;  %v6738_v21 = vunpack.c.l.bf16 %v4157_v20  ;;  %v6741_v2 = vunpack.c.l.bf16 %v3733_v42 }
  0xa5   :  { %v234_v43 = vadd.f32 %v233_v23, %v6729_v39  ;;  %v236_v23 = vsel %vm158_vm0, %v6730_v40, 0.0  ;;  %v282_v39 = vmul.f32 %v3875_v57, %v211_v18  ;;  %v255_v40 = vadd.f32 %v254_v32, %v6616_v8  ;;  %6733 = vst [vmem:[#allocation25_spill] sm:$0xff] %v4198_v13 }
  0xa6   :  { %v240_v18 = vadd.f32 %v6617_v54, %v6618_v45  ;;  %v4202_v36 = vsub.f32 %v6734_v25, %v281_v28  ;;  %v490_v32 = vadd.f32 %v489_v30, %v488_v48  ;;  %v6739_v45 = vunpack.c.h.bf16 %v3713_v26  ;;  %v218_v30 = vpop.xlane.xlu1 %217 }
  0xa7   :  { %v235_v15 = vadd.f32 %v234_v43, %v6731_v35  ;;  %v6736_v43 = vunpack.c.l.bf16 %v3713_v26  ;;  %v4217_v6 = vsub.f32 %v6741_v2, %v281_v28  ;;  %v401_v60 = vmul.f32 %v4198_v13, %v4198_v13 }
  0xa8   :  { %6735 = vst [vmem:[#allocation26_spill] sm:$0xff] %v4202_v36  ;;  %v241_v54 = vadd.f32 %v240_v18, %v6738_v21  ;;  %v4213_v55 = vsub.f32 %v6739_v45, %v281_v28  ;;  %v402_v25 = vmul.f32 %v4202_v36, %v4202_v36  ;;  %v6743_v21 = vunpack.c.h.bf16 %v4139_v14  ;;  %491 = vadd.xlane.f32.xlu2 %v490_v32 }
  0xa9   :  { %v4206_v35 = vsub.f32 %v6736_v43, %v281_v28  ;;  %6742 = vst [vmem:[#allocation29_spill] sm:$0xff] %v4217_v6  ;;  %v237_v43 = vadd.f32 %v236_v23, %v235_v15  ;;  %v6744_v45 = vunpack.c.l.bf16 %v4165_v51  ;;  %v405_v18 = vmul.f32 %v4217_v6, %v4217_v6  ;;  %252 = vadd.xlane.f32.xlu1 %v251_v24 }
  0xaa   :  { %6740 = vst [vmem:[#allocation28_spill] sm:$0xff] %v4213_v55  ;;  %v256_v26 = vadd.f32 %v255_v40, %v6743_v21  ;;  %v404_v28 = vmul.f32 %v4213_v55, %v4213_v55  ;;  %v493_v2 = vadd.f32 %v402_v25, %v401_v60  ;;  %v6745_v8 = vunpack.c.l.bf16 %v3723_v37  ;;  %v4245_v40 = vld [vmem:[%s6544_s0 + $0x12c] sm:$0xff] }
  0xab   :  { %6737 = vst [vmem:[#allocation27_spill] sm:$0xff] %v4206_v35  ;;  %v403_v48 = vmul.f32 %v4206_v35, %v4206_v35  ;;  %v257_v42 = vsel %vm158_vm0, %v6744_v45, 0.0  ;;  %v6747_v15 = vunpack.c.h.bf16 %v3723_v37  ;;  %v6749_v21 = vunpack.c.h.bf16 %v4157_v20  ;;  %238 = vadd.xlane.f32.xlu0 %v237_v43 }
  0xac   :  { %v4236_v36 = vsub.f32 %v6745_v8, %v282_v39  ;;  %v6750_v6 = vunpack.c.l.bf16 %v4183_v19  ;;  %v283_v8 = vmul.f32 %v3875_v57, %v218_v30  ;;  %v6751_v25 = vunpack.c.l.bf16 %v3740_v52 }
  0xad   :  { %v4240_v23 = vsub.f32 %v6747_v15, %v282_v39  ;;  %v242_v45 = vadd.f32 %v241_v54, %v6749_v21  ;;  %v4260_v15 = vld [vmem:[%s6544_s0 + $0x134] sm:$0xff]  ;;  %v494_v24 = vadd.f32 %v493_v2, %v403_v48  ;;  %v6753_v55 = vunpack.c.h.bf16 %v3740_v52  ;;  %v4280_v52 = vld [vmem:[%s6544_s0 + $0x13c] sm:$0xf] }
  0xae   :  { %6746 = vst [vmem:[#allocation30_spill] sm:$0xff] %v4236_v36  ;;  %v243_v60 = vsel %vm158_vm0, %v6750_v6, 0.0  ;;  %v4255_v37 = vsub.f32 %v6751_v25, %v282_v39  ;;  %v406_v6 = vmul.f32 %v4236_v36, %v4236_v36  ;;  %v496_v21 = vsel %vm158_vm0, %v405_v18, 0.0 }
  0xaf   :  { %6748 = vst [vmem:[#allocation31_spill] sm:$0xff] %v4240_v23  ;;  %v4264_v54 = vsub.f32 %v6753_v55, %v282_v39  ;;  %v407_v30 = vmul.f32 %v4240_v23, %v4240_v23  ;;  %v6755_v25 = vunpack.c.l.bf16 %v3749_v17  ;;  %v6629_v55 = vunpack.c.l.bf16 %v4245_v40 }
  0xb0   :  { %6752 = vst [vmem:[#allocation32_spill] sm:$0xff] %v4255_v37  ;;  %v408_v32 = vmul.f32 %v4255_v37, %v4255_v37  ;;  %v495_v48 = vadd.f32 %v494_v24, %v404_v28  ;;  %v6628_v43 = vunpack.c.h.bf16 %v4245_v40  ;;  %v6627_v18 = vunpack.c.l.bf16 %v4260_v15 }
  0xb1   :  { %6754 = vst [vmem:[#allocation33_spill] sm:$0xff] %v4264_v54  ;;  %v4273_v35 = vsub.f32 %v6755_v25, %v282_v39  ;;  %v500_v2 = vadd.f32 %v407_v30, %v406_v6  ;;  %v258_v23 = vadd.f32 %v257_v42, %v256_v26  ;;  %v6757_v39 = vunpack.c.l.bf16 %v3762_v31 }
  0xb2   :  { %v497_v37 = vadd.f32 %v496_v21, %v495_v48  ;;  %v6630_v13 = vunpack.c.l.bf16 %v4280_v52  ;;  %v261_v28 = vadd.f32 %v6628_v43, %v6629_v55  ;;  %v6759_v24 = vunpack.c.h.bf16 %v3762_v31 }
  0xb3   :  { %6756 = vst [vmem:[#allocation34_spill] sm:$0xff] %v4273_v35  ;;  %v4288_v25 = vsub.f32 %v6757_v39, %v283_v8  ;;  %v244_v30 = vadd.f32 %v243_v60, %v242_v45  ;;  %v409_v26 = vmul.f32 %v4264_v54, %v4264_v54  ;;  %v501_v42 = vadd.f32 %v500_v2, %v408_v32 }
  0xb4   :  { %v4297_v6 = vsub.f32 %v6759_v24, %v283_v8  ;;  %v6761_v39 = vunpack.c.l.bf16 %v3767_v56  ;;  %v410_v21 = vmul.f32 %v4273_v35, %v4273_v35  ;;  %v262_v48 = vadd.f32 %v261_v28, %v6627_v18  ;;  %259 = vadd.xlane.f32.xlu1 %v258_v23  ;;  %498 = vadd.xlane.f32.xlu2 %v497_v37 }
  0xb5   :  { %6758 = vst [vmem:[#allocation35_spill] sm:$0xff] %v4288_v25  ;;  %v411_v31 = vmul.f32 %v4288_v25, %v4288_v25  ;;  %v6763_v60 = vunpack.c.h.bf16 %v4260_v15  ;;  %v264_v2 = vsel %vm158_vm0, %v6630_v13, 0.0  ;;  %245 = vadd.xlane.f32.xlu0 %v244_v30  ;;  %v502_v24 = vadd.f32 %v501_v42, %v409_v26 }
  0xb6   :  { %6760 = vst [vmem:[#allocation36_spill] sm:$0xff] %v4297_v6  ;;  %v4303_v17 = vsub.f32 %v6761_v39, %v283_v8  ;;  %v412_v45 = vmul.f32 %v4297_v6, %v4297_v6  ;;  %v6764_v39 = vunpack.c.h.bf16 %v3767_v56  ;;  %v503_v23 = vsel %vm158_vm0, %v410_v21, 0.0  ;;  %v3199_v21 = vld [vmem:[%s6547_s3 + $0xf4] sm:$0xf0] }
  0xb7   :  { %v263_v32 = vadd.f32 %v262_v48, %v6763_v60  ;;  %v6766_v37 = vunpack.c.l.bf16 %v3798_v62  ;;  %v504_v60 = vadd.f32 %v503_v23, %v502_v24  ;;  %v2882_v62 = vld [vmem:[%s6547_s3 + $0x70] sm:$0xf]  ;;  %v6788_v59 = vunpack.c.l.bf16 %v3880_v61 }
  0xb8   :  { %6762 = vst [vmem:[#allocation37_spill] sm:$0xff] %v4303_v17  ;;  %v4320_v28 = vsub.f32 %v6764_v39, %v283_v8  ;;  %v413_v18 = vmul.f32 %v4303_v17, %v4303_v17  ;;  %v507_v43 = vadd.f32 %v412_v45, %v411_v31  ;;  %v3074_v23 = vld [vmem:[%s6547_s3 + $0x1f0] sm:$0xf] }
  0xb9   :  { %v4327_v55 = vsub.f32 %v6766_v37, %v283_v8  ;;  %v265_v48 = vadd.f32 %v264_v2, %v263_v32  ;;  %v3183_v8 = vld [vmem:[%s6547_s3 + $0x74] sm:$0xf0]  ;;  %v3010_v32 = vld [vmem:[%s6547_s3 + $0x170] sm:$0xf] }
  0xba   :  { %6765 = vst [vmem:[#allocation38_spill] sm:$0xff] %v4320_v28  ;;  %v414_v30 = vmul.f32 %v4320_v28, %v4320_v28  ;;  %v508_v26 = vadd.f32 %v507_v43, %v413_v18  ;;  %v2946_v43 = vld [vmem:[%s6547_s3 + $0xf0] sm:$0xf]  ;;  %v2883_v18 = vor.u32 %v3183_v8, %v2882_v62  ;;  %v3215_v2 = vld [vmem:[%s6547_s3 + $0x174] sm:$0xf0] }
  0xbb   :  { %6767 = vst [vmem:[#allocation39_spill] sm:$0xff] %v4327_v55  ;;  %v415_v56 = vmul.f32 %v4327_v55, %v4327_v55  ;;  %v2947_v24 = vor.u32 %v3199_v21, %v2946_v43  ;;  %v3011_v39 = vor.u32 %v3215_v2, %v3010_v32  ;;  %v3231_v37 = vld [vmem:[%s6547_s3 + $0x1f4] sm:$0xf0]  ;;  %v3066_v43 = vld [vmem:[%s6547_s3 + $0x1e0] sm:$0xf] }
  0xbc   :  { %266 = vadd.xlane.f32.xlu2 %v265_v48  ;;  %v509_v42 = vadd.f32 %v508_v26, %v414_v30  ;;  %1536 = vmatpush.bf16.msra.mxu0 %v2883_v18  ;;  %v3075_v48 = vor.u32 %v3231_v37, %v3074_v23  ;;  %v3181_v30 = vld [vmem:[%s6547_s3 + $0x64] sm:$0xf0]  ;;  %v2938_v26 = vld [vmem:[%s6547_s3 + $0xe0] sm:$0xf]  ;;  %v2866_v32 = vld [vmem:[%s6547_s3 + $0x50] sm:$0xf] }
  0xbd   :  { %505 = vadd.xlane.f32.xlu0 %v504_v60  ;;  %v510_v31 = vsel %vm158_vm0, %v415_v56, 0.0  ;;  %1585 = vmatpush.bf16.msra.mxu1 %v2947_v24  ;;  %v2874_v60 = vld [vmem:[%s6547_s3 + $0x60] sm:$0xf]  ;;  %v3229_v18 = vld [vmem:[%s6547_s3 + $0x1e4] sm:$0xf0] }
  0xbe   :  { %v511_v45 = vadd.f32 %v510_v31, %v509_v42  ;;  %1634 = vmatpush.bf16.msra.mxu2 %v3011_v39  ;;  %1683 = vmatpush.bf16.msra.mxu3 %v3075_v48  ;;  %v2875_v56 = vor.u32 %v3181_v30, %v2874_v60  ;;  %v3197_v42 = vld [vmem:[%s6547_s3 + $0xe4] sm:$0xf0]  ;;  %v3002_v31 = vld [vmem:[%s6547_s3 + $0x160] sm:$0xf]  ;;  %v3067_v21 = vor.u32 %v3229_v18, %v3066_v43  ;;  %v3179_v2 = vld [vmem:[%s6547_s3 + $0x54] sm:$0xf0] }
  0xbf   :  { %v2939_v62 = vor.u32 %v3197_v42, %v2938_v26  ;;  %v2930_v24 = vld [vmem:[%s6547_s3 + $0xd0] sm:$0xf]  ;;  %v2867_v39 = vor.u32 %v3179_v2, %v2866_v32  ;;  %v3195_v23 = vld [vmem:[%s6547_s3 + $0xd4] sm:$0xf0]  ;;  %v3193_v43 = vld [vmem:[%s6547_s3 + $0xc4] sm:$0xf0] }
  0xc0   :  { %1537 = vmatpush.bf16.msra.mxu0 %v2875_v56  ;;  %v2994_v37 = vld [vmem:[%s6547_s3 + $0x150] sm:$0xf]  ;;  %v3211_v48 = vld [vmem:[%s6547_s3 + $0x154] sm:$0xf0]  ;;  %v2931_v60 = vor.u32 %v3195_v23, %v2930_v24  ;;  %v2986_v18 = vld [vmem:[%s6547_s3 + $0x140] sm:$0xf] }
  0xc1   :  { %1586 = vmatpush.bf16.msra.mxu1 %v2939_v62  ;;  %v2995_v30 = vor.u32 %v3211_v48, %v2994_v37  ;;  %v3058_v26 = vld [vmem:[%s6547_s3 + $0x1d0] sm:$0xf]  ;;  %v3227_v56 = vld [vmem:[%s6547_s3 + $0x1d4] sm:$0xf0]  ;;  %v2922_v62 = vld [vmem:[%s6547_s3 + $0xc0] sm:$0xf] }
  0xc2   :  { %1684 = vmatpush.bf16.msra.mxu3 %v3067_v21  ;;  %v3059_v42 = vor.u32 %v3227_v56, %v3058_v26  ;;  %v3209_v21 = vld [vmem:[%s6547_s3 + $0x144] sm:$0xf0]  ;;  %v2923_v32 = vor.u32 %v3193_v43, %v2922_v62  ;;  %v3050_v24 = vld [vmem:[%s6547_s3 + $0x1c0] sm:$0xf]  ;;  %v2850_v37 = vld [vmem:[%s6547_s3 + $0x30] sm:$0xf] }
  0xc3   :  { %v2987_v2 = vor.u32 %v3209_v21, %v2986_v18  ;;  %v3175_v48 = vld [vmem:[%s6547_s3 + $0x34] sm:$0xf0]  ;;  %v2978_v56 = vld [vmem:[%s6547_s3 + $0x130] sm:$0xf]  ;;  %v2842_v18 = vld [vmem:[%s6547_s3 + $0x20] sm:$0xf] }
  0xc4   :  { %1538 = vmatpush.bf16.msra.mxu0 %v2867_v39  ;;  %v3225_v39 = vld [vmem:[%s6547_s3 + $0x1c4] sm:$0xf0]  ;;  %v3191_v26 = vld [vmem:[%s6547_s3 + $0xb4] sm:$0xf0]  ;;  %v3042_v62 = vld [vmem:[%s6547_s3 + $0x1b0] sm:$0xf] }
  0xc5   :  { %512 = vadd.xlane.f32.xlu0 %v511_v45  ;;  %v3213_v45 = vld [vmem:[%s6547_s3 + $0x164] sm:$0xf0]  ;;  %1587 = vmatpush.bf16.msra.mxu1 %v2931_v60  ;;  %v3051_v23 = vor.u32 %v3225_v39, %v3050_v24  ;;  %v2914_v60 = vld [vmem:[%s6547_s3 + $0xb0] sm:$0xf]  ;;  %v2970_v39 = vld [vmem:[%s6547_s3 + $0x120] sm:$0xf] }
  0xc6   :  { %v3003_v8 = vor.u32 %v3213_v45, %v3002_v31  ;;  %v2858_v31 = vld [vmem:[%s6547_s3 + $0x40] sm:$0xf]  ;;  %v3177_v45 = vld [vmem:[%s6547_s3 + $0x44] sm:$0xf0]  ;;  %1685 = vmatpush.bf16.msra.mxu3 %v3059_v42  ;;  %v3207_v42 = vld [vmem:[%s6547_s3 + $0x134] sm:$0xf0] }
  0xc7   :  { %v3173_v21 = vld [vmem:[%s6547_s3 + $0x24] sm:$0xf0] }
  0xc8   :  { %1635 = vmatpush.bf16.msra.mxu2 %v3003_v8  ;;  %v2859_v8 = vor.u32 %v3177_v45, %v2858_v31  ;;  %v2915_v31 = vor.u32 %v3191_v26, %v2914_v60  ;;  %v2979_v45 = vor.u32 %v3207_v42, %v2978_v56  ;;  %v3189_v24 = vld [vmem:[%s6547_s3 + $0xa4] sm:$0xf0]  ;;  %v3034_v60 = vld [vmem:[%s6547_s3 + $0x1a0] sm:$0xf]  ;;  %v2834_v42 = vld [vmem:[%s6547_s3 + $0x10] sm:$0xf] }
  0xc9   :  { %1588 = vmatpush.bf16.msra.mxu1 %v2923_v32  ;;  %v2906_v32 = vld [vmem:[%s6547_s3 + $0xa0] sm:$0xf] }
  0xca   :  { %1539 = vmatpush.bf16.msra.mxu0 %v2859_v8  ;;  %1686 = vmatpush.bf16.msra.mxu3 %v3051_v23  ;;  %v3223_v8 = vld [vmem:[%s6547_s3 + $0x1b4] sm:$0xf0]  ;;  %v3205_v23 = vld [vmem:[%s6547_s3 + $0x124] sm:$0xf0] }
  0xcb   :  { %v3043_v43 = vor.u32 %v3223_v8, %v3042_v62 }
  0xcc   :  { %1636 = vmatpush.bf16.msra.mxu2 %v2995_v30  ;;  %v2851_v30 = vor.u32 %v3175_v48, %v2850_v37  ;;  %v2907_v37 = vor.u32 %v3189_v24, %v2906_v32  ;;  %v2971_v48 = vor.u32 %v3205_v23, %v2970_v39  ;;  %v3026_v24 = vld [vmem:[%s6547_s3 + $0x190] sm:$0xf]  ;;  %v3219_v39 = vld [vmem:[%s6547_s3 + $0x194] sm:$0xf0] }
  0xcd   :  { %1589 = vmatpush.bf16.msra.mxu1 %v2915_v31  ;;  %v3171_v31 = vld [vmem:[%s6547_s3 + $0x14] sm:$0xf0] }
  0xce   :  { %1540 = vmatpush.bf16.msra.mxu0 %v2851_v30  ;;  %1687 = vmatpush.bf16.msra.mxu3 %v3043_v43  ;;  %v3221_v30 = vld [vmem:[%s6547_s3 + $0x1a4] sm:$0xf0]  ;;  %v2835_v8 = vor.u32 %v3171_v31, %v2834_v42  ;;  %v3187_v43 = vld [vmem:[%s6547_s3 + $0x94] sm:$0xf0]  ;;  %v2954_v42 = vld [vmem:[%s6547_s3 + $0x100] sm:$0xf] }
  0xcf   :  { %v3035_v26 = vor.u32 %v3221_v30, %v3034_v60  ;;  %v3169_v60 = vld [vmem:[%s6547_s3 + $0x4] sm:$0xf0]  ;;  %v2890_v30 = vld [vmem:[%s6547_s3 + $0x80] sm:$0xf] }
  0xd0   :  { %1637 = vmatpush.bf16.msra.mxu2 %v2987_v2  ;;  %v2843_v2 = vor.u32 %v3173_v21, %v2842_v18  ;;  %v2962_v18 = vld [vmem:[%s6547_s3 + $0x110] sm:$0xf]  ;;  %v3203_v21 = vld [vmem:[%s6547_s3 + $0x114] sm:$0xf0]  ;;  %v3201_v31 = vld [vmem:[%s6547_s3 + $0x104] sm:$0xf0] }
  0xd1   :  { %1590 = vmatpush.bf16.msra.mxu1 %v2907_v37  ;;  %v3027_v37 = vor.u32 %v3219_v39, %v3026_v24 }
  0xd2   :  { %1541 = vmatpush.bf16.msra.mxu0 %v2843_v2  ;;  %1688 = vmatpush.bf16.msra.mxu3 %v3035_v26  ;;  %v2963_v2 = vor.u32 %v3203_v21, %v2962_v18 }
  0xd4   :  { %1638 = vmatpush.bf16.msra.mxu2 %v2979_v45  ;;  %v2898_v45 = vld [vmem:[%s6547_s3 + $0x90] sm:$0xf] }
  0xd5   :  { %v2899_v32 = vor.u32 %v3187_v43, %v2898_v45  ;;  %v3217_v43 = vld [vmem:[%s6547_s3 + $0x184] sm:$0xf0] }
  0xd6   :  { %1542 = vmatpush.bf16.msra.mxu0 %v2835_v8  ;;  %1689 = vmatpush.bf16.msra.mxu3 %v3027_v37  ;;  %v3018_v8 = vld [vmem:[%s6547_s3 + $0x180] sm:$0xf] }
  0xd7   :  { %1591 = vmatpush.bf16.msra.mxu1 %v2899_v32  ;;  %v3019_v21 = vor.u32 %v3217_v43, %v3018_v8  ;;  %v6774_v8 = vunpack.c.h.bf16 %v3828_v38 }
  0xd8   :  { %1639 = vmatpush.bf16.msra.mxu2 %v2971_v48  ;;  %v2826_v48 = vld [vmem:[%s6547_s3] sm:$0xf] }
  0xd9   :  { %v2827_v26 = vor.u32 %v3169_v60, %v2826_v48 }
  0xda   :  { %1690 = vmatpush.bf16.msra.mxu3 %v3019_v21  ;;  %v6776_v21 = vunpack.c.l.bf16 %v3838_v44 }
  0xdb   :  { %1543 = vmatpush.bf16.msra.mxu0 %v2827_v26  ;;  %v6770_v26 = vunpack.c.h.bf16 %v3821_v27 }
  0xdc   :  { %1640 = vmatpush.bf16.msra.mxu2 %v2963_v2 }
 0x102   :  { %v457_v56 = vpop.xlane.xlu2 %456 }
 0x103   :  { %v563_v62 = vmul.f32 %v457_v56, %v3875_v57  ;;  %v3185_v56 = vld [vmem:[%s6547_s3 + $0x84] sm:$0xf0] }
 0x104   :  { %v2891_v45 = vor.u32 %v3185_v56, %v2890_v30  ;;  %v6768_v30 = vunpack.c.l.bf16 %v3821_v27 }
 0x105   :  { %v4503_v23 = vadd.f32 1e-05, %v563_v62  ;;  %v2955_v62 = vor.u32 %v3201_v31, %v2954_v42  ;;  %v6772_v31 = vunpack.c.l.bf16 %v3828_v38 }
 0x106   :  { %1592 = vmatpush.bf16.msra.mxu1 %v2891_v45 }
 0x107   :  { %3376 = vrsqrt.f32 %v4503_v23  ;;  %1641 = vmatpush.bf16.msra.mxu2 %v2955_v62  ;;  %vm601_vm2 = vweird.f32 %v4503_v23 }
 0x10a   :  { %v225_v2 = vpop.xlane.xlu2 %224 }
 0x10b   :  { %v478_v18 = vpop.xlane.xlu1 %477  ;;  %v284_v24 = vmul.f32 %v3875_v57, %v225_v2 }
 0x10c   :  { %v566_v32 = vmul.f32 %v478_v18, %v3875_v57 }
 0x10d   :  { %v4535_v60 = vpop.eup %3376  ;;  %v4539_v56 = vsub.f32 %v6768_v30, %v284_v24  ;;  %v4543_v42 = vsub.f32 %v6770_v26, %v284_v24  ;;  %v4547_v45 = vsub.f32 %v6772_v31, %v284_v24  ;;  %v4554_v43 = vsub.f32 %v6774_v8, %v284_v24 }
 0x10e   :  { %v464_v39 = vpop.xlane.xlu0 %463  ;;  %v4532_v37 = vadd.f32 1e-05, %v566_v32  ;;  %v596_v62 = vmul.f32 %v4535_v60, %v4503_v23  ;;  %v4560_v27 = vsub.f32 %v6776_v21, %v284_v24  ;;  %vm602_vm3 = vweird.f32 %v4535_v60 }
 0x10f   :  { %v564_v48 = vmul.f32 %v464_v39, %v3875_v57  ;;  %6769 = vst [vmem:[#allocation40_spill] sm:$0xff] %v4539_v56  ;;  %v416_v32 = vmul.f32 %v4539_v56, %v4539_v56  ;;  %v417_v2 = vmul.f32 %v4543_v42, %v4543_v42  ;;  %v418_v38 = vmul.f32 %v4547_v45, %v4547_v45  ;;  %vm603_vm5 = vmor %vm601_vm2, %vm602_vm3 }
 0x110   :  { %6771 = vst [vmem:[#allocation41_spill] sm:$0xff] %v4543_v42  ;;  %3378 = vrsqrt.f32 %v4532_v37  ;;  %v597_v39 = vmul.f32 %v4535_v60, %v596_v62  ;;  %v420_v24 = vmul.f32 %v4560_v27, %v4560_v27  ;;  %v419_v21 = vmul.f32 %v4554_v43, %v4554_v43 }
 0x111   :  { %6773 = vst [vmem:[#allocation42_spill] sm:$0xff] %v4547_v45  ;;  %v4556_v18 = vadd.f32 1e-05, %v564_v48  ;;  %v514_v48 = vadd.f32 %v417_v2, %v416_v32  ;;  %vm631_vm8 = vweird.f32 %v4532_v37 }
 0x112   :  { %6775 = vst [vmem:[#allocation43_spill] sm:$0xff] %v4554_v43  ;;  %v232_v44 = vpop.xlane.xlu2 %231  ;;  %v598_v32 = vmul.f32 0.5, %v597_v39  ;;  %v4597_v39 = vld [vmem:[%s6546_s2] sm:$0x1f]  ;;  %s3502_s2 = smov [#allocation2]  }
 0x113   :  { %6777 = vst [vmem:[#allocation44_spill] sm:$0xff] %v4560_v27  ;;  %3380 = vrsqrt.f32 %v4556_v18  ;;  %v285_v31 = vmul.f32 %v3875_v57, %v232_v44  ;;  %v515_v62 = vadd.f32 %v514_v48, %v418_v38  ;;  %v517_v27 = vsel %vm158_vm0, %v420_v24, 0.0  ;;  %s2810_s27 = sshll.u32 %s3502_s2, 4  ;;  %s2811_s27 = int_to_ptr.vmem [resolvable:$true] %s2810_s27 }
 0x114   :  { %v485_v30 = vpop.xlane.xlu1 %484  ;;  %v6778_v38 = vunpack.c.l.bf16 %v3843_v47  ;;  %v6782_v24 = vunpack.c.l.bf16 %v3854_v22  ;;  %v599_v56 = vsub.f32 1.5, %v598_v32  ;;  %v4624_v28 = vperm.slane %v4597_v39, 0 }
 0x115   :  { %v567_v26 = vmul.f32 %v485_v30, %v3875_v57  ;;  %v516_v2 = vadd.f32 %v515_v62, %v419_v21  ;;  %v4584_v30 = vld [vmem:[%s6545_s1] sm:$0x1f]  ;;  %v6780_v62 = vunpack.c.h.bf16 %v3843_v47  ;;  %v6784_v47 = vunpack.c.h.bf16 %v3854_v22  ;;  %s2812_s1 = sshll.u32 %s6550_s6, 4  ;;  %s2813_s1 = int_to_ptr.hbm [resolvable:$true] %s2812_s1 }
 0x116   :  { %v471_v8 = vpop.xlane.xlu0 %470  ;;  %v4576_v13 = vpop.eup %3378  ;;  %v4592_v48 = vsub.f32 %v6778_v38, %v285_v31  ;;  %v4607_v43 = vsub.f32 %v6782_v24, %v285_v31  ;;  %v4613_v42 = vperm.slane %v4584_v30, 0  ;;  %v600_v54 = vmul.f32 %v4535_v60, %v599_v56 }
 0x117   :  { %v4578_v55 = vadd.f32 1e-05, %v567_v26  ;;  %v565_v45 = vmul.f32 %v471_v8, %v3875_v57  ;;  %v626_v8 = vmul.f32 %v4576_v13, %v4532_v37  ;;  %v518_v21 = vadd.f32 %v517_v27, %v516_v2 }
 0x118   :  { %6779 = vst [vmem:[#allocation45_spill] sm:$0xff] %v4592_v48  ;;  %v4617_v2 = vsub.f32 %v6784_v47, %v285_v31  ;;  %v421_v25 = vmul.f32 %v4592_v48, %v4592_v48  ;;  %v423_v47 = vmul.f32 %v4607_v43, %v4607_v43  ;;  %vm611_vm6 = vweird.f32 %v4556_v18 }
 0x119   :  { %3382 = vrsqrt.f32 %v4578_v55  ;;  %v4587_v44 = vadd.f32 1e-05, %v565_v45  ;;  %v3381_v26 = vpop.eup %3380  ;;  %v4603_v45 = vsub.f32 %v6780_v62, %v285_v31  ;;  %6783 = vst [vmem:[#allocation47_spill] sm:$0xff] %v4607_v43  ;;  %519 = vadd.xlane.f32.xlu1 %v518_v21  ;;  %v6786_v62 = vunpack.c.l.bf16 %v3866_v58 }
 0x11a   :  { %v606_v38 = vmul.f32 %v3381_v26, %v4556_v18  ;;  %6785 = vst [vmem:[#allocation48_spill] sm:$0xff] %v4617_v2  ;;  %v4631_v21 = vperm.slane %v4584_v30, 1  ;;  %v627_v22 = vmul.f32 %v4576_v13, %v626_v8  ;;  %v424_v48 = vmul.f32 %v4617_v2, %v4617_v2 }
 0x11b   :  { %6781 = vst [vmem:[#allocation46_spill] sm:$0xff] %v4603_v45  ;;  %3384 = vrsqrt.f32 %v4587_v44  ;;  %v4621_v24 = vsub.f32 %v6786_v62, %v285_v31  ;;  %v492_v6 = vpop.xlane.xlu2 %491  ;;  %v422_v32 = vmul.f32 %v4603_v45, %v4603_v45  ;;  %v4647_v8 = vperm.slane %v4597_v39, 1 }
 0x11c   :  { %v253_v27 = vpop.xlane.xlu1 %252  ;;  %v607_v17 = vmul.f32 %v3381_v26, %v606_v38  ;;  %v568_v31 = vmul.f32 %v492_v6, %v3875_v57  ;;  %v4650_v6 = vperm.slane %v4584_v30, 2  ;;  %vm612_vm4 = vweird.f32 %v3381_v26 }
 0x11d   :  { %6787 = vst [vmem:[#allocation49_spill] sm:$0xff] %v4621_v24  ;;  %v288_v58 = vmul.f32 %v3875_v57, %v253_v27  ;;  %v425_v45 = vmul.f32 %v4621_v24, %v4621_v24  ;;  %v521_v35 = vadd.f32 %v422_v32, %v421_v25  ;;  %v628_v24 = vmul.f32 0.5, %v627_v22  ;;  %vm613_vm7 = vmor %vm611_vm6, %vm612_vm4 }
 0x11e   :  { %v608_v62 = vmul.f32 0.5, %v607_v17  ;;  %v4654_v43 = vadd.f32 1e-05, %v568_v31  ;;  %v239_v2 = vpop.xlane.xlu0 %238  ;;  %v4666_v31 = vperm.slane %v4597_v39, 2  ;;  %v6793_v18 = vunpack.c.h.bf16 %v3912_v41 }
 0x11f   :  { %v4638_v38 = vpop.eup %3382  ;;  %v522_v36 = vadd.f32 %v521_v35, %v423_v47  ;;  %v524_v32 = vsel %vm158_vm0, %v425_v45, 0.0  ;;  %v4663_v11 = vsub.f32 %v6788_v59, %v288_v58  ;;  %v6789_v45 = vunpack.c.h.bf16 %v3880_v61 }
 0x120   :  { %v609_v17 = vsub.f32 1.5, %v608_v62  ;;  %v636_v25 = vmul.f32 %v4638_v38, %v4578_v55  ;;  %3386 = vrsqrt.f32 %v4654_v43  ;;  %v4689_v62 = vsub.f32 %v6793_v18, %v288_v58 }
 0x121   :  { %v4652_v27 = vpop.eup %3384  ;;  %v523_v7 = vadd.f32 %v522_v36, %v424_v48  ;;  %v4676_v22 = vsub.f32 %v6789_v45, %v288_v58  ;;  %v6791_v36 = vunpack.c.l.bf16 %v3912_v41  ;;  %v4683_v48 = vsel %vm603_vm5, %v4535_v60, %v600_v54 }
 0x122   :  { %v616_v56 = vmul.f32 %v4652_v27, %v4587_v44  ;;  %v610_v16 = vmul.f32 %v3381_v26, %v609_v17  ;;  %6794 = vst [vmem:[#allocation52_spill] sm:$0xff] %v4689_v62  ;;  %v629_v61 = vsub.f32 1.5, %v628_v24  ;;  %v6795_v45 = vunpack.c.l.bf16 %v3933_v5 }
 0x123   :  { %6790 = vst [vmem:[#allocation50_spill] sm:$0xff] %v4676_v22  ;;  %v4680_v59 = vsub.f32 %v6791_v36, %v288_v58  ;;  %v525_v23 = vadd.f32 %v524_v32, %v523_v7  ;;  %v436_v60 = vmul.f32 %v4663_v11, %v4663_v11  ;;  %v437_v7 = vmul.f32 %v4676_v22, %v4676_v22 }
 0x124   :  { %v617_v35 = vmul.f32 %v4652_v27, %v616_v56  ;;  %v4691_v17 = vsel %vm613_vm7, %v3381_v26, %v610_v16  ;;  %v637_v56 = vmul.f32 %v4638_v38, %v636_v25  ;;  %v4696_v36 = vsub.f32 %v6795_v45, %v288_v58 }
 0x125   :  { %6792 = vst [vmem:[#allocation51_spill] sm:$0xff] %v4680_v59  ;;  %526 = vadd.xlane.f32.xlu2 %v525_v23  ;;  %v438_v41 = vmul.f32 %v4680_v59, %v4680_v59  ;;  %v439_v5 = vmul.f32 %v4689_v62, %v4689_v62  ;;  %v4709_v26 = vperm.slane %v4584_v30, 3  ;;  %v542_v58 = vadd.f32 %v437_v7, %v436_v60 }
 0x126   :  { %6796 = vst [vmem:[#allocation53_spill] sm:$0xff] %v4696_v36  ;;  %v618_v54 = vmul.f32 0.5, %v617_v35  ;;  %v440_v24 = vmul.f32 %v4696_v36, %v4696_v36  ;;  %v755_v25 = vmul.f32 %v4683_v48, %v3916_v3  ;;  %v760_v32 = vmul.f32 %v4691_v17, %v4000_v9  ;;  %v4723_v18 = vpop.eup %3386 }
 0x127   :  { %v499_v47 = vpop.xlane.xlu2 %498  ;;  %v630_v35 = vmul.f32 %v4576_v13, %v629_v61  ;;  %vm632_vm9 = vweird.f32 %v4576_v13  ;;  %v286_v23 = vmul.f32 %v3875_v57, %v239_v2  ;;  %v638_v45 = vmul.f32 0.5, %v637_v56  ;;  %v260_v22 = vpop.xlane.xlu1 %259 }
 0x128   :  { %v569_v16 = vmul.f32 %v499_v47, %v3875_v57  ;;  %v4721_v47 = vperm.slane %v4597_v39, 3  ;;  %v619_v36 = vsub.f32 1.5, %v618_v54  ;;  %vm622_vm10 = vweird.f32 %v4652_v27  ;;  %v246_v60 = vpop.xlane.xlu0 %245  ;;  %vm633_vm12 = vmor %vm631_vm8, %vm632_vm9 }
 0x129   :  { %v543_v3 = vadd.f32 %v542_v58, %v438_v41  ;;  %v545_v9 = vsel %vm158_vm0, %v440_v24, 0.0  ;;  %v846_v61 = vmul.f32 %v4613_v42, %v755_v25  ;;  %v851_v62 = vmul.f32 %v4613_v42, %v760_v32 }
 0x12a   :  { %v4726_v7 = vadd.f32 1e-05, %v569_v16  ;;  %vm621_vm11 = vweird.f32 %v4587_v44  ;;  %v756_v59 = vmul.f32 %v4683_v48, %v3920_v0  ;;  %v761_v56 = vmul.f32 %v4691_v17, %v4004_v34 }
 0x12b   :  { %v544_v2 = vadd.f32 %v543_v3, %v439_v5  ;;  %v757_v54 = vmul.f32 %v4683_v48, %v3924_v4  ;;  %v646_v41 = vmul.f32 %v4723_v18, %v4654_v43  ;;  %v937_v16 = vadd.f32 %v4624_v28, %v846_v61  ;;  %vm623_vm13 = vmor %vm621_vm11, %vm622_vm10 }
 0x12c   :  { %v942_v24 = vadd.f32 %v4624_v28, %v851_v62  ;;  %v762_v58 = vmul.f32 %v4691_v17, %v4018_v53  ;;  %v847_v25 = vmul.f32 %v4631_v21, %v756_v59  ;;  %v852_v0 = vmul.f32 %v4631_v21, %v761_v56 }
 0x12d   :  { %v546_v5 = vadd.f32 %v545_v9, %v544_v2  ;;  %v848_v34 = vmul.f32 %v4650_v6, %v757_v54  ;;  %v639_v32 = vsub.f32 1.5, %v638_v45  ;;  %v758_v61 = vmul.f32 %v4683_v48, %v3928_v1 }
 0x12e   :  { %v4747_v3 = vpack.c.bf16 %v942_v24, %v937_v16  ;;  %v853_v4 = vmul.f32 %v4650_v6, %v762_v58  ;;  %3388 = vrsqrt.f32 %v4726_v7  ;;  %v938_v53 = vadd.f32 %v4647_v8, %v847_v25 }
 0x12f   :  { %547 = vadd.xlane.f32.xlu2 %v546_v5  ;;  %v943_v59 = vadd.f32 %v4647_v8, %v852_v0  ;;  %v763_v62 = vmul.f32 %v4691_v17, %v4022_v10  ;;  %v620_v45 = vmul.f32 %v4652_v27, %v619_v36  ;;  %v647_v9 = vmul.f32 %v4723_v18, %v646_v41 }
 0x130   :  { %6797 = vst [vmem:[#allocation54_spill] sm:$0xff] %v4747_v3  ;;  %1544 = vmatmul.bf16.vlgmr.msra.gmra.mxu0 %v4747_v3  ;;  %v939_v2 = vadd.f32 %v4666_v31, %v848_v34  ;;  %v944_v1 = vadd.f32 %v4666_v31, %v853_v4  ;;  %v849_v54 = vmul.f32 %v4709_v26, %v758_v61  ;;  %v6799_v36 = vunpack.c.l.bf16 %v4084_v49 }
 0x131   :  { %v4766_v56 = vpack.c.bf16 %v943_v59, %v938_v53  ;;  %v854_v10 = vmul.f32 %v4709_v26, %v763_v62  ;;  %v4775_v16 = vsel %vm633_vm12, %v4576_v13, %v630_v35  ;;  %v289_v24 = vmul.f32 %v3875_v57, %v260_v22  ;;  %v506_v35 = vpop.xlane.xlu0 %505 }
 0x132   :  { %v4772_v41 = vsub.f32 %v6799_v36, %v286_v23  ;;  %v4778_v58 = vpack.c.bf16 %v944_v1, %v939_v2  ;;  %v6801_v37 = vunpack.c.h.bf16 %v4084_v49  ;;  %v287_v25 = vmul.f32 %v3875_v57, %v246_v60 }
 0x133   :  { %6798 = vst [vmem:[#allocation55_spill] sm:$0xff] %v4766_v56  ;;  %1593 = vmatmul.bf16.vlgmr.msra.gmra.mxu1 %v4766_v56  ;;  %v940_v0 = vadd.f32 %v4721_v47, %v849_v54  ;;  %v945_v34 = vadd.f32 %v4721_v47, %v854_v10  ;;  %v6802_v4 = vunpack.c.l.bf16 %v4108_v46  ;;  %v6803_v49 = vunpack.c.h.bf16 %v4108_v46  ;;  %v6822_v56 = vld [vmem:[#allocation10_spill] sm:$0xff] }
 0x134   :  { %6800 = vst [vmem:[#allocation56_spill] sm:$0xff] %v4778_v58  ;;  %v4782_v5 = vsub.f32 %v6801_v37, %v286_v23  ;;  %1642 = vmatmul.bf16.vlgmr.msra.gmra.mxu2 %v4778_v58  ;;  %v6804_v60 = vunpack.c.l.bf16 %v4119_v63  ;;  %v426_v53 = vmul.f32 %v4772_v41, %v4772_v41  ;;  %v4809_v62 = vpop.eup %3388  ;;  %v4812_v44 = vmul.f32 %v4638_v38, %v639_v32 }
 0x135   :  { %v4790_v13 = vsub.f32 %v6802_v4, %v286_v23  ;;  %v4799_v22 = vsub.f32 %v6803_v49, %v286_v23  ;;  %v4815_v2 = vsel %vm623_vm13, %v4652_v27, %v620_v45  ;;  %v648_v46 = vmul.f32 0.5, %v647_v9 }
 0x136   :  { %v4803_v61 = vsub.f32 %v6804_v60, %v286_v23  ;;  %v427_v59 = vmul.f32 %v4782_v5, %v4782_v5  ;;  %v4817_v1 = vpack.c.bf16 %v945_v34, %v940_v0  ;;  %v570_v10 = vmul.f32 %v506_v35, %v3875_v57 }
 0x137   :  { %v428_v63 = vmul.f32 %v4790_v13, %v4790_v13  ;;  %v6807_v32 = vunpack.c.l.bf16 %v4130_v12  ;;  %v6808_v27 = vunpack.c.h.bf16 %v4130_v12  ;;  %v6809_v9 = vunpack.c.l.bf16 %v4139_v14 }
 0x138   :  { %6805 = vst [vmem:[#allocation57_spill] sm:$0xff] %v4803_v61  ;;  %v430_v23 = vmul.f32 %v4803_v61, %v4803_v61  ;;  %v528_v54 = vadd.f32 %v427_v59, %v426_v53  ;;  %1691 = vmatmul.bf16.vlgmr.msra.gmra.mxu3 %v4817_v1  ;;  %v6811_v0 = vunpack.c.h.bf16 %v4139_v14  ;;  %v656_v4 = vmul.f32 %v4809_v62, %v4726_v7 }
 0x139   :  { %6806 = vst [vmem:[#allocation58_spill] sm:$0xff] %v4817_v1  ;;  %v4827_v36 = vsub.f32 %v6807_v32, %v289_v24  ;;  %v4831_v45 = vsub.f32 %v6808_v27, %v289_v24  ;;  %v4835_v37 = vsub.f32 %v6809_v9, %v289_v24  ;;  %v429_v35 = vmul.f32 %v4799_v22, %v4799_v22 }
 0x13a   :  { %v4839_v34 = vsub.f32 %v6811_v0, %v289_v24  ;;  %v529_v49 = vadd.f32 %v528_v54, %v428_v63  ;;  %v4845_v60 = vadd.f32 1e-05, %v570_v10  ;;  %v6813_v12 = vunpack.c.l.bf16 %v4165_v51 }
 0x13b   :  { %6810 = vst [vmem:[#allocation59_spill] sm:$0xff] %v4835_v37  ;;  %v441_v59 = vmul.f32 %v4827_v36, %v4827_v36  ;;  %v442_v14 = vmul.f32 %v4831_v45, %v4831_v45  ;;  %v443_v32 = vmul.f32 %v4835_v37, %v4835_v37  ;;  %v649_v27 = vsub.f32 1.5, %v648_v46 }
 0x13c   :  { %6812 = vst [vmem:[#allocation60_spill] sm:$0xff] %v4839_v34  ;;  %v4849_v53 = vsub.f32 %v6813_v12, %v289_v24  ;;  %v530_v9 = vadd.f32 %v529_v49, %v429_v35  ;;  %v531_v0 = vsel %vm158_vm0, %v430_v23, 0.0  ;;  %3390 = vrsqrt.f32 %v4845_v60 }
 0x13d   :  { %vm641_vm14 = vweird.f32 %v4578_v55  ;;  %vm642_vm15 = vweird.f32 %v4638_v38  ;;  %v444_v51 = vmul.f32 %v4839_v34, %v4839_v34  ;;  %v549_v63 = vadd.f32 %v442_v14, %v441_v59  ;;  %v6823_v34 = vld [vmem:[#allocation6_spill] sm:$0xff] }
 0x13e   :  { %6814 = vst [vmem:[#allocation61_spill] sm:$0xff] %v4849_v53  ;;  %v445_v24 = vmul.f32 %v4849_v53, %v4849_v53  ;;  %v6815_v54 = vunpack.c.l.bf16 %v4149_v33  ;;  %v532_v46 = vadd.f32 %v531_v0, %v530_v9  ;;  %v6816_v23 = vunpack.c.h.bf16 %v4149_v33  ;;  %v267_v0 = vpop.xlane.xlu2 %266  ;;  %vm643_vm3 = vmor %vm641_vm14, %vm642_vm15 }
 0x13f   :  { %v6817_v49 = vunpack.c.l.bf16 %v4157_v20  ;;  %v6818_v1 = vunpack.c.h.bf16 %v4157_v20  ;;  %vm651_vm1 = vweird.f32 %v4654_v43  ;;  %v657_v59 = vmul.f32 %v4809_v62, %v656_v4 }
 0x140   :  { %v4867_v10 = vsub.f32 %v6815_v54, %v287_v25  ;;  %v4871_v35 = vsub.f32 %v6816_v23, %v287_v25  ;;  %v550_v14 = vadd.f32 %v549_v63, %v443_v32  ;;  %v6819_v54 = vunpack.c.l.bf16 %v4183_v19  ;;  %533 = vadd.xlane.f32.xlu0 %v532_v46 }
 0x141   :  { %v4875_v12 = vsub.f32 %v6817_v49, %v287_v25  ;;  %v4879_v58 = vsub.f32 %v6818_v1, %v287_v25  ;;  %vm652_vm2 = vweird.f32 %v4723_v18  ;;  %v552_v20 = vsel %vm158_vm0, %v445_v24, 0.0  ;;  %v6821_v49 = vld [vmem:[#allocation5_spill] sm:$0xff] }
 0x142   :  { %v4885_v9 = vsub.f32 %v6819_v54, %v287_v25  ;;  %v431_v33 = vmul.f32 %v4867_v10, %v4867_v10  ;;  %v432_v1 = vmul.f32 %v4871_v35, %v4871_v35  ;;  %v551_v32 = vadd.f32 %v550_v14, %v444_v51  ;;  %v4901_v46 = vpop.eup %3390  ;;  %vm653_vm4 = vmor %vm651_vm1, %vm652_vm2 }
 0x143   :  { %v433_v4 = vmul.f32 %v4875_v12, %v4875_v12  ;;  %v765_v25 = vmul.f32 %v4815_v2, %v3895_v29  ;;  %v770_v63 = vmul.f32 %v4775_v16, %v3980_v50  ;;  %v434_v24 = vmul.f32 %v4879_v58, %v4879_v58 }
 0x144   :  { %6820 = vst [vmem:[#allocation62_spill] sm:$0xff] %v4885_v9  ;;  %v435_v19 = vmul.f32 %v4885_v9, %v4885_v9  ;;  %v535_v23 = vadd.f32 %v432_v1, %v431_v33  ;;  %v766_v54 = vmul.f32 %v4815_v2, %v6821_v49  ;;  %v771_v51 = vmul.f32 %v4775_v16, %v6822_v56 }
 0x145   :  { %v650_v14 = vmul.f32 %v4723_v18, %v649_v27  ;;  %v4910_v3 = vmul.f32 0.5, %v657_v59  ;;  %v290_v29 = vmul.f32 %v3875_v57, %v267_v0  ;;  %v666_v50 = vmul.f32 %v4901_v46, %v4845_v60 }
 0x146   :  { %v553_v53 = vadd.f32 %v552_v20, %v551_v32  ;;  %v536_v9 = vadd.f32 %v535_v23, %v433_v4  ;;  %v538_v61 = vsel %vm158_vm0, %v435_v19, 0.0  ;;  %v856_v33 = vmul.f32 %v4613_v42, %v765_v25  ;;  %v6824_v20 = vld [vmem:[#allocation11_spill] sm:$0xff] }
 0x147   :  { %v667_v1 = vmul.f32 %v4901_v46, %v666_v50  ;;  %v861_v49 = vmul.f32 %v4613_v42, %v770_v63  ;;  %v857_v56 = vmul.f32 %v4631_v21, %v766_v54  ;;  %v862_v27 = vmul.f32 %v4631_v21, %v771_v51  ;;  %v6825_v23 = vld [vmem:[#allocation7_spill] sm:$0xff] }
 0x148   :  { %v537_v59 = vadd.f32 %v536_v9, %v434_v24  ;;  %v947_v0 = vadd.f32 %v4624_v28, %v856_v33  ;;  %v767_v37 = vmul.f32 %v4815_v2, %v6823_v34  ;;  %v772_v4 = vmul.f32 %v4775_v16, %v6824_v20  ;;  %554 = vadd.xlane.f32.xlu0 %v553_v53 }
 0x149   :  { %v668_v32 = vmul.f32 0.5, %v667_v1  ;;  %v952_v19 = vadd.f32 %v4624_v28, %v861_v49  ;;  %v948_v25 = vadd.f32 %v4647_v8, %v857_v56  ;;  %v953_v63 = vadd.f32 %v4647_v8, %v862_v27  ;;  %v6828_v1 = vld [vmem:[#allocation12_spill] sm:$0xff] }
 0x14a   :  { %v539_v9 = vadd.f32 %v538_v61, %v537_v59  ;;  %v858_v24 = vmul.f32 %v4650_v6, %v767_v37  ;;  %v863_v34 = vmul.f32 %v4650_v6, %v772_v4  ;;  %v768_v54 = vmul.f32 %v4815_v2, %v6825_v23 }
 0x14b   :  { %v4939_v51 = vsel %vm643_vm3, %v4638_v38, %v4812_v44  ;;  %v4941_v50 = vpack.c.bf16 %v952_v19, %v947_v0  ;;  %v4943_v33 = vpack.c.bf16 %v953_v63, %v948_v25  ;;  %v773_v55 = vmul.f32 %v4775_v16, %v6828_v1 }
 0x14c   :  { %540 = vadd.xlane.f32.xlu1 %v539_v9  ;;  %v949_v61 = vadd.f32 %v4666_v31, %v858_v24  ;;  %v954_v37 = vadd.f32 %v4666_v31, %v863_v34  ;;  %v859_v38 = vmul.f32 %v4709_v26, %v768_v54  ;;  %v6829_v44 = vunpack.c.l.bf16 %v4245_v40  ;;  %v6836_v54 = vld [vmem:[#allocation15_spill] sm:$0xff] }
 0x14d   :  { %6826 = vst [vmem:[#allocation5_spill] sm:$0xff] %v4941_v50  ;;  %v4959_v49 = vsel %vm653_vm4, %v4723_v18, %v650_v14  ;;  %v659_v56 = vsub.f32 1.5, %v4910_v3  ;;  %v669_v27 = vsub.f32 1.5, %v668_v32  ;;  %1549 = vmatmul.bf16.gmra.mxu0 %v4941_v50  ;;  %1598 = vmatmul.bf16.gmra.mxu1 %v4943_v33  ;;  %v864_v43 = vmul.f32 %v4709_v26, %v773_v55  ;;  %v6837_v55 = vld [vmem:[#allocation20_spill] sm:$0xff] }
 0x14e   :  { %6827 = vst [vmem:[#allocation10_spill] sm:$0xff] %v4943_v33  ;;  %v4956_v53 = vsub.f32 %v6829_v44, %v290_v29  ;;  %v4965_v59 = vpack.c.bf16 %v954_v37, %v949_v61  ;;  %v950_v0 = vadd.f32 %v4721_v47, %v859_v38  ;;  %v6831_v20 = vunpack.c.h.bf16 %v4245_v40  ;;  %v6838_v37 = vld [vmem:[#allocation16_spill] sm:$0xff] }
 0x14f   :  { %v6832_v18 = vunpack.c.l.bf16 %v4260_v15  ;;  %vm671_vm5 = vweird.f32 %v4845_v60  ;;  %vm672_vm6 = vweird.f32 %v4901_v46  ;;  %v955_v3 = vadd.f32 %v4721_v47, %v864_v43 }
 0x150   :  { %6830 = vst [vmem:[#allocation6_spill] sm:$0xff] %v4965_v59  ;;  %v4970_v4 = vsub.f32 %v6831_v20, %v290_v29  ;;  %v6833_v32 = vunpack.c.h.bf16 %v4260_v15  ;;  %1647 = vmatmul.bf16.gmra.mxu2 %v4965_v59  ;;  %v6834_v40 = vunpack.c.l.bf16 %v4280_v52  ;;  %v446_v63 = vmul.f32 %v4956_v53, %v4956_v53  ;;  %vm673_vm9 = vmor %vm671_vm5, %vm672_vm6 }
 0x151   :  { %v4974_v14 = vsub.f32 %v6832_v18, %v290_v29  ;;  %v670_v34 = vmul.f32 %v4901_v46, %v669_v27  ;;  %v4995_v15 = vpack.c.bf16 %v955_v3, %v950_v0  ;;  %v775_v52 = vmul.f32 %v4939_v51, %v6836_v54  ;;  %v6839_v27 = vld [vmem:[#allocation21_spill] sm:$0xff] }
 0x152   :  { %v4981_v19 = vsub.f32 %v6833_v32, %v290_v29  ;;  %v4986_v25 = vsub.f32 %v6834_v40, %v290_v29  ;;  %v447_v9 = vmul.f32 %v4970_v4, %v4970_v4  ;;  %v780_v61 = vmul.f32 %v4959_v49, %v6837_v55 }
 0x153   :  { %v448_v24 = vmul.f32 %v4974_v14, %v4974_v14  ;;  %6835 = vst [vmem:[#allocation11_spill] sm:$0xff] %v4995_v15  ;;  %v776_v38 = vmul.f32 %v4939_v51, %v6838_v37  ;;  %v660_v44 = vmul.f32 %v4809_v62, %v659_v56  ;;  %vm661_vm7 = vweird.f32 %v4726_v7  ;;  %1696 = vmatmul.bf16.gmra.mxu3 %v4995_v15  ;;  %v6840_v56 = vld [vmem:[#allocation17_spill] sm:$0xff]  ;;  %v6844_v7 = vld [vmem:[#allocation30_spill] sm:$0xff] }
 0x154   :  { %v449_v23 = vmul.f32 %v4981_v19, %v4981_v19  ;;  %v450_v29 = vmul.f32 %v4986_v25, %v4986_v25  ;;  %v556_v1 = vadd.f32 %v447_v9, %v446_v63  ;;  %vm662_vm8 = vweird.f32 %v4809_v62  ;;  %v6841_v63 = vld [vmem:[#allocation22_spill] sm:$0xff] }
 0x155   :  { %v781_v43 = vmul.f32 %v4959_v49, %v6839_v27  ;;  %v866_v20 = vmul.f32 %v4613_v42, %v775_v52  ;;  %v871_v18 = vmul.f32 %v4613_v42, %v780_v61  ;;  %v777_v3 = vmul.f32 %v4939_v51, %v6840_v56  ;;  %v6842_v61 = vld [vmem:[#allocation18_spill] sm:$0xff]  ;;  %vm663_vm10 = vmor %vm661_vm7, %vm662_vm8 }
 0x156   :  { %v557_v0 = vadd.f32 %v556_v1, %v448_v24  ;;  %v559_v32 = vsel %vm158_vm0, %v450_v29, 0.0  ;;  %v867_v40 = vmul.f32 %v4631_v21, %v776_v38  ;;  %v782_v9 = vmul.f32 %v4959_v49, %v6841_v63 }
 0x157   :  { %v872_v60 = vmul.f32 %v4631_v21, %v781_v43  ;;  %v5027_v54 = vsel %vm673_vm9, %v4901_v46, %v670_v34  ;;  %v962_v52 = vadd.f32 %v4624_v28, %v871_v18  ;;  %v778_v29 = vmul.f32 %v4939_v51, %v6842_v61  ;;  %v6843_v46 = vld [vmem:[#allocation23_spill] sm:$0xff]  ;;  %v6850_v61 = vld [vmem:[#allocation26_spill] sm:$0xff] }
 0x158   :  { %v558_v24 = vadd.f32 %v557_v0, %v449_v23  ;;  %v873_v55 = vmul.f32 %v4650_v6, %v782_v9  ;;  %v868_v38 = vmul.f32 %v4650_v6, %v777_v3  ;;  %v783_v34 = vmul.f32 %v4959_v49, %v6843_v46 }
 0x159   :  { %v963_v1 = vadd.f32 %v4647_v8, %v872_v60  ;;  %v5042_v23 = vsel %vm663_vm10, %v4809_v62, %v660_v44  ;;  %v957_v27 = vadd.f32 %v4624_v28, %v866_v20  ;;  %v958_v43 = vadd.f32 %v4647_v8, %v867_v40  ;;  %v6847_v44 = vld [vmem:[#allocation25_spill] sm:$0xff]  ;;  %v6848_v40 = vld [vmem:[#allocation31_spill] sm:$0xff] }
 0x15a   :  { %v560_v37 = vadd.f32 %v559_v32, %v558_v24  ;;  %v964_v0 = vadd.f32 %v4666_v31, %v873_v55  ;;  %v874_v18 = vmul.f32 %v4709_v26, %v783_v34  ;;  %v790_v56 = vmul.f32 %v5027_v54, %v6844_v7  ;;  %v3114_v24 = vld [vmem:[%s6547_s3 + $0x240] sm:$0xf] }
 0x15b   :  { %v5050_v32 = vpack.c.bf16 %v962_v52, %v957_v27  ;;  %v5052_v3 = vpack.c.bf16 %v963_v1, %v958_v43  ;;  %v869_v60 = vmul.f32 %v4709_v26, %v778_v29  ;;  %v959_v62 = vadd.f32 %v4666_v31, %v868_v38  ;;  %v3241_v52 = vld [vmem:[%s6547_s3 + $0x244] sm:$0x30]  ;;  %v3106_v27 = vld [vmem:[%s6547_s3 + $0x230] sm:$0xf]  ;;  %v3239_v43 = vld [vmem:[%s6547_s3 + $0x234] sm:$0xf0] }
 0x15c   :  { %561 = vadd.xlane.f32.xlu1 %v560_v37  ;;  %v785_v20 = vmul.f32 %v5042_v23, %v6847_v44  ;;  %v791_v63 = vmul.f32 %v5027_v54, %v6848_v40  ;;  %v965_v9 = vadd.f32 %v4721_v47, %v874_v18  ;;  %v881_v55 = vmul.f32 %v4613_v42, %v790_v56  ;;  %v6852_v18 = vld [vmem:[#allocation27_spill] sm:$0xff] }
 0x15d   :  { %6845 = vst [vmem:[#allocation7_spill] sm:$0xff] %v5050_v32  ;;  %1554 = vmatmul.bf16.gmra.mxu0 %v5050_v32  ;;  %1603 = vmatmul.bf16.gmra.mxu1 %v5052_v3  ;;  %v5069_v1 = vpack.c.bf16 %v964_v0, %v959_v62  ;;  %v786_v29 = vmul.f32 %v5042_v23, %v6850_v61  ;;  %vm1529_vm11 = vcmask 1045504   ;;  %v6853_v62 = vld [vmem:[#allocation32_spill] sm:$0xff] }
 0x15e   :  { %6846 = vst [vmem:[#allocation12_spill] sm:$0xff] %v5052_v3  ;;  %v960_v37 = vadd.f32 %v4721_v47, %v869_v60  ;;  %v876_v38 = vmul.f32 %v4613_v42, %v785_v20  ;;  %v882_v46 = vmul.f32 %v4631_v21, %v791_v63  ;;  %v3115_v34 = vor.u32 %v3241_v52, %v3114_v24  ;;  %v6854_v52 = vld [vmem:[#allocation33_spill] sm:$0xff] }
 0x15f   :  { %6849 = vst [vmem:[#allocation15_spill] sm:$0xff] %v5069_v1  ;;  %v787_v7 = vmul.f32 %v5042_v23, %v6852_v18  ;;  %v972_v56 = vadd.f32 %v4624_v28, %v881_v55  ;;  %v877_v60 = vmul.f32 %v4631_v21, %v786_v29  ;;  %v792_v44 = vmul.f32 %v5027_v54, %v6853_v62  ;;  %v6855_v29 = vld [vmem:[#allocation8_spill] sm:$0xff] }
 0x160   :  { %1652 = vmatmul.bf16.gmra.mxu2 %v5069_v1  ;;  %v5084_v0 = vpack.c.bf16 %v965_v9, %v960_v37  ;;  %v1531_v20 = vsel %vm1529_vm11, %v3115_v34, 0  ;;  %v3107_v40 = vor.u32 %v3239_v43, %v3106_v27  ;;  %v5095_v63 = vperm.slane %v4584_v30, 4  ;;  %v6856_v34 = vld [vmem:[#allocation14_spill] sm:$0xff]  ;;  %v6858_v43 = vld [vmem:[#allocation28_spill] sm:$0xff] }
 0x161   :  { %1735 = vmatpush.bf16.msrb.mxu0 %v1531_v20  ;;  %v967_v9 = vadd.f32 %v4624_v28, %v876_v38  ;;  %v973_v24 = vadd.f32 %v4647_v8, %v882_v46  ;;  %v793_v55 = vmul.f32 %v5027_v54, %v6854_v52  ;;  %v878_v61 = vmul.f32 %v4650_v6, %v787_v7  ;;  %v6859_v20 = vld [vmem:[#allocation9_spill] sm:$0xff] }
 0x162   :  { %6851 = vst [vmem:[#allocation20_spill] sm:$0xff] %v5084_v0  ;;  %v759_v37 = vmul.f32 %v4683_v48, %v6855_v29  ;;  %v764_v18 = vmul.f32 %v4691_v17, %v6856_v34  ;;  %v5107_v27 = vperm.slane %v4597_v39, 4  ;;  %v968_v38 = vadd.f32 %v4647_v8, %v877_v60  ;;  %v6860_v52 = vld [vmem:[#allocation13_spill] sm:$0xff]  ;;  %v6863_v29 = vld [vmem:[#allocation24_spill] sm:$0xff] }
 0x163   :  { %1701 = vmatmul.bf16.gmra.mxu3 %v5084_v0  ;;  %v5109_v30 = vpack.c.bf16 %v972_v56, %v967_v9  ;;  %v883_v46 = vmul.f32 %v4650_v6, %v792_v44  ;;  %v788_v62 = vmul.f32 %v5042_v23, %v6858_v43  ;;  %v769_v17 = vmul.f32 %v4815_v2, %v6859_v20  ;;  %v6862_v9 = vld [vmem:[#allocation19_spill] sm:$0xff] }
 0x164   :  { %v850_v7 = vmul.f32 %v5095_v63, %v759_v37  ;;  %v855_v48 = vmul.f32 %v5095_v63, %v764_v18  ;;  %v774_v39 = vmul.f32 %v4775_v16, %v6860_v52  ;;  %v5121_v56 = vpack.c.bf16 %v973_v24, %v968_v38  ;;  %v6864_v38 = vld [vmem:[#allocation29_spill] sm:$0xff] }
 0x165   :  { %6857 = vst [vmem:[#allocation16_spill] sm:$0xff] %v5109_v30  ;;  %1736 = vmatpush.bf16.msrb.mxu0 %v3107_v40  ;;  %v884_v60 = vmul.f32 %v4709_v26, %v793_v55  ;;  %v779_v44 = vmul.f32 %v4939_v51, %v6862_v9  ;;  %v784_v40 = vmul.f32 %v4959_v49, %v6863_v29 }
 0x166   :  { %6861 = vst [vmem:[#allocation21_spill] sm:$0xff] %v5121_v56  ;;  %v941_v37 = vadd.f32 %v5107_v27, %v850_v7  ;;  %v946_v34 = vadd.f32 %v5107_v27, %v855_v48  ;;  %v860_v18 = vmul.f32 %v5095_v63, %v769_v17  ;;  %v865_v2 = vmul.f32 %v5095_v63, %v774_v39 }
 0x167   :  { %v974_v16 = vadd.f32 %v4666_v31, %v883_v46  ;;  %v870_v24 = vmul.f32 %v5095_v63, %v779_v44  ;;  %v875_v55 = vmul.f32 %v5095_v63, %v784_v40  ;;  %v789_v51 = vmul.f32 %v5042_v23, %v6864_v38 }
 0x168   :  { %v879_v43 = vmul.f32 %v4709_v26, %v788_v62  ;;  %v5138_v49 = vpack.c.bf16 %v946_v34, %v941_v37  ;;  %v951_v7 = vadd.f32 %v5107_v27, %v860_v18  ;;  %v956_v48 = vadd.f32 %v5107_v27, %v865_v2  ;;  %v6865_v62 = vld [vmem:[#allocation34_spill] sm:$0xff]  ;;  %v513_v18 = vpop.xlane.xlu0 %512 }
 0x169   :  { %v969_v20 = vadd.f32 %v4666_v31, %v878_v61  ;;  %v975_v17 = vadd.f32 %v4721_v47, %v884_v60  ;;  %v961_v46 = vadd.f32 %v5107_v27, %v870_v24  ;;  %v966_v52 = vadd.f32 %v5107_v27, %v875_v55 }
 0x16a   :  { %v5148_v23 = vpack.c.bf16 %v956_v48, %v951_v7  ;;  %v794_v39 = vmul.f32 %v5027_v54, %v6865_v62  ;;  %v880_v9 = vmul.f32 %v5095_v63, %v789_v51  ;;  %v970_v60 = vadd.f32 %v4721_v47, %v879_v43 }
 0x16b   :  { %v5153_v44 = vpack.c.bf16 %v974_v16, %v969_v20  ;;  %v5155_v61 = vpack.c.bf16 %v966_v52, %v961_v46  ;;  %v571_v2 = vmul.f32 %v513_v18, %v3875_v57 }
 0x16c   :  { %v885_v29 = vmul.f32 %v5095_v63, %v794_v39  ;;  %v5160_v40 = vpack.c.bf16 %v975_v17, %v970_v60  ;;  %v971_v37 = vadd.f32 %v5107_v27, %v880_v9 }
 0x16d   :  { %1559 = vmatmul.bf16.gmra.mxu0 %v5109_v30  ;;  %1608 = vmatmul.bf16.gmra.mxu1 %v5121_v56  ;;  %6866 = vst [vmem:[#allocation17_spill] sm:$0xff] %v5153_v44  ;;  %v587_v16 = vadd.f32 1e-05, %v571_v2 }
 0x16e   :  { %6867 = vst [vmem:[#allocation22_spill] sm:$0xff] %v5155_v61  ;;  %v976_v34 = vadd.f32 %v5107_v27, %v885_v29  ;;  %v3196_v61 = vld [vmem:[%s6547_s3 + $0xe4] sm:$0xf] }
 0x16f   :  { %6868 = vst [vmem:[#allocation18_spill] sm:$0xff] %v5160_v40  ;;  %3392 = vrsqrt.f32 %v587_v16  ;;  %vm681_vm12 = vweird.f32 %v587_v16 }
 0x170   :  { %1657 = vmatmul.bf16.gmra.mxu2 %v5153_v44  ;;  %v5165_v54 = vpack.c.bf16 %v976_v34, %v971_v37 }
 0x172   :  { %6869 = vst [vmem:[#allocation23_spill] sm:$0xff] %v5165_v54 }
 0x173   :  { %1706 = vmatmul.bf16.gmra.mxu3 %v5160_v40 }
 0x175   :  { %v3393_v24 = vpop.eup %3392 }
 0x176   :  { %v676_v51 = vmul.f32 %v3393_v24, %v587_v16  ;;  %vm682_vm13 = vweird.f32 %v3393_v24 }
 0x177   :  { %vm683_vm14 = vmor %vm681_vm12, %vm682_vm13 }
 0x178   :  { %v677_v7 = vmul.f32 %v3393_v24, %v676_v51 }
 0x17a   :  { %v678_v48 = vmul.f32 0.5, %v677_v7  ;;  %v6870_v7 = vld [vmem:[#allocation35_spill] sm:$0xff] }
 0x17c   :  { %v679_v62 = vsub.f32 1.5, %v678_v48 }
 0x17e   :  { %v680_v29 = vmul.f32 %v3393_v24, %v679_v62 }
 0x180   :  { %v5175_v2 = vsel %vm683_vm14, %v3393_v24, %v680_v29  ;;  %v3237_v24 = vld [vmem:[%s6547_s3 + $0x224] sm:$0xf0] }
 0x181   :  { %v795_v48 = vmul.f32 %v5175_v2, %v6870_v7 }
 0x18c   :  { %v520_v55 = vpop.xlane.xlu1 %519 }
 0x18d   :  { %v572_v38 = vmul.f32 %v520_v55, %v3875_v57 }
 0x18f   :  { %v588_v43 = vadd.f32 1e-05, %v572_v38 }
 0x191   :  { %3394 = vrsqrt.f32 %v588_v43  ;;  %vm691_vm1 = vweird.f32 %v588_v43 }
 0x197   :  { %v3395_v20 = vpop.eup %3394 }
 0x198   :  { %v527_v17 = vpop.xlane.xlu2 %526  ;;  %v686_v46 = vmul.f32 %v3395_v20, %v588_v43  ;;  %vm692_vm15 = vweird.f32 %v3395_v20 }
 0x199   :  { %v573_v52 = vmul.f32 %v527_v17, %v3875_v57  ;;  %v3098_v17 = vld [vmem:[%s6547_s3 + $0x220] sm:$0xf]  ;;  %vm693_vm2 = vmor %vm691_vm1, %vm692_vm15 }
 0x19a   :  { %v687_v39 = vmul.f32 %v3395_v20, %v686_v46  ;;  %v6871_v46 = vld [vmem:[#allocation36_spill] sm:$0xff] }
 0x19b   :  { %v5170_v9 = vadd.f32 1e-05, %v573_v52  ;;  %v796_v52 = vmul.f32 %v5175_v2, %v6871_v46 }
 0x19c   :  { %v688_v60 = vmul.f32 0.5, %v687_v39  ;;  %v3099_v39 = vor.u32 %v3237_v24, %v3098_v17  ;;  %v6875_v24 = vld [vmem:[#allocation41_spill] sm:$0xff] }
 0x19d   :  { %3396 = vrsqrt.f32 %v5170_v9  ;;  %v887_v0 = vmul.f32 %v4631_v21, %v796_v52  ;;  %v1131_v52 = vld [vmem:[%s6548_s4] sm:$0x3]  ;;  %vm701_vm4 = vweird.f32 %v5170_v9 }
 0x19e   :  { %v689_v37 = vsub.f32 1.5, %v688_v60  ;;  %v6872_v60 = vld [vmem:[#allocation37_spill] sm:$0xff]  ;;  %1737 = vmatpush.bf16.msrb.mxu0 %v3099_v39 }
 0x19f   :  { %v797_v29 = vmul.f32 %v5175_v2, %v6872_v60  ;;  %v978_v30 = vadd.f32 %v4647_v8, %v887_v0 }
 0x1a0   :  { %v690_v16 = vmul.f32 %v3395_v20, %v689_v37 }
 0x1a1   :  { %v888_v43 = vmul.f32 %v4650_v6, %v797_v29 }
 0x1a2   :  { %v548_v34 = vpop.xlane.xlu2 %547  ;;  %v5196_v37 = vsel %vm693_vm2, %v3395_v20, %v690_v16  ;;  %v6876_v16 = vld [vmem:[#allocation42_spill] sm:$0xff] }
 0x1a3   :  { %v5173_v18 = vpop.eup %3396  ;;  %v576_v55 = vmul.f32 %v548_v34, %v3875_v57  ;;  %v886_v34 = vmul.f32 %v4613_v42, %v795_v48  ;;  %v801_v20 = vmul.f32 %v5196_v37, %v6875_v24  ;;  %v802_v39 = vmul.f32 %v5196_v37, %v6876_v16  ;;  %v6877_v48 = vld [vmem:[#allocation43_spill] sm:$0xff] }
 0x1a4   :  { %v696_v38 = vmul.f32 %v5173_v18, %v5170_v9  ;;  %v803_v60 = vmul.f32 %v5196_v37, %v6877_v48  ;;  %vm702_vm3 = vweird.f32 %v5173_v18 }
 0x1a5   :  { %v5180_v51 = vadd.f32 1e-05, %v576_v55  ;;  %v6873_v55 = vld [vmem:[#allocation38_spill] sm:$0xff]  ;;  %v977_v29 = vadd.f32 %v4624_v28, %v886_v34  ;;  %v892_v16 = vmul.f32 %v4631_v21, %v801_v20  ;;  %v893_v15 = vmul.f32 %v4650_v6, %v802_v39  ;;  %vm703_vm5 = vmor %vm701_vm4, %vm702_vm3 }
 0x1a6   :  { %v697_v62 = vmul.f32 %v5173_v18, %v696_v38  ;;  %v798_v7 = vmul.f32 %v5175_v2, %v6873_v55  ;;  %v6874_v38 = vld [vmem:[#allocation40_spill] sm:$0xff]  ;;  %v894_v54 = vmul.f32 %v4709_v26, %v803_v60 }
 0x1a7   :  { %3398 = vrsqrt.f32 %v5180_v51  ;;  %v800_v17 = vmul.f32 %v5196_v37, %v6874_v38  ;;  %v5220_v38 = vperm.slane %v1131_v52, 0  ;;  %v979_v52 = vadd.f32 %v4666_v31, %v888_v43 }
 0x1a8   :  { %v698_v40 = vmul.f32 0.5, %v697_v62  ;;  %v889_v55 = vmul.f32 %v4709_v26, %v798_v7  ;;  %v983_v7 = vadd.f32 %v4647_v8, %v892_v16  ;;  %v985_v0 = vadd.f32 %v4721_v47, %v894_v54 }
 0x1a9   :  { %v891_v24 = vmul.f32 %v4613_v42, %v800_v17  ;;  %v984_v17 = vadd.f32 %v4666_v31, %v893_v15  ;;  %vm731_vm6 = vweird.f32 %v5180_v51 }
 0x1aa   :  { %v699_v48 = vsub.f32 1.5, %v698_v40 }
 0x1ab   :  { %v982_v34 = vadd.f32 %v4624_v28, %v891_v24  ;;  %v5239_v24 = vpack.c.bf16 %v983_v7, %v978_v30  ;;  %v5241_v16 = vpack.c.bf16 %v984_v17, %v979_v52  ;;  %v6883_v52 = vld [vmem:[#allocation45_spill] sm:$0xff] }
 0x1ac   :  { %v700_v43 = vmul.f32 %v5173_v18, %v699_v48 }
 0x1ad   :  { %v5203_v46 = vpop.eup %3398  ;;  %v1545_v56 = vpop.f32.mrf.mxu0  ;;  %v5237_v60 = vpack.c.bf16 %v982_v34, %v977_v29  ;;  %6879 = vst [vmem:[#allocation25_spill] sm:$0xff] %v5239_v24  ;;  %1613 = vmatmul.bf16.gmra.mxu1 %v5239_v24  ;;  %1662 = vmatmul.bf16.gmra.mxu2 %v5241_v16 }
 0x1ae   :  { %v726_v62 = vmul.f32 %v5203_v46, %v5180_v51  ;;  %v1546_v40 = vadd.f32 %v1545_v56, %v5220_v38  ;;  %6880 = vst [vmem:[#allocation31_spill] sm:$0xff] %v5241_v16  ;;  %vm732_vm7 = vweird.f32 %v5203_v46 }
 0x1af   :  { %6878 = vst [vmem:[#allocation30_spill] sm:$0xff] %v5237_v60  ;;  %1564 = vmatmul.bf16.gmra.mxu0 %v5237_v60  ;;  %vm733_vm8 = vmor %vm731_vm6, %vm732_vm7 }
 0x1b0   :  { %v727_v44 = vmul.f32 %v5203_v46, %v726_v62  ;;  %v1594_v39 = vpop.f32.mrf.mxu1  ;;  %v980_v62 = vadd.f32 %v4721_v47, %v889_v55 }
 0x1b1   :  { %v1595_v56 = vadd.f32 %v1594_v39, %v1546_v40 }
 0x1b2   :  { %v728_v15 = vmul.f32 0.5, %v727_v44  ;;  %v5257_v44 = vsel %vm703_vm5, %v5173_v18, %v700_v43 }
 0x1b3   :  { %v534_v1 = vpop.xlane.xlu0 %533  ;;  %v805_v17 = vmul.f32 %v5257_v44, %v6883_v52  ;;  %v3235_v52 = vld [vmem:[%s6547_s3 + $0x214] sm:$0xf0] }
 0x1b4   :  { %v574_v20 = vmul.f32 %v534_v1, %v3875_v57  ;;  %v5246_v1 = vpack.c.bf16 %v985_v0, %v980_v62  ;;  %v729_v54 = vsub.f32 1.5, %v728_v15 }
 0x1b5   :  { %v5272_v43 = vpop.f32.mrf.mxu0 }
 0x1b6   :  { %v5244_v3 = vadd.f32 1e-05, %v574_v20  ;;  %6881 = vst [vmem:[#allocation26_spill] sm:$0xff] %v5246_v1  ;;  %1711 = vmatmul.bf16.gmra.mxu3 %v5246_v1  ;;  %v6884_v20 = vld [vmem:[#allocation46_spill] sm:$0xff]  ;;  %v730_v39 = vmul.f32 %v5203_v46, %v729_v54 }
 0x1b7   :  { %v1643_v30 = vpop.f32.mrf.mxu2  ;;  %v806_v18 = vmul.f32 %v5257_v44, %v6884_v20  ;;  %6885 = vst [vmem:[#allocation32_spill] sm:$0xff] %v5272_v43  ;;  %v896_v20 = vmul.f32 %v4613_v42, %v805_v17  ;;  %v3180_v43 = vld [vmem:[%s6547_s3 + $0x64] sm:$0xf] }
 0x1b8   :  { %3400 = vrsqrt.f32 %v5244_v3  ;;  %v1644_v29 = vadd.f32 %v1643_v30, %v1595_v56  ;;  %v5274_v15 = vpop.f32.mrf.mxu1  ;;  %v6887_v56 = vld [vmem:[#allocation47_spill] sm:$0xff]  ;;  %vm711_vm9 = vweird.f32 %v5244_v3 }
 0x1b9   :  { %6886 = vst [vmem:[#allocation33_spill] sm:$0xff] %v5274_v15  ;;  %v807_v30 = vmul.f32 %v5257_v44, %v6887_v56  ;;  %v5297_v56 = vsel %vm733_vm8, %v5203_v46, %v730_v39  ;;  %v3182_v46 = vld [vmem:[%s6547_s3 + $0x74] sm:$0xf]  ;;  %v3012_v15 = vld [vmem:[%s6547_s3 + $0x178] sm:$0xf0] }
 0x1ba   :  { %v820_v17 = vmul.f32 %v5297_v56, %v4663_v11 }
 0x1bb   :  { %v555_v55 = vpop.xlane.xlu0 %554  ;;  %v1692_v48 = vpop.f32.mrf.mxu3 }
 0x1bc   :  { %v577_v9 = vmul.f32 %v555_v55, %v3875_v57  ;;  %v5262_v7 = vadd.f32 %v1692_v48, %v1644_v29  ;;  %v6888_v48 = vld [vmem:[#allocation48_spill] sm:$0xff] }
 0x1bd   :  { %v808_v54 = vmul.f32 %v5257_v44, %v6888_v48 }
 0x1be   :  { %6882 = vst [vmem:[#allocation27_spill] sm:$0xff] %v5262_v7  ;;  %v3401_v40 = vpop.eup %3400  ;;  %v5270_v0 = vadd.f32 1e-05, %v577_v9 }
 0x1bf   :  { %v541_v34 = vpop.xlane.xlu1 %540  ;;  %v706_v29 = vmul.f32 %v3401_v40, %v5244_v3  ;;  %v899_v1 = vmul.f32 %v4709_v26, %v808_v54  ;;  %vm712_vm10 = vweird.f32 %v3401_v40  ;;  %v2940_v3 = vld [vmem:[%s6547_s3 + $0xe8] sm:$0xf0] }
 0x1c0   :  { %v575_v62 = vmul.f32 %v541_v34, %v3875_v57  ;;  %3402 = vrsqrt.f32 %v5270_v0  ;;  %v3090_v34 = vld [vmem:[%s6547_s3 + $0x210] sm:$0xf]  ;;  %vm713_vm12 = vmor %vm711_vm9, %vm712_vm10  ;;  %vm741_vm1 = vweird.f32 %v5270_v0 }
 0x1c1   :  { %v707_v9 = vmul.f32 %v3401_v40, %v706_v29  ;;  %v3091_v51 = vor.u32 %v3235_v52, %v3090_v34  ;;  %v898_v29 = vmul.f32 %v4650_v6, %v807_v30  ;;  %v5314_v30 = vadd.f32 %v4624_v28, %v896_v20  ;;  %v3198_v34 = vld [vmem:[%s6547_s3 + $0xf4] sm:$0xf]  ;;  %v2948_v52 = vld [vmem:[%s6547_s3 + $0xf8] sm:$0xf0] }
 0x1c2   :  { %v5279_v55 = vadd.f32 1e-05, %v575_v62  ;;  %v897_v62 = vmul.f32 %v4631_v21, %v806_v18  ;;  %v2884_v18 = vld [vmem:[%s6547_s3 + $0x78] sm:$0xf0]  ;;  %v3214_v20 = vld [vmem:[%s6547_s3 + $0x174] sm:$0xf] }
 0x1c3   :  { %v708_v48 = vmul.f32 0.5, %v707_v9  ;;  %1738 = vmatpush.bf16.msrb.mxu0 %v3091_v51  ;;  %v5320_v9 = vadd.f32 %v4666_v31, %v898_v29  ;;  %v2887_v11 = vor.u32 %v3182_v46, %v2884_v18  ;;  %v6890_v29 = vld [vmem:[#allocation50_spill] sm:$0xff]  ;;  %v2951_v18 = vor.u32 %v3198_v34, %v2948_v52 }
 0x1c4   :  { %3404 = vrsqrt.f32 %v5279_v55  ;;  %v5317_v54 = vadd.f32 %v4647_v8, %v897_v62  ;;  %v821_v46 = vmul.f32 %v5297_v56, %v6890_v29  ;;  %v990_v52 = vadd.f32 %v4721_v47, %v899_v1 }
 0x1c5   :  { %v709_v7 = vsub.f32 1.5, %v708_v48  ;;  %v5333_v48 = vpop.f32.mrf.mxu2  ;;  %1781 = vmatpush.bf16.msrb.mxu1 %v2887_v11  ;;  %v3015_v60 = vor.u32 %v3214_v20, %v3012_v15  ;;  %1830 = vmatpush.bf16.msrb.mxu2 %v2951_v18  ;;  %vm721_vm14 = vweird.f32 %v5279_v55 }
 0x1c6   :  { %v5311_v39 = vpop.eup %3402  ;;  %6889 = vst [vmem:[#allocation8_spill] sm:$0xff] %v5333_v48  ;;  %v6891_v48 = vld [vmem:[#allocation51_spill] sm:$0xff]  ;;  %v5383_v18 = vmul.f32 %v4631_v21, %v821_v46 }
 0x1c7   :  { %v710_v51 = vmul.f32 %v3401_v40, %v709_v7  ;;  %v736_v62 = vmul.f32 %v5311_v39, %v5270_v0  ;;  %v2876_v7 = vld [vmem:[%s6547_s3 + $0x68] sm:$0xf0]  ;;  %v5354_v24 = vmul.f32 %v5297_v56, %v6891_v48  ;;  %v5368_v48 = vmul.f32 %v4613_v42, %v820_v17  ;;  %1879 = vmatpush.bf16.msrb.mxu3 %v3015_v60 }
 0x1c8   :  { %v2879_v32 = vor.u32 %v3180_v43, %v2876_v7  ;;  %v5370_v43 = vpop.f32.mrf.mxu3  ;;  %v2943_v7 = vor.u32 %v3196_v61, %v2940_v3  ;;  %vm742_vm2 = vweird.f32 %v5311_v39 }
 0x1c9   :  { %v5362_v59 = vsel %vm713_vm12, %v3401_v40, %v710_v51  ;;  %v737_v33 = vmul.f32 %v5311_v39, %v736_v62  ;;  %6892 = vst [vmem:[#allocation14_spill] sm:$0xff] %v5370_v43  ;;  %vm5500_vm3 = vmor %vm741_vm1, %vm742_vm2 }
 0x1ca   :  { %v5346_v16 = vpop.eup %3404  ;;  %v1550_v29 = vpop.f32.mrf.mxu0  ;;  %v810_v11 = vmul.f32 %v5362_v59, %v4772_v41  ;;  %v811_v40 = vmul.f32 %v5362_v59, %v4782_v5  ;;  %v812_v20 = vmul.f32 %v5362_v59, %v4790_v13  ;;  %v813_v17 = vmul.f32 %v5362_v59, %v4799_v22  ;;  %v3212_v41 = vld [vmem:[%s6547_s3 + $0x164] sm:$0xf]  ;;  %v3004_v5 = vld [vmem:[%s6547_s3 + $0x168] sm:$0xf0]  ;;  %1782 = vmatpush.bf16.msrb.mxu1 %v2879_v32 }
 0x1cb   :  { %v1599_v34 = vpop.f32.mrf.mxu1  ;;  %v716_v1 = vmul.f32 %v5346_v16, %v5279_v55  ;;  %v1551_v15 = vadd.f32 %v1550_v29, %v5220_v38  ;;  %v5394_v46 = vmul.f32 0.5, %v737_v33  ;;  %1831 = vmatpush.bf16.msrb.mxu2 %v2943_v7  ;;  %vm722_vm13 = vweird.f32 %v5346_v16 }
 0x1cc   :  { %v901_v29 = vmul.f32 %v4613_v42, %v810_v11  ;;  %v903_v61 = vmul.f32 %v4650_v6, %v812_v20  ;;  %v904_v3 = vmul.f32 %v4709_v26, %v813_v17  ;;  %v3178_v20 = vld [vmem:[%s6547_s3 + $0x54] sm:$0xf]  ;;  %vm723_vm15 = vmor %vm721_vm14, %vm722_vm13 }
 0x1cd   :  { %v717_v51 = vmul.f32 %v5346_v16, %v716_v1  ;;  %v1600_v60 = vadd.f32 %v1599_v34, %v1551_v15  ;;  %v902_v1 = vmul.f32 %v4631_v21, %v811_v40  ;;  %v3007_v34 = vor.u32 %v3212_v41, %v3004_v5  ;;  %v3082_v15 = vld [vmem:[%s6547_s3 + $0x200] sm:$0xf]  ;;  %v3233_v40 = vld [vmem:[%s6547_s3 + $0x204] sm:$0xf0]  ;;  %v6893_v41 = vld [vmem:[#allocation52_spill] sm:$0xff] }
 0x1ce   :  { %v992_v50 = vadd.f32 %v4624_v28, %v901_v29  ;;  %v994_v33 = vadd.f32 %v4666_v31, %v903_v61  ;;  %v995_v11 = vadd.f32 %v4721_v47, %v904_v3  ;;  %v823_v5 = vmul.f32 %v5297_v56, %v6893_v41 }
 0x1cf   :  { %v562_v62 = vpop.xlane.xlu1 %561  ;;  %v718_v22 = vmul.f32 0.5, %v717_v51  ;;  %1880 = vmatpush.bf16.msrb.mxu3 %v3007_v34  ;;  %v739_v61 = vsub.f32 1.5, %v5394_v46  ;;  %v3083_v55 = vor.u32 %v3233_v40, %v3082_v15  ;;  %v3176_v46 = vld [vmem:[%s6547_s3 + $0x44] sm:$0xf]  ;;  %v2860_v15 = vld [vmem:[%s6547_s3 + $0x48] sm:$0xf0] }
 0x1d0   :  { %v578_v13 = vmul.f32 %v562_v62, %v3875_v57  ;;  %v993_v57 = vadd.f32 %v4647_v8, %v902_v1  ;;  %v5416_v51 = vpack.c.bf16 %v992_v50, %v5314_v30  ;;  %v3194_v50 = vld [vmem:[%s6547_s3 + $0xd4] sm:$0xf]  ;;  %v2932_v30 = vld [vmem:[%s6547_s3 + $0xd8] sm:$0xf0]  ;;  %v5439_v29 = vpack.c.bf16 %v994_v33, %v5320_v9  ;;  %v3192_v40 = vld [vmem:[%s6547_s3 + $0xc4] sm:$0xf] }
 0x1d1   :  { %v719_v32 = vsub.f32 1.5, %v718_v22  ;;  %v5441_v1 = vpack.c.bf16 %v995_v11, %v990_v52  ;;  %v3210_v9 = vld [vmem:[%s6547_s3 + $0x154] sm:$0xf]  ;;  %v2996_v52 = vld [vmem:[%s6547_s3 + $0x158] sm:$0xf0]  ;;  %1739 = vmatpush.bf16.msrb.mxu0 %v3083_v55  ;;  %v914_v0 = vmul.f32 %v4709_v26, %v823_v5 }
 0x1d2   :  { %v5398_v43 = vadd.f32 1e-05, %v578_v13  ;;  %v5419_v62 = vpack.c.bf16 %v993_v57, %v5317_v54  ;;  %v5421_v17 = vpop.f32.mrf.mxu0  ;;  %v2868_v13 = vld [vmem:[%s6547_s3 + $0x58] sm:$0xf0]  ;;  %1569 = vmatmul.bf16.gmra.mxu0 %v5416_v51  ;;  %v913_v57 = vmul.f32 %v4650_v6, %v5354_v24  ;;  %1667 = vmatmul.bf16.gmra.mxu2 %v5439_v29  ;;  %v2935_v24 = vor.u32 %v3194_v50, %v2932_v30 }
 0x1d3   :  { %v5423_v7 = vpop.f32.mrf.mxu1  ;;  %v720_v54 = vmul.f32 %v5346_v16, %v719_v32  ;;  %6894 = vst [vmem:[#allocation28_spill] sm:$0xff] %v5441_v1  ;;  %v1648_v22 = vpop.f32.mrf.mxu2  ;;  %1716 = vmatmul.bf16.gmra.mxu3 %v5441_v1  ;;  %v740_v30 = vmul.f32 %v5311_v39, %v739_v61  ;;  %v2852_v5 = vld [vmem:[%s6547_s3 + $0x38] sm:$0xf0] }
 0x1d4   :  { %3406 = vrsqrt.f32 %v5398_v43  ;;  %1618 = vmatmul.bf16.gmra.mxu1 %v5419_v62  ;;  %v1649_v3 = vadd.f32 %v1648_v22, %v1600_v60  ;;  %v2871_v60 = vor.u32 %v3178_v20, %v2868_v13  ;;  %v2924_v20 = vld [vmem:[%s6547_s3 + $0xc8] sm:$0xf0]  ;;  %1832 = vmatpush.bf16.msrb.mxu2 %v2935_v24  ;;  %vm751_vm4 = vweird.f32 %v5398_v43 }
 0x1d5   :  { %v5457_v34 = vsel %vm723_vm15, %v5346_v16, %v720_v54  ;;  %v2988_v13 = vld [vmem:[%s6547_s3 + $0x148] sm:$0xf0] }
 0x1d6   :  { %v1697_v16 = vpop.f32.mrf.mxu3  ;;  %v815_v32 = vmul.f32 %v5457_v34, %v4867_v10  ;;  %v816_v33 = vmul.f32 %v5457_v34, %v4871_v35  ;;  %v817_v11 = vmul.f32 %v5457_v34, %v4875_v12  ;;  %v818_v10 = vmul.f32 %v5457_v34, %v4879_v58  ;;  %1783 = vmatpush.bf16.msrb.mxu1 %v2871_v60  ;;  %v3208_v12 = vld [vmem:[%s6547_s3 + $0x144] sm:$0xf] }
 0x1d7   :  { %v5481_v41 = vadd.f32 %v1697_v16, %v1649_v3  ;;  %v2999_v35 = vor.u32 %v3210_v9, %v2996_v52  ;;  %v2863_v58 = vor.u32 %v3176_v46, %v2860_v15  ;;  %v2927_v52 = vor.u32 %v3192_v40, %v2924_v20  ;;  %v6897_v16 = vld [vmem:[#allocation39_spill] sm:$0xff]  ;;  %v5533_v20 = vld [vmem:[%s6547_s3 + $0x248] sm:$0x30] }
 0x1d8   :  { %v906_v54 = vmul.f32 %v4613_v42, %v815_v32  ;;  %v907_v22 = vmul.f32 %v4631_v21, %v816_v33  ;;  %v908_v9 = vmul.f32 %v4650_v6, %v817_v11  ;;  %v909_v61 = vmul.f32 %v4709_v26, %v818_v10  ;;  %v5516_v33 = vld [vmem:[%s6547_s3 + $0x244] sm:$0xf] }
 0x1d9   :  { %1881 = vmatpush.bf16.msrb.mxu3 %v2999_v35  ;;  %v1002_v46 = vadd.f32 %v4624_v28, %v5368_v48  ;;  %v2991_v15 = vor.u32 %v3208_v12, %v2988_v13  ;;  %v799_v32 = vmul.f32 %v5175_v2, %v6897_v16  ;;  %v1003_v48 = vadd.f32 %v4647_v8, %v5383_v18  ;;  %v3174_v2 = vld [vmem:[%s6547_s3 + $0x34] sm:$0xf] }
 0x1da   :  { %v5491_v50 = vpop.eup %3406  ;;  %v1555_v60 = vpop.f32.mrf.mxu0  ;;  %1784 = vmatpush.bf16.msrb.mxu1 %v2863_v58  ;;  %1833 = vmatpush.bf16.msrb.mxu2 %v2927_v52  ;;  %v5538_v35 = vsel %vm5500_vm3, %v5311_v39, %v740_v30  ;;  %v997_v18 = vadd.f32 %v4624_v28, %v906_v54  ;;  %v998_v12 = vadd.f32 %v4647_v8, %v907_v22  ;;  %v3190_v58 = vld [vmem:[%s6547_s3 + $0xb4] sm:$0xf] }
 0x1db   :  { %v746_v55 = vmul.f32 %v5491_v50, %v5398_v43  ;;  %v1604_v24 = vpop.f32.mrf.mxu1  ;;  %v5519_v10 = vpop.f32.mrf.mxu2  ;;  %v1556_v40 = vadd.f32 %v1555_v60, %v5220_v38  ;;  %v1004_v13 = vadd.f32 %v4666_v31, %v913_v57  ;;  %v999_v3 = vadd.f32 %v4666_v31, %v908_v9  ;;  %v3206_v30 = vld [vmem:[%s6547_s3 + $0x134] sm:$0xf]  ;;  %v2980_v57 = vld [vmem:[%s6547_s3 + $0x138] sm:$0xf0] }
 0x1dc   :  { %6898 = vst [vmem:[#allocation9_spill] sm:$0xff] %v5519_v10  ;;  %v1000_v39 = vadd.f32 %v4721_v47, %v909_v61  ;;  %vm752_vm5 = vweird.f32 %v5491_v50  ;;  %v1005_v22 = vadd.f32 %v4721_v47, %v914_v0  ;;  %v2855_v9 = vor.u32 %v3174_v2, %v2852_v5  ;;  %v3172_v61 = vld [vmem:[%s6547_s3 + $0x24] sm:$0xf]  ;;  %v2908_v2 = vld [vmem:[%s6547_s3 + $0xa8] sm:$0xf0] }
 0x1dd   :  { %v747_v11 = vmul.f32 %v5491_v50, %v746_v55  ;;  %v2916_v55 = vld [vmem:[%s6547_s3 + $0xb8] sm:$0xf0]  ;;  %v1605_v60 = vadd.f32 %v1604_v24, %v1556_v40  ;;  %1882 = vmatpush.bf16.msrb.mxu3 %v2991_v15  ;;  %v2844_v24 = vld [vmem:[%s6547_s3 + $0x28] sm:$0xf0]  ;;  %v825_v16 = vmul.f32 %v5538_v35, %v4827_v36  ;;  %v3188_v0 = vld [vmem:[%s6547_s3 + $0xa4] sm:$0xf]  ;;  %v3119_v5 = vor.u32 %v5516_v33, %v5533_v20 }
 0x1de   :  { %v5559_v54 = vpop.f32.mrf.mxu3  ;;  %v2919_v40 = vor.u32 %v3190_v58, %v2916_v55  ;;  %v5580_v1 = vpack.c.bf16 %v1002_v46, %v997_v18  ;;  %1785 = vmatpush.bf16.msrb.mxu1 %v2855_v9  ;;  %v3204_v36 = vld [vmem:[%s6547_s3 + $0x124] sm:$0xf]  ;;  %v890_v58 = vmul.f32 %v5095_v63, %v799_v32  ;;  %v5592_v10 = vpack.c.bf16 %v1004_v13, %v999_v3  ;;  %vm753_vm6 = vmor %vm751_vm4, %vm752_vm5  ;;  %v6901_v9 = vld [vmem:[#allocation60_spill] sm:$0xff] }
 0x1df   :  { %v748_v52 = vmul.f32 0.5, %v747_v11  ;;  %6899 = vst [vmem:[#allocation13_spill] sm:$0xff] %v5559_v54  ;;  %v826_v11 = vmul.f32 %v5538_v35, %v4831_v45  ;;  %v2972_v45 = vld [vmem:[%s6547_s3 + $0x128] sm:$0xf0]  ;;  %v5590_v54 = vpack.c.bf16 %v1003_v48, %v998_v12  ;;  %v5594_v46 = vpack.c.bf16 %v1005_v22, %v1000_v39  ;;  %v3170_v3 = vld [vmem:[%s6547_s3 + $0x14] sm:$0xf] }
 0x1e0   :  { %1834 = vmatpush.bf16.msrb.mxu2 %v2919_v40  ;;  %v828_v48 = vmul.f32 %v5538_v35, %v6901_v9  ;;  %v2847_v12 = vor.u32 %v3172_v61, %v2844_v24  ;;  %v2911_v13 = vor.u32 %v3188_v0, %v2908_v2  ;;  %v916_v22 = vmul.f32 %v4613_v42, %v825_v16  ;;  %v3186_v61 = vld [vmem:[%s6547_s3 + $0x94] sm:$0xf]  ;;  %v2900_v24 = vld [vmem:[%s6547_s3 + $0x98] sm:$0xf0]  ;;  %v3168_v9 = vld [vmem:[%s6547_s3 + $0x4] sm:$0xf] }
 0x1e1   :  { %v749_v15 = vsub.f32 1.5, %v748_v52  ;;  %v2983_v52 = vor.u32 %v3206_v30, %v2980_v57  ;;  %v6900_v57 = vld [vmem:[#allocation59_spill] sm:$0xff]  ;;  %v2975_v40 = vor.u32 %v3204_v36, %v2972_v45  ;;  %v2964_v2 = vld [vmem:[%s6547_s3 + $0x118] sm:$0xf0] }
 0x1e2   :  { %v5600_v18 = vpop.f32.mrf.mxu0  ;;  %v827_v32 = vmul.f32 %v5538_v35, %v6900_v57  ;;  %v2836_v57 = vld [vmem:[%s6547_s3 + $0x18] sm:$0xf0]  ;;  %1574 = vmatmul.bf16.gmra.mxu0 %v5580_v1  ;;  %v3202_v0 = vld [vmem:[%s6547_s3 + $0x114] sm:$0xf]  ;;  %1672 = vmatmul.bf16.gmra.mxu2 %v5592_v10 }
 0x1e3   :  { %v750_v55 = vmul.f32 %v5491_v50, %v749_v15  ;;  %v5602_v30 = vpop.f32.mrf.mxu1  ;;  %1883 = vmatpush.bf16.msrb.mxu3 %v2983_v52  ;;  %v1653_v39 = vpop.f32.mrf.mxu2  ;;  %v917_v15 = vmul.f32 %v4631_v21, %v826_v11  ;;  %1786 = vmatpush.bf16.msrb.mxu1 %v2847_v12  ;;  %v2839_v45 = vor.u32 %v3170_v3, %v2836_v57  ;;  %v3184_v12 = vld [vmem:[%s6547_s3 + $0x84] sm:$0xf] }
 0x1e4   :  { %1623 = vmatmul.bf16.gmra.mxu1 %v5590_v54  ;;  %1721 = vmatmul.bf16.gmra.mxu3 %v5594_v46  ;;  %v1007_v3 = vadd.f32 %v4624_v28, %v916_v22 }
 0x1e5   :  { %v5612_v43 = vsel %vm753_vm6, %v5491_v50, %v750_v55  ;;  %v1654_v50 = vadd.f32 %v1653_v39, %v1605_v60  ;;  %1835 = vmatpush.bf16.msrb.mxu2 %v2911_v13  ;;  %v2903_v55 = vor.u32 %v3186_v61, %v2900_v24  ;;  %v2892_v13 = vld [vmem:[%s6547_s3 + $0x88] sm:$0xf0]  ;;  %v1008_v57 = vadd.f32 %v4647_v8, %v917_v15 }
 0x1e6   :  { %v830_v16 = vmul.f32 %v5612_v43, %v4956_v53  ;;  %v831_v11 = vmul.f32 %v5612_v43, %v4970_v4  ;;  %v832_v60 = vmul.f32 %v5612_v43, %v4974_v14  ;;  %v833_v53 = vmul.f32 %v5612_v43, %v4981_v19  ;;  %v1702_v52 = vpop.f32.mrf.mxu3  ;;  %v2828_v14 = vld [vmem:[%s6547_s3 + $0x8] sm:$0xf0] }
 0x1e7   :  { %v981_v4 = vadd.f32 %v5107_v27, %v890_v58  ;;  %v5651_v39 = vadd.f32 %v1702_v52, %v1654_v50  ;;  %v918_v58 = vmul.f32 %v4650_v6, %v827_v32  ;;  %1884 = vmatpush.bf16.msrb.mxu3 %v2975_v40  ;;  %v3200_v32 = vld [vmem:[%s6547_s3 + $0x104] sm:$0xf]  ;;  %v2956_v40 = vld [vmem:[%s6547_s3 + $0x108] sm:$0xf0]  ;;  %v2831_v50 = vor.u32 %v3168_v9, %v2828_v14 }
 0x1e8   :  { %v921_v36 = vmul.f32 %v4613_v42, %v830_v16  ;;  %v922_v19 = vmul.f32 %v4631_v21, %v831_v11  ;;  %v2967_v42 = vor.u32 %v3202_v0, %v2964_v2  ;;  %v923_v61 = vmul.f32 %v4650_v6, %v832_v60  ;;  %v6902_v16 = vld [vmem:[#allocation44_spill] sm:$0xff]  ;;  %v6903_v11 = vld [vmem:[#allocation49_spill] sm:$0xff]  ;;  %1787 = vmatpush.bf16.msrb.mxu1 %v2839_v45  ;;  %v6905_v45 = vld [vmem:[#allocation62_spill] sm:$0xff] }
 0x1e9   :  { %v919_v21 = vmul.f32 %v4709_v26, %v828_v48  ;;  %v924_v24 = vmul.f32 %v4709_v26, %v833_v53  ;;  %v804_v22 = vmul.f32 %v5196_v37, %v6902_v16  ;;  %v809_v15 = vmul.f32 %v5257_v44, %v6903_v11  ;;  %1836 = vmatpush.bf16.msrb.mxu2 %v2903_v55  ;;  %v6904_v60 = vld [vmem:[#allocation57_spill] sm:$0xff] }
 0x1ea   :  { %v1534_v6 = vsel %vm1529_vm11, %v3119_v5, 0  ;;  %v1560_v48 = vpop.f32.mrf.mxu0  ;;  %v1012_v0 = vadd.f32 %v4624_v28, %v921_v36  ;;  %v2895_v2 = vor.u32 %v3184_v12, %v2892_v13  ;;  %v814_v26 = vmul.f32 %v5362_v59, %v6904_v60  ;;  %v6906_v14 = vld [vmem:[#allocation53_spill] sm:$0xff] }
 0x1eb   :  { %v5683_v53 = vpop.f32.mrf.mxu2  ;;  %v1561_v37 = vadd.f32 %v1560_v48, %v5220_v38  ;;  %v1013_v44 = vadd.f32 %v4647_v8, %v922_v19  ;;  %1885 = vmatpush.bf16.msrb.mxu3 %v2967_v42  ;;  %v2959_v52 = vor.u32 %v3200_v32, %v2956_v40  ;;  %v895_v33 = vmul.f32 %v5095_v63, %v804_v22  ;;  %v1609_v20 = vpop.f32.mrf.mxu1  ;;  %v6907_v19 = vld [vmem:[#allocation61_spill] sm:$0xff] }
 0x1ec   :  { %v1014_v5 = vadd.f32 %v4666_v31, %v923_v61  ;;  %v900_v28 = vmul.f32 %v5095_v63, %v809_v15  ;;  %v905_v36 = vmul.f32 %v5095_v63, %v814_v26  ;;  %v819_v59 = vmul.f32 %v5457_v34, %v6905_v45  ;;  %1788 = vmatpush.bf16.msrb.mxu1 %v2831_v50  ;;  %v6918_v45 = vld [vmem:[#allocation23_spill] sm:$0xff] }
 0x1ed   :  { %v1610_v55 = vadd.f32 %v1609_v20, %v1561_v37  ;;  %v986_v9 = vadd.f32 %v5107_v27, %v895_v33  ;;  %v824_v8 = vmul.f32 %v5297_v56, %v6906_v14  ;;  %v829_v42 = vmul.f32 %v5538_v35, %v6907_v19  ;;  %1837 = vmatpush.bf16.msrb.mxu2 %v2895_v2  ;;  %v6912_v37 = vld [vmem:[#allocation10_spill] sm:$0xff]  ;;  %v6915_v33 = vld [vmem:[#allocation7_spill] sm:$0xff]  ;;  %v6916_v20 = vld [vmem:[#allocation12_spill] sm:$0xff] }
 0x1ee   :  { %v5698_v12 = vpop.f32.mrf.mxu3  ;;  %v991_v13 = vadd.f32 %v5107_v27, %v900_v28  ;;  %v996_v61 = vadd.f32 %v5107_v27, %v905_v36  ;;  %v910_v32 = vmul.f32 %v5095_v63, %v819_v59  ;;  %v1015_v34 = vadd.f32 %v4721_v47, %v924_v24  ;;  %v6919_v59 = vld [vmem:[#allocation16_spill] sm:$0xff] }
 0x1ef   :  { %1886 = vmatpush.bf16.msrb.mxu3 %v2959_v52  ;;  %v5704_v40 = vpack.c.bf16 %v986_v9, %v981_v4  ;;  %v915_v56 = vmul.f32 %v5095_v63, %v824_v8  ;;  %v834_v50 = vmul.f32 %v5612_v43, %v4986_v25  ;;  %v920_v22 = vmul.f32 %v5095_v63, %v829_v42  ;;  %v6914_v52 = vld [vmem:[#allocation22_spill] sm:$0xff]  ;;  %v6921_v9 = vld [vmem:[#allocation17_spill] sm:$0xff] }
 0x1f0   :  { %1980 = vmatpush.bf16.msra.mxu1 %v1534_v6  ;;  %v5707_v16 = vpack.c.bf16 %v996_v61, %v991_v13  ;;  %v1001_v35 = vadd.f32 %v5107_v27, %v910_v32  ;;  %v1009_v11 = vadd.f32 %v4666_v31, %v918_v58  ;;  %v1010_v15 = vadd.f32 %v4721_v47, %v919_v21  ;;  %v6909_v21 = vld [vmem:[#allocation55_spill] sm:$0xff]  ;;  %v6922_v32 = vld [vmem:[#allocation30_spill] sm:$0xff] }
 0x1f1   :  { %v1006_v24 = vadd.f32 %v5107_v27, %v915_v56  ;;  %v5716_v4 = vpack.c.bf16 %v1012_v0, %v1007_v3  ;;  %v5718_v48 = vpack.c.bf16 %v1013_v44, %v1008_v57  ;;  %v925_v6 = vmul.f32 %v5095_v63, %v834_v50  ;;  %v6908_v57 = vld [vmem:[#allocation54_spill] sm:$0xff]  ;;  %v6910_v0 = vld [vmem:[#allocation56_spill] sm:$0xff]  ;;  %v6924_v50 = vld [vmem:[#allocation31_spill] sm:$0xff] }
 0x1f2   :  { %v5721_v2 = vpack.c.bf16 %v1014_v5, %v1009_v11  ;;  %v5723_v60 = vpack.c.bf16 %v1015_v34, %v1010_v15  ;;  %v1011_v47 = vadd.f32 %v5107_v27, %v920_v22  ;;  %v6913_v44 = vld [vmem:[#allocation6_spill] sm:$0xff]  ;;  %v6917_v5 = vld [vmem:[#allocation15_spill] sm:$0xff]  ;;  %v5752_v28 = vpop.f32.mrf.mxu0  ;;  %v3076_v11 = vld [vmem:[%s6547_s3 + $0x1f8] sm:$0xf0]  ;;  %vm2034_vm11 = vcmask 523264  }
 0x1f3   :  { %v1658_v26 = vpop.f32.mrf.mxu2  ;;  %v5725_v25 = vpack.c.bf16 %v1006_v24, %v1001_v35  ;;  %1579 = vmatmul.bf16.gmra.mxu0 %v5716_v4  ;;  %v1016_v43 = vadd.f32 %v5107_v27, %v925_v6  ;;  %v6911_v27 = vld [vmem:[#allocation5_spill] sm:$0xff]  ;;  %v5754_v36 = vpop.f32.mrf.mxu1  ;;  %v3230_v22 = vld [vmem:[%s6547_s3 + $0x1f4] sm:$0xf] }
 0x1f4   :  { %1628 = vmatmul.bf16.gmra.mxu1 %v5718_v48  ;;  %v1659_v31 = vadd.f32 %v1658_v26, %v1610_v55  ;;  %1677 = vmatmul.bf16.gmra.mxu2 %v5721_v2  ;;  %v6920_v55 = vld [vmem:[#allocation21_spill] sm:$0xff]  ;;  %v3079_v15 = vor.u32 %v3230_v22, %v3076_v11  ;;  %v2032_v11 = vld [vmem:[%s6549_s5 + $0x30] sm:$0xff] }
 0x1f5   :  { %1726 = vmatmul.bf16.gmra.mxu3 %v5723_v60  ;;  %v5733_v58 = vpack.c.bf16 %v1016_v43, %v1011_v47  ;;  %v6923_v35 = vld [vmem:[#allocation25_spill] sm:$0xff]  ;;  %v3226_v47 = vld [vmem:[%s6547_s3 + $0x1d4] sm:$0xf] }
 0x1f6   :  { %v1707_v63 = vpop.f32.mrf.mxu3  ;;  %1928 = vmatpush.bf16.msra.mxu0 %v3079_v15  ;;  %v3228_v26 = vld [vmem:[%s6547_s3 + $0x1e4] sm:$0xf] }
 0x1f7   :  { %v5735_v3 = vadd.f32 %v1707_v63, %v1659_v31  ;;  %v3068_v31 = vld [vmem:[%s6547_s3 + $0x1e8] sm:$0xf0]  ;;  %v3060_v63 = vld [vmem:[%s6547_s3 + $0x1d8] sm:$0xf0] }
 0x1f8   :  { %v3071_v43 = vor.u32 %v3228_v26, %v3068_v31  ;;  %v3220_v26 = vld [vmem:[%s6547_s3 + $0x1a4] sm:$0xf]  ;;  %v3036_v31 = vld [vmem:[%s6547_s3 + $0x1a8] sm:$0xf0] }
 0x1fa   :  { %1929 = vmatpush.bf16.msra.mxu0 %v3071_v43  ;;  %v3039_v43 = vor.u32 %v3220_v26, %v3036_v31 }
 0x1fb   :  { %v5764_v13 = vpop.f32.mrf.mxu2 }
 0x1fe   :  { %v5766_v61 = vpop.f32.mrf.mxu3 }
 0x203   :  { %3120 = vmatmul.msk.bf16.vlgmr.msrb.gmra.mxu0 %vm158_vm0, %v5138_v49 }
 0x204   :  { %1789 = vmatmul.bf16.vlgmr.msrb.gmra.mxu1 %v6908_v57  ;;  %1838 = vmatmul.bf16.vlgmr.msrb.gmra.mxu2 %v6909_v21 }
 0x205   :  { %1887 = vmatmul.bf16.vlgmr.msrb.gmra.mxu3 %v6910_v0  ;;  %v3063_v0 = vor.u32 %v3226_v47, %v3060_v63  ;;  %v3236_v47 = vld [vmem:[%s6547_s3 + $0x224] sm:$0xf]  ;;  %v3100_v63 = vld [vmem:[%s6547_s3 + $0x228] sm:$0xf0] }
 0x207   :  { %1930 = vmatpush.bf16.msra.mxu0 %v3063_v0  ;;  %v2031_v0 = vld [vmem:[%s6549_s5 + $0x28] sm:$0xff] }
 0x213   :  { %3121 = vmatmul.msk.bf16.gmra.mxu0 %vm158_vm0, %v5148_v23 }
 0x214   :  { %1794 = vmatmul.bf16.gmra.mxu1 %v6911_v27  ;;  %1843 = vmatmul.bf16.gmra.mxu2 %v6912_v37 }
 0x215   :  { %1892 = vmatmul.bf16.gmra.mxu3 %v6913_v44 }
 0x223   :  { %3122 = vmatmul.msk.bf16.gmra.mxu0 %vm158_vm0, %v6914_v52 }
 0x224   :  { %1799 = vmatmul.bf16.gmra.mxu1 %v6915_v33  ;;  %1848 = vmatmul.bf16.gmra.mxu2 %v6916_v20  ;;  %v3224_v20 = vld [vmem:[%s6547_s3 + $0x1c4] sm:$0xf] }
 0x225   :  { %1897 = vmatmul.bf16.gmra.mxu3 %v6917_v5  ;;  %v3052_v5 = vld [vmem:[%s6547_s3 + $0x1c8] sm:$0xf0] }
 0x22a   :  { %v1614_v19 = vpop.f32.mrf.mxu1 }
 0x22c   :  { %v1565_v14 = vpop.f32.mrf.mxu0 }
 0x22d   :  { %v1566_v8 = vadd.f32 %v1565_v14, %v5220_v38  ;;  %v3108_v14 = vld [vmem:[%s6547_s3 + $0x238] sm:$0xf0] }
 0x22f   :  { %v5762_v42 = vadd.f32 %v1614_v19, %v1566_v8 }
 0x230   :  { %v5771_v34 = vpop.f32.mrf.mxu2 }
 0x232   :  { %v5785_v6 = vpop.f32.mrf.mxu1 }
 0x233   :  { %3123 = vmatmul.msk.bf16.gmra.mxu0 %vm158_vm0, %v6918_v45 }
 0x234   :  { %1804 = vmatmul.bf16.gmra.mxu1 %v6919_v59  ;;  %1853 = vmatmul.bf16.gmra.mxu2 %v6920_v55  ;;  %v5783_v24 = vpop.f32.mrf.mxu0  ;;  %v3055_v59 = vor.u32 %v3224_v20, %v3052_v5  ;;  %v3222_v55 = vld [vmem:[%s6547_s3 + $0x1b4] sm:$0xf]  ;;  %v3028_v20 = vld [vmem:[%s6547_s3 + $0x198] sm:$0xf0] }
 0x235   :  { %1902 = vmatmul.bf16.gmra.mxu3 %v6921_v9  ;;  %v3238_v9 = vld [vmem:[%s6547_s3 + $0x234] sm:$0xf] }
 0x236   :  { %1931 = vmatpush.bf16.msra.mxu0 %v3055_v59  ;;  %v3111_v8 = vor.u32 %v3238_v9, %v3108_v14  ;;  %v3234_v59 = vld [vmem:[%s6547_s3 + $0x214] sm:$0xf] }
 0x238   :  { %v5799_v57 = vpop.f32.mrf.mxu2  ;;  %1981 = vmatpush.bf16.msra.mxu1 %v3111_v8 }
 0x239   :  { %v5773_v56 = vpop.f32.mrf.mxu3 }
 0x241   :  { %v5801_v21 = vpop.f32.mrf.mxu3 }
 0x243   :  { %3124 = vmatmul.msk.bf16.gmra.mxu0 %vm158_vm0, %v5704_v40 }
 0x244   :  { %1809 = vmatmul.bf16.gmra.mxu1 %v6922_v32  ;;  %1858 = vmatmul.bf16.gmra.mxu2 %v6923_v35 }
 0x245   :  { %1907 = vmatmul.bf16.gmra.mxu3 %v6924_v50 }
 0x24f   :  { %v1570_v27 = vpop.f32.mrf.mxu0 }
 0x250   :  { %v1571_v44 = vadd.f32 %v1570_v27, %v5220_v38  ;;  %v2030_v27 = vld [vmem:[%s6549_s5 + $0x20] sm:$0xff] }
 0x251   :  { %v1619_v37 = vpop.f32.mrf.mxu1 }
 0x252   :  { %v5804_v33 = vadd.f32 %v1619_v37, %v1571_v44  ;;  %v3103_v37 = vor.u32 %v3236_v47, %v3100_v63  ;;  %v3218_v44 = vld [vmem:[%s6547_s3 + $0x194] sm:$0xf]  ;;  %v3232_v47 = vld [vmem:[%s6547_s3 + $0x204] sm:$0xf]  ;;  %v2027_v63 = vld [vmem:[%s6549_s5 + $0x8] sm:$0xff] }
 0x253   :  { %3125 = vmatmul.msk.bf16.gmra.mxu0 %vm158_vm0, %v5707_v16  ;;  %v3031_v5 = vor.u32 %v3218_v44, %v3028_v20 }
 0x254   :  { %1814 = vmatmul.bf16.gmra.mxu1 %v5416_v51  ;;  %1863 = vmatmul.bf16.gmra.mxu2 %v5419_v62  ;;  %v3044_v51 = vld [vmem:[%s6547_s3 + $0x1b8] sm:$0xf0] }
 0x255   :  { %1912 = vmatmul.bf16.gmra.mxu3 %v5439_v29  ;;  %v2033_v62 = vld [vmem:[%s6549_s5 + $0x38] sm:$0xff]  ;;  %v3047_v29 = vor.u32 %v3222_v55, %v3044_v51  ;;  %v5832_v19 = vpop.f32.mrf.mxu2  ;;  %1982 = vmatpush.bf16.msra.mxu1 %v3103_v37 }
 0x256   :  { %2091 = vmatpush.msra.mxu2 %v2033_v62  ;;  %v5834_v32 = vpop.f32.mrf.mxu3  ;;  %2364 = vmatpush.msra.mxu3 %v2033_v62  ;;  %v3092_v55 = vld [vmem:[%s6547_s3 + $0x218] sm:$0xf0] }
 0x257   :  { %v1572_v35 = vpop.f32.mrf.mxu0  ;;  %1932 = vmatpush.bf16.msra.mxu0 %v3047_v29  ;;  %v2029_v51 = vld [vmem:[%s6549_s5 + $0x18] sm:$0xff] }
 0x258   :  { %v1573_v22 = vadd.f32 %v1572_v35, %v5220_v38  ;;  %2092 = vmatpush.msra.mxu2 %v2032_v11  ;;  %2365 = vmatpush.msra.mxu3 %v2032_v11  ;;  %v3095_v35 = vor.u32 %v3234_v59, %v3092_v55  ;;  %v3020_v11 = vld [vmem:[%s6547_s3 + $0x188] sm:$0xf0] }
 0x259   :  { %v1621_v50 = vpop.f32.mrf.mxu1 }
 0x25a   :  { %v5840_v15 = vadd.f32 %v1621_v50, %v1573_v22  ;;  %2093 = vmatpush.msra.mxu2 %v2031_v0  ;;  %2366 = vmatpush.msra.mxu3 %v2031_v0  ;;  %v2028_v50 = vld [vmem:[%s6549_s5 + $0x10] sm:$0xff]  ;;  %v3216_v22 = vld [vmem:[%s6547_s3 + $0x184] sm:$0xf] }
 0x25b   :  { %1933 = vmatpush.bf16.msra.mxu0 %v3039_v43  ;;  %v3023_v31 = vor.u32 %v3216_v22, %v3020_v11  ;;  %v3084_v43 = vld [vmem:[%s6547_s3 + $0x208] sm:$0xf0]  ;;  %1983 = vmatpush.bf16.msra.mxu1 %v3095_v35  ;;  %v2026_v0 = vld [vmem:[%s6549_s5] sm:$0xff] }
 0x25c   :  { %2094 = vmatpush.msra.mxu2 %v2030_v27  ;;  %2367 = vmatpush.msra.mxu3 %v2030_v27 }
 0x25d   :  { %v5875_v9 = vpop.f32.mrf.mxu2 }
 0x25e   :  { %v5877_v14 = vpop.f32.mrf.mxu3  ;;  %2095 = vmatpush.msra.mxu2 %v2029_v51  ;;  %2368 = vmatpush.msra.mxu3 %v2029_v51 }
 0x25f   :  { %v1575_v62 = vpop.f32.mrf.mxu0  ;;  %1934 = vmatpush.bf16.msra.mxu0 %v3031_v5 }
 0x260   :  { %v1576_v8 = vadd.f32 %v1575_v62, %v5220_v38  ;;  %2096 = vmatpush.msra.mxu2 %v2028_v50  ;;  %2369 = vmatpush.msra.mxu3 %v2028_v50 }
 0x261   :  { %v1624_v29 = vpop.f32.mrf.mxu1 }
 0x262   :  { %v5889_v26 = vadd.f32 %v1624_v29, %v1576_v8  ;;  %2097 = vmatpush.msra.mxu2 %v2027_v63  ;;  %2370 = vmatpush.msra.mxu3 %v2027_v63 }
 0x263   :  { %3126 = vmatmul.msk.bf16.gmra.mxu0 %vm158_vm0, %v5725_v25 }
 0x264   :  { %1819 = vmatmul.bf16.gmra.mxu1 %v5580_v1  ;;  %1868 = vmatmul.bf16.gmra.mxu2 %v5590_v54  ;;  %v3087_v1 = vor.u32 %v3232_v47, %v3084_v43  ;;  %v6925_v47 = vld [vmem:[#allocation32_spill] sm:$0xff] }
 0x265   :  { %1917 = vmatmul.bf16.gmra.mxu3 %v5592_v10  ;;  %1935 = vmatpush.bf16.msra.mxu0 %v3023_v31  ;;  %v5908_v27 = vpop.f32.mrf.mxu2  ;;  %v1548_v43 = vadd.f32 %v6925_v47, %v5220_v38 }
 0x266   :  { %1984 = vmatpush.bf16.msra.mxu1 %v3087_v1  ;;  %2098 = vmatpush.msra.mxu2 %v2026_v0 }
 0x267   :  { %v5910_v37 = vpop.f32.mrf.mxu3  ;;  %v1577_v54 = vpop.f32.mrf.mxu0  ;;  %2371 = vmatpush.msra.mxu3 %v2026_v0 }
 0x268   :  { %v1578_v44 = vadd.f32 %v1577_v54, %v5220_v38  ;;  %v6927_v54 = vld [vmem:[#allocation27_spill] sm:$0xff] }
 0x269   :  { %v1626_v10 = vpop.f32.mrf.mxu1 }
 0x26a   :  { %v5913_v20 = vadd.f32 %v1626_v10, %v1578_v44  ;;  %v3472_v44 = vld [vmem:[%s6548_s4] sm:$0x3]  ;;  %s3501_s4 = smov 96  }
 0x26d   :  { %v5915_v5 = vpop.f32.mrf.mxu2 }
 0x26f   :  { %v5917_v59 = vpop.f32.mrf.mxu3 }
 0x270   :  { %v1580_v55 = vpop.f32.mrf.mxu0 }
 0x271   :  { %v1629_v51 = vpop.f32.mrf.mxu1  ;;  %v1581_v62 = vadd.f32 %v1580_v55, %v5220_v38  ;;  %v5945_v55 = vperm.slane %v3472_v44, 1 }
 0x273   :  { %v5920_v29 = vadd.f32 %v1629_v51, %v1581_v62  ;;  %3127 = vmatmul.msk.bf16.gmra.mxu0 %vm158_vm0, %v5733_v58  ;;  %v6928_v51 = vld [vmem:[#allocation8_spill] sm:$0xff] }
 0x274   :  { %1824 = vmatmul.bf16.gmra.mxu1 %v5716_v4  ;;  %1873 = vmatmul.bf16.gmra.mxu2 %v5718_v48 }
 0x275   :  { %1922 = vmatmul.bf16.gmra.mxu3 %v5721_v2  ;;  %v6926_v2 = vld [vmem:[#allocation33_spill] sm:$0xff] }
 0x276   :  { %v1597_v0 = vadd.f32 %v6926_v2, %v1548_v43  ;;  %v6930_v43 = vld [vmem:[#allocation14_spill] sm:$0xff] }
 0x277   :  { %v5927_v8 = vpop.f32.mrf.mxu2 }
 0x278   :  { %v5929_v35 = vpop.f32.mrf.mxu3  ;;  %v1582_v50 = vpop.f32.mrf.mxu0  ;;  %v1646_v62 = vadd.f32 %v6928_v51, %v1597_v0 }
 0x279   :  { %v1631_v22 = vpop.f32.mrf.mxu1  ;;  %v1583_v11 = vadd.f32 %v1582_v50, %v5220_v38  ;;  %v6929_v50 = vld [vmem:[#allocation58_spill] sm:$0xff] }
 0x27b   :  { %v5932_v31 = vadd.f32 %v1631_v22, %v1583_v11 }
 0x27f   :  { %v5936_v63 = vpop.f32.mrf.mxu2 }
 0x280   :  { %v5938_v4 = vpop.f32.mrf.mxu3  ;;  %v1741_v48 = vpop.f32.mrf.mxu0 }
 0x281   :  { %v1790_v1 = vpop.f32.mrf.mxu1  ;;  %v1742_v10 = vadd.f32 %v1741_v48, %v6927_v54  ;;  %v1695_v48 = vadd.f32 %v6930_v43, %v1646_v62 }
 0x282   :  { %v1791_v47 = vadd.f32 %v1790_v1, %v5945_v55  ;;  %v1553_v1 = vadd.f32 %v5421_v17, %v5220_v38  ;;  %v6935_v17 = vld [vmem:[#allocation11_spill] sm:$0xff] }
 0x283   :  { %1936 = vmatmul.bf16.vlgmr.msra.gmra.mxu0 %v6929_v50  ;;  %v2148_v22 = vmul.f32 %v1742_v10, %v1742_v10  ;;  %2292 = vrot.lane.b32.xlu2 %v1742_v10, %s3500_s24 }
 0x284   :  { %3128 = vmatmul.msk.bf16.vlgmr.msra.gmra.mxu1 %vm158_vm0, %v5138_v49  ;;  %3136 = vmatmul.msk.f32.vlgmr.msra.gmra.mxu2 %vm2034_vm11, %v1742_v10 }
 0x285   :  { %v2164_v11 = vsel %vm2034_vm11, %v2148_v22, 0.0 }
 0x286   :  { %2165 = vadd.xlane.f32.xlu0 %v2164_v11 }
 0x287   :  { %v1839_v2 = vpop.f32.mrf.mxu2 }
 0x288   :  { %v5956_v0 = vpop.f32.mrf.mxu3  ;;  %v5958_v54 = vadd.f32 %v1839_v2, %v1791_v47  ;;  %v1743_v44 = vpop.f32.mrf.mxu0  ;;  %v1602_v2 = vadd.f32 %v5423_v7, %v1553_v1 }
 0x289   :  { %6931 = vst [vmem:[#allocation19_spill] sm:$0xff] %v5956_v0  ;;  %v1792_v49 = vpop.f32.mrf.mxu1  ;;  %v1744_v51 = vadd.f32 %v1743_v44, %v1695_v48  ;;  %v6934_v44 = vld [vmem:[#allocation9_spill] sm:$0xff] }
 0x28a   :  { %v1793_v10 = vadd.f32 %v1792_v49, %v5945_v55  ;;  %v1651_v0 = vadd.f32 %v6934_v44, %v1602_v2 }
 0x28b   :  { %v5960_v50 = vmul.f32 %v1744_v51, %v1744_v51  ;;  %2437 = vrot.lane.b32.xlu2 %v2148_v22, %s3500_s24 }
 0x28c   :  { %3137 = vmatmul.msk.f32.gmra.mxu2 %vm2034_vm11, %v1744_v51 }
 0x28d   :  { %2439 = vrot.lane.b32.xlu1 %v5960_v50, %s3500_s24 }
 0x28f   :  { %v1841_v62 = vpop.f32.mrf.mxu2 }
 0x290   :  { %v5969_v11 = vpop.f32.mrf.mxu3  ;;  %v5971_v47 = vadd.f32 %v1841_v62, %v1793_v10  ;;  %v1746_v43 = vpop.f32.mrf.mxu0  ;;  %v6936_v10 = vld [vmem:[#allocation13_spill] sm:$0xff] }
 0x291   :  { %6932 = vst [vmem:[#allocation24_spill] sm:$0xff] %v5969_v11  ;;  %v1795_v48 = vpop.f32.mrf.mxu1  ;;  %v5975_v22 = vadd.f32 %v1746_v43, %v5481_v41  ;;  %v1700_v62 = vadd.f32 %v6936_v10, %v1651_v0 }
 0x292   :  { %6933 = vst [vmem:[#allocation29_spill] sm:$0xff] %v5971_v47  ;;  %v1796_v49 = vadd.f32 %v1795_v48, %v5945_v55 }
 0x293   :  { %1941 = vmatmul.bf16.gmra.mxu0 %v6935_v17 }
 0x294   :  { %3129 = vmatmul.msk.bf16.gmra.mxu1 %vm158_vm0, %v5148_v23  ;;  %3138 = vmatmul.msk.f32.gmra.mxu2 %vm2034_vm11, %v5975_v22  ;;  %v1558_v23 = vadd.f32 %v5600_v18, %v5220_v38 }
 0x297   :  { %v1844_v11 = vpop.f32.mrf.mxu2 }
 0x298   :  { %v5985_v47 = vpop.f32.mrf.mxu3  ;;  %v5987_v7 = vadd.f32 %v1844_v11, %v1796_v49  ;;  %v1748_v41 = vpop.f32.mrf.mxu0  ;;  %v6001_v49 = vmul.f32 %v5975_v22, %v5975_v22 }
 0x299   :  { %v1797_v1 = vpop.f32.mrf.mxu1  ;;  %v1749_v43 = vadd.f32 %v1748_v41, %v1700_v62  ;;  %v6937_v41 = vld [vmem:[#allocation20_spill] sm:$0xff] }
 0x29a   :  { %2294 = vrot.lane.b32.xlu0 %v1744_v51, %s3500_s24  ;;  %v1798_v48 = vadd.f32 %v1797_v1, %v5945_v55  ;;  %v1607_v51 = vadd.f32 %v5602_v30, %v1558_v23 }
 0x29b   :  { %2298 = vrot.lane.b32.xlu2 %v1749_v43, %s3500_s24  ;;  %v6009_v18 = vmul.f32 %v1749_v43, %v1749_v43 }
 0x29c   :  { %3139 = vmatmul.msk.f32.gmra.mxu2 %vm2034_vm11, %v1749_v43  ;;  %v1656_v62 = vadd.f32 %v5683_v53, %v1607_v51 }
 0x29f   :  { %v1846_v0 = vpop.f32.mrf.mxu2 }
 0x2a0   :  { %v5995_v2 = vpop.f32.mrf.mxu3  ;;  %v5997_v44 = vadd.f32 %v1846_v0, %v1798_v48  ;;  %v1751_v11 = vpop.f32.mrf.mxu0 }
 0x2a1   :  { %v1800_v17 = vpop.f32.mrf.mxu1  ;;  %v6005_v10 = vadd.f32 %v1751_v11, %v5651_v39  ;;  %v1705_v39 = vadd.f32 %v5698_v12, %v1656_v62 }
 0x2a2   :  { %2441 = vrot.lane.b32.xlu0 %v6001_v49, %s3500_s24  ;;  %v1801_v30 = vadd.f32 %v1800_v17, %v5945_v55 }
 0x2a3   :  { %1946 = vmatmul.bf16.gmra.mxu0 %v6937_v41  ;;  %2443 = vrot.lane.b32.xlu2 %v6009_v18, %s3500_s24 }
 0x2a4   :  { %3130 = vmatmul.msk.bf16.gmra.mxu1 %vm158_vm0, %v6914_v52  ;;  %3140 = vmatmul.msk.f32.gmra.mxu2 %vm2034_vm11, %v6005_v10  ;;  %v1563_v52 = vadd.f32 %v5752_v28, %v5220_v38 }
 0x2a7   :  { %v1849_v1 = vpop.f32.mrf.mxu2 }
 0x2a8   :  { %v6021_v43 = vpop.f32.mrf.mxu3  ;;  %v6023_v23 = vadd.f32 %v1849_v1, %v1801_v30  ;;  %v1753_v53 = vpop.f32.mrf.mxu0  ;;  %v1612_v30 = vadd.f32 %v5754_v36, %v1563_v52 }
 0x2a9   :  { %v1802_v48 = vpop.f32.mrf.mxu1  ;;  %v6025_v0 = vadd.f32 %v1753_v53, %v1705_v39  ;;  %v6938_v53 = vld [vmem:[#allocation18_spill] sm:$0xff] }
 0x2aa   :  { %v1803_v11 = vadd.f32 %v1802_v48, %v5945_v55  ;;  %v1661_v1 = vadd.f32 %v5764_v13, %v1612_v30  ;;  %v2167_v48 = vsel %vm2034_vm11, %v5960_v50, 0.0  ;;  %v1568_v50 = vadd.f32 %v5783_v24, %v5220_v38 }
 0x2ac   :  { %3141 = vmatmul.msk.f32.gmra.mxu2 %vm2034_vm11, %v6025_v0  ;;  %v1710_v36 = vadd.f32 %v5766_v61, %v1661_v1 }
 0x2af   :  { %v1851_v17 = vpop.f32.mrf.mxu2 }
 0x2b0   :  { %v6032_v51 = vpop.f32.mrf.mxu3  ;;  %v6034_v12 = vadd.f32 %v1851_v17, %v1803_v11  ;;  %v1756_v62 = vpop.f32.mrf.mxu0 }
 0x2b1   :  { %v1805_v41 = vpop.f32.mrf.mxu1  ;;  %v6038_v39 = vadd.f32 %v1756_v62, %v5735_v3 }
 0x2b2   :  { %v1806_v28 = vadd.f32 %v1805_v41, %v5945_v55 }
 0x2b3   :  { %1951 = vmatmul.bf16.gmra.mxu0 %v6938_v53 }
 0x2b4   :  { %3131 = vmatmul.msk.bf16.gmra.mxu1 %vm158_vm0, %v6918_v45  ;;  %3142 = vmatmul.msk.f32.gmra.mxu2 %vm2034_vm11, %v6038_v39  ;;  %v1664_v45 = vadd.f32 %v5771_v34, %v5762_v42 }
 0x2b6   :  { %v1713_v41 = vadd.f32 %v5773_v56, %v1664_v45 }
 0x2b7   :  { %v1854_v52 = vpop.f32.mrf.mxu2  ;;  %2168 = vadd.xlane.f32.xlu1 %v2167_v48 }
 0x2b8   :  { %v6050_v3 = vpop.f32.mrf.mxu3  ;;  %v6052_v13 = vadd.f32 %v1854_v52, %v1806_v28  ;;  %v1758_v11 = vpop.f32.mrf.mxu0  ;;  %v6939_v52 = vld [vmem:[#allocation26_spill] sm:$0xff] }
 0x2b9   :  { %v1807_v17 = vpop.f32.mrf.mxu1  ;;  %v6054_v62 = vadd.f32 %v1758_v11, %v1710_v36  ;;  %v1617_v36 = vadd.f32 %v5785_v6, %v1568_v50 }
 0x2ba   :  { %v1808_v61 = vadd.f32 %v1807_v17, %v5945_v55 }
 0x2bb   :  { %v1666_v34 = vadd.f32 %v5799_v57, %v1617_v36 }
 0x2bc   :  { %3143 = vmatmul.msk.f32.gmra.mxu2 %vm2034_vm11, %v6054_v62 }
 0x2bd   :  { %v1715_v56 = vadd.f32 %v5801_v21, %v1666_v34  ;;  %v2173_v21 = vsel %vm2034_vm11, %v6009_v18, 0.0  ;;  %v1671_v18 = vadd.f32 %v5875_v9, %v5840_v15 }
 0x2bf   :  { %v1856_v30 = vpop.f32.mrf.mxu2 }
 0x2c0   :  { %v6064_v1 = vpop.f32.mrf.mxu3  ;;  %v6066_v53 = vadd.f32 %v1856_v30, %v1808_v61  ;;  %v1761_v28 = vpop.f32.mrf.mxu0  ;;  %v1669_v61 = vadd.f32 %v5832_v19, %v5804_v33 }
 0x2c1   :  { %v1810_v48 = vpop.f32.mrf.mxu1  ;;  %v6069_v42 = vadd.f32 %v1761_v28, %v1713_v41 }
 0x2c2   :  { %v1811_v38 = vadd.f32 %v1810_v48, %v5945_v55  ;;  %v1718_v30 = vadd.f32 %v5834_v32, %v1669_v61 }
 0x2c3   :  { %1956 = vmatmul.bf16.gmra.mxu0 %v6939_v52  ;;  %v6940_v52 = vld [vmem:[#allocation28_spill] sm:$0xff] }
 0x2c4   :  { %3132 = vmatmul.msk.bf16.gmra.mxu1 %vm158_vm0, %v5704_v40  ;;  %3144 = vmatmul.msk.f32.gmra.mxu2 %vm2034_vm11, %v6069_v42  ;;  %v2170_v40 = vsel %vm2034_vm11, %v6001_v49, 0.0 }
 0x2c7   :  { %v1859_v24 = vpop.f32.mrf.mxu2 }
 0x2c8   :  { %v1908_v11 = vpop.f32.mrf.mxu3  ;;  %v1860_v17 = vadd.f32 %v1859_v24, %v1811_v38  ;;  %v1763_v6 = vpop.f32.mrf.mxu0  ;;  %v1720_v38 = vadd.f32 %v5877_v14, %v1671_v18 }
 0x2c9   :  { %v1812_v45 = vpop.f32.mrf.mxu1  ;;  %v6079_v50 = vadd.f32 %v1763_v6, %v1715_v56  ;;  %v1674_v6 = vadd.f32 %v5908_v27, %v5889_v26  ;;  %v1676_v27 = vadd.f32 %v5915_v5, %v5913_v20 }
 0x2ca   :  { %v6081_v57 = vadd.f32 %v1908_v11, %v1860_v17  ;;  %v1813_v41 = vadd.f32 %v1812_v45, %v5945_v55 }
 0x2cb   :  { %v1723_v61 = vadd.f32 %v5910_v37, %v1674_v6 }
 0x2cc   :  { %3145 = vmatmul.msk.f32.gmra.mxu2 %vm2034_vm11, %v6079_v50  ;;  %2171 = vadd.xlane.f32.xlu0 %v2170_v40 }
 0x2cd   :  { %2174 = vadd.xlane.f32.xlu2 %v2173_v21 }
 0x2cf   :  { %v1861_v28 = vpop.f32.mrf.mxu2 }
 0x2d0   :  { %v1910_v48 = vpop.f32.mrf.mxu3  ;;  %v1862_v36 = vadd.f32 %v1861_v28, %v1813_v41  ;;  %v1766_v34 = vpop.f32.mrf.mxu0  ;;  %2296 = vrot.lane.b32.xlu1 %v5975_v22, %s3500_s24  ;;  %v6109_v22 = vmul.f32 %v6025_v0, %v6025_v0 }
 0x2d1   :  { %v1815_v33 = vpop.f32.mrf.mxu1  ;;  %v6095_v19 = vadd.f32 %v1766_v34, %v1718_v30  ;;  %v1725_v34 = vadd.f32 %v5917_v59, %v1676_v27 }
 0x2d2   :  { %v6097_v49 = vadd.f32 %v1910_v48, %v1862_v36  ;;  %v1816_v32 = vadd.f32 %v1815_v33, %v5945_v55  ;;  %v2152_v36 = vmul.f32 %v6005_v10, %v6005_v10 }
 0x2d3   :  { %1961 = vmatmul.bf16.gmra.mxu0 %v6940_v52 }
 0x2d4   :  { %3133 = vmatmul.msk.bf16.gmra.mxu1 %vm158_vm0, %v5707_v16  ;;  %3146 = vmatmul.msk.f32.gmra.mxu2 %vm2034_vm11, %v6095_v19 }
 0x2d7   :  { %v1864_v56 = vpop.f32.mrf.mxu2 }
 0x2d8   :  { %v1913_v24 = vpop.f32.mrf.mxu3  ;;  %v1865_v11 = vadd.f32 %v1864_v56, %v1816_v32  ;;  %v1768_v15 = vpop.f32.mrf.mxu0  ;;  %2447 = vrot.lane.b32.xlu1 %v6109_v22, %s3500_s24  ;;  %v2154_v32 = vmul.f32 %v6038_v39, %v6038_v39 }
 0x2d9   :  { %v1817_v9 = vpop.f32.mrf.mxu1  ;;  %v6114_v16 = vadd.f32 %v1768_v15, %v1720_v38 }
 0x2da   :  { %v6116_v17 = vadd.f32 %v1913_v24, %v1865_v11  ;;  %v1818_v14 = vadd.f32 %v1817_v9, %v5945_v55 }
 0x2dc   :  { %3147 = vmatmul.msk.f32.gmra.mxu2 %vm2034_vm11, %v6114_v16 }
 0x2dd   :  { %v2293_v45 = vpop.permute.xlu2 %2292 }
 0x2de   :  { %3152 = vmatmul.msk.f32.vlgmr.msra.gmra.mxu3 %vm2034_vm11, %v2293_v45 }
 0x2df   :  { %v1866_v40 = vpop.f32.mrf.mxu2 }
 0x2e0   :  { %v1915_v21 = vpop.f32.mrf.mxu3  ;;  %v1867_v41 = vadd.f32 %v1866_v40, %v1818_v14  ;;  %v1771_v30 = vpop.f32.mrf.mxu0  ;;  %2300 = vrot.lane.b32.xlu0 %v6005_v10, %s3500_s24 }
 0x2e1   :  { %v1820_v28 = vpop.f32.mrf.mxu1  ;;  %v6127_v48 = vadd.f32 %v1771_v30, %v1723_v61 }
 0x2e2   :  { %v6129_v26 = vadd.f32 %v1915_v21, %v1867_v41  ;;  %v1821_v37 = vadd.f32 %v1820_v28, %v5945_v55  ;;  %v6943_v21 = vld [vmem:[#allocation19_spill] sm:$0xff] }
 0x2e3   :  { %1966 = vmatmul.bf16.gmra.mxu0 %v5594_v46  ;;  %v1889_v41 = vadd.f32 %v6943_v21, %v5958_v54 }
 0x2e4   :  { %3134 = vmatmul.msk.bf16.gmra.mxu1 %vm158_vm0, %v5725_v25  ;;  %3148 = vmatmul.msk.f32.gmra.mxu2 %vm2034_vm11, %v6127_v48 }
 0x2e5   :  { %2302 = vrot.lane.b32.xlu2 %v6025_v0, %s3500_s24  ;;  %v1679_v0 = vadd.f32 %v5927_v8, %v5920_v29  ;;  %v1681_v8 = vadd.f32 %v5936_v63, %v5932_v31 }
 0x2e7   :  { %v1869_v33 = vpop.f32.mrf.mxu2  ;;  %v1728_v10 = vadd.f32 %v5929_v35, %v1679_v0  ;;  %v1730_v6 = vadd.f32 %v5938_v4, %v1681_v8 }
 0x2e8   :  { %v1918_v20 = vpop.f32.mrf.mxu3  ;;  %v1870_v5 = vadd.f32 %v1869_v33, %v1821_v37  ;;  %v1773_v46 = vpop.f32.mrf.mxu0  ;;  %2445 = vrot.lane.b32.xlu0 %v2152_v36, %s3500_s24  ;;  %v2179_v33 = vsel %vm2034_vm11, %v6109_v22, 0.0 }
 0x2e9   :  { %v1822_v18 = vpop.f32.mrf.mxu1  ;;  %v6145_v25 = vadd.f32 %v1773_v46, %v1725_v34  ;;  %v6945_v46 = vld [vmem:[#allocation24_spill] sm:$0xff] }
 0x2ea   :  { %v6147_v52 = vadd.f32 %v1918_v20, %v1870_v5  ;;  %v1823_v59 = vadd.f32 %v1822_v18, %v5945_v55 }
 0x2ec   :  { %6941 = vst [vmem:[#allocation34_spill] sm:$0xff] %v6147_v52  ;;  %3149 = vmatmul.msk.f32.gmra.mxu2 %vm2034_vm11, %v6145_v25 }
 0x2ed   :  { %2449 = vrot.lane.b32.xlu2 %v2154_v32, %s3500_s24 }
 0x2ef   :  { %v1871_v38 = vpop.f32.mrf.mxu2 }
 0x2f0   :  { %v1920_v56 = vpop.f32.mrf.mxu3  ;;  %v1872_v24 = vadd.f32 %v1871_v38, %v1823_v59  ;;  %v1776_v11 = vpop.f32.mrf.mxu0 }
 0x2f1   :  { %v1825_v15 = vpop.f32.mrf.mxu1  ;;  %v6158_v9 = vadd.f32 %v1776_v11, %v1728_v10  ;;  %v6210_v11 = vmul.f32 %v6127_v48, %v6127_v48 }
 0x2f2   :  { %v6160_v29 = vadd.f32 %v1920_v56, %v1872_v24  ;;  %v1826_v35 = vadd.f32 %v1825_v15, %v5945_v55  ;;  %v2176_v24 = vsel %vm2034_vm11, %v2152_v36, 0.0 }
 0x2f3   :  { %1971 = vmatmul.bf16.gmra.mxu0 %v5723_v60 }
 0x2f4   :  { %6942 = vst [vmem:[#allocation35_spill] sm:$0xff] %v6160_v29  ;;  %3135 = vmatmul.msk.bf16.gmra.mxu1 %vm158_vm0, %v5733_v58  ;;  %3150 = vmatmul.msk.f32.gmra.mxu2 %vm2034_vm11, %v6158_v9  ;;  %v6179_v58 = vmul.f32 %v6079_v50, %v6079_v50  ;;  %vm2757_vm0 = vcmask 785408  }
 0x2f5   :  { %2308 = vrot.lane.b32.xlu2 %v6069_v42, %s3500_s24 }
 0x2f7   :  { %v1874_v14 = vpop.f32.mrf.mxu2 }
 0x2f8   :  { %v1875_v45 = vadd.f32 %v1874_v14, %v1826_v35  ;;  %v1778_v61 = vpop.f32.mrf.mxu0  ;;  %v1923_v31 = vpop.f32.mrf.mxu3  ;;  %v2182_v35 = vsel %vm2034_vm11, %v2154_v32, 0.0 }
 0x2f9   :  { %v1827_v40 = vpop.f32.mrf.mxu1  ;;  %v6173_v63 = vadd.f32 %v1778_v61, %v1730_v6  ;;  %v2166_v5 = vpop.xlane.xlu0 %2165 }
 0x2fa   :  { %v6175_v60 = vadd.f32 %v1923_v31, %v1875_v45  ;;  %v1828_v4 = vadd.f32 %v1827_v40, %v5945_v55  ;;  %v6944_v55 = vld [vmem:[#allocation29_spill] sm:$0xff]  ;;  %v6227_v14 = vpop.permute.xlu2 %2437 }
 0x2fb   :  { %v1891_v18 = vadd.f32 %v6945_v46, %v6944_v55 }
 0x2fc   :  { %3151 = vmatmul.msk.f32.gmra.mxu2 %vm2034_vm11, %v6173_v63 }
 0x2fd   :  { %2455 = vrot.lane.b32.xlu2 %v6179_v58, %s3500_s24 }
 0x2ff   :  { %v1876_v30 = vpop.f32.mrf.mxu2  ;;  %v6231_v61 = vpop.permute.xlu1 %2439 }
 0x300   :  { %v6188_v28 = vadd.f32 %v1876_v30, %v1828_v4  ;;  %v1937_v27 = vpop.f32.mrf.mxu0 }
 0x301   :  { %v1938_v37 = vadd.f32 %v1937_v27, %v1889_v41  ;;  %v1986_v34 = vpop.f32.mrf.mxu1 }
 0x302   :  { %2180 = vadd.xlane.f32.xlu1 %v2179_v33  ;;  %v2299_v32 = vpop.permute.xlu2 %2298  ;;  %v1906_v33 = vadd.f32 %v6064_v1, %v6066_v53  ;;  %v6254_v53 = vmul.f32 %v6145_v25, %v6145_v25 }
 0x303   :  { %v6192_v20 = vadd.f32 %v1986_v34, %v1938_v37  ;;  %v2155_v34 = vmul.f32 %v6054_v62, %v6054_v62 }
 0x305   :  { %2312 = vrot.lane.b32.xlu2 %v6095_v19, %s3500_s24 }
 0x307   :  { %v2100_v6 = vpop.f32.mrf.mxu2 }
 0x308   :  { %v1939_v54 = vpop.f32.mrf.mxu0 }
 0x309   :  { %v1940_v0 = vadd.f32 %v1939_v54, %v1891_v18  ;;  %v1988_v59 = vpop.f32.mrf.mxu1 }
 0x30a   :  { %v6246_v55 = vpop.permute.xlu2 %2443 }
 0x30b   :  { %v6198_v10 = vadd.f32 %v1988_v59, %v1940_v0 }
 0x30c   :  { %v2295_v38 = vpop.permute.xlu0 %2294 }
 0x30d   :  { %2316 = vrot.lane.b32.xlu2 %v6127_v48, %s3500_s24  ;;  %3153 = vmatmul.msk.f32.gmra.mxu3 %vm2034_vm11, %v2295_v38 }
 0x30f   :  { %v2103_v31 = vpop.f32.mrf.mxu2 }
 0x310   :  { %v6203_v22 = vpop.f32.mrf.mxu0 }
 0x311   :  { %v6205_v56 = vpop.f32.mrf.mxu1 }
 0x312   :  { %2177 = vadd.xlane.f32.xlu0 %v2176_v24 }
 0x314   :  { %v6248_v46 = vpop.permute.xlu0 %2441 }
 0x315   :  { %2461 = vrot.lane.b32.xlu2 %v6210_v11, %s3500_s24 }
 0x318   :  { %v6214_v15 = vpop.f32.mrf.mxu0 }
 0x319   :  { %v6216_v8 = vpop.f32.mrf.mxu1 }
 0x31a   :  { %2183 = vadd.xlane.f32.xlu0 %v2182_v35 }
 0x31b   :  { %2304 = vrot.lane.b32.xlu1 %v6038_v39, %s3500_s24  ;;  %v1904_v39 = vadd.f32 %v6050_v3, %v6052_v13  ;;  %v2212_v3 = vmul.f32 0.5, %v2166_v5  ;;  %v2106_v13 = vpop.f32.mrf.mxu2 }
 0x31d   :  { %2318 = vrot.lane.b32.xlu2 %v6145_v25, %s3500_s24  ;;  %v2228_v59 = vsub.f32 %v2100_v6, %v2212_v3  ;;  %v2185_v6 = vsel %vm2034_vm11, %v2155_v34, 0.0 }
 0x320   :  { %v6223_v36 = vpop.f32.mrf.mxu0 }
 0x321   :  { %v6225_v48 = vpop.f32.mrf.mxu1 }
 0x323   :  { %v2109_v5 = vpop.f32.mrf.mxu2 }
 0x328   :  { %v6229_v45 = vpop.f32.mrf.mxu0 }
 0x329   :  { %v6233_v40 = vpop.f32.mrf.mxu1 }
 0x32a   :  { %v2169_v21 = vpop.xlane.xlu1 %2168 }
 0x32b   :  { %v2213_v37 = vmul.f32 0.5, %v2169_v21 }
 0x32d   :  { %v2229_v18 = vsub.f32 %v2103_v31, %v2213_v37  ;;  %v2203_v37 = vsel %vm2034_vm11, %v6254_v53, 0.0 }
 0x32e   :  { %2306 = vrot.lane.b32.xlu0 %v6054_v62, %s3500_s24  ;;  %v2244_v62 = vmul.f32 1.442695, %v2228_v59 }
 0x32f   :  { %v2246_v35 = vmul.f32 1.442695, %v2229_v18 }
 0x330   :  { %v1952_v4 = vpop.f32.mrf.mxu0 }
 0x331   :  { %v1953_v41 = vadd.f32 %v1952_v4, %v1904_v39  ;;  %v2001_v30 = vpop.f32.mrf.mxu1  ;;  %3408 = vpow2.f32 %v2246_v35 }
 0x332   :  { %3410 = vpow2.f32 %v2244_v62  ;;  %v2156_v62 = vmul.f32 %v6069_v42, %v6069_v42  ;;  %v6287_v42 = vmul.f32 %v6173_v63, %v6173_v63 }
 0x333   :  { %v6239_v27 = vadd.f32 %v2001_v30, %v1953_v41 }
 0x336   :  { %2451 = vrot.lane.b32.xlu0 %v2155_v34, %s3500_s24 }
 0x338   :  { %v1954_v54 = vpop.f32.mrf.mxu0 }
 0x339   :  { %v1955_v0 = vadd.f32 %v1954_v54, %v1906_v33  ;;  %v2003_v38 = vpop.f32.mrf.mxu1  ;;  %v3409_v33 = vpop.eup %3408 }
 0x33a   :  { %v3411_v3 = vpop.eup %3410  ;;  %v6260_v18 = vmul.f32 0.17677669, %v3409_v33 }
 0x33b   :  { %v6250_v24 = vadd.f32 %v2003_v38, %v1955_v0  ;;  %v6262_v25 = vmul.f32 0.17677669, %v3411_v3 }
 0x33f   :  { %v2172_v39 = vpop.xlane.xlu0 %2171 }
 0x340   :  { %v2175_v4 = vpop.xlane.xlu2 %2174  ;;  %v2214_v21 = vmul.f32 0.5, %v2172_v39 }
 0x341   :  { %v2215_v1 = vmul.f32 0.5, %v2175_v4  ;;  %v2188_v4 = vsel %vm2034_vm11, %v2156_v62, 0.0 }
 0x342   :  { %v2230_v31 = vsub.f32 %v2106_v13, %v2214_v21  ;;  %v2297_v41 = vpop.permute.xlu1 %2296  ;;  %v3294_v13 = vpack.i.bf16 %v6260_v18, %v6262_v25  ;;  %v2491_v25 = vsel %vm2034_vm11, %v6248_v46, 0.0  ;;  %v2200_v46 = vsel %vm2034_vm11, %v6210_v11, 0.0 }
 0x343   :  { %v2231_v30 = vsub.f32 %v2109_v5, %v2215_v1  ;;  %3154 = vmatmul.msk.f32.gmra.mxu3 %vm2034_vm11, %v2297_v41  ;;  %v2158_v1 = vmul.f32 %v6095_v19, %v6095_v19 }
 0x344   :  { %v2248_v54 = vmul.f32 1.442695, %v2230_v31 }
 0x345   :  { %2186 = vadd.xlane.f32.xlu1 %v2185_v6  ;;  %v2250_v0 = vmul.f32 1.442695, %v2231_v30  ;;  %v2112_v30 = vpop.f32.mrf.mxu2 }
 0x346   :  { %2204 = vadd.xlane.f32.xlu2 %v2203_v37  ;;  %3412 = vpow2.f32 %v2248_v54 }
 0x347   :  { %3414 = vpow2.f32 %v2250_v0 }
 0x348   :  { %v2303_v38 = vpop.permute.xlu2 %2302 }
 0x34a   :  { %v2448_v5 = vpop.permute.xlu1 %2447 }
 0x34b   :  { %3155 = vmatmul.msk.f32.gmra.mxu3 %vm2034_vm11, %v2299_v32 }
 0x34c   :  { %v3413_v34 = vpop.eup %3412 }
 0x34d   :  { %v3415_v35 = vpop.eup %3414  ;;  %v6273_v32 = vmul.f32 0.17677669, %v3413_v34  ;;  %v2115_v18 = vpop.f32.mrf.mxu2  ;;  %v2194_v34 = vsel %vm2034_vm11, %v2158_v1, 0.0 }
 0x34e   :  { %v6271_v39 = vmul.f32 0.17677669, %v3415_v35 }
 0x350   :  { %v3299_v21 = vpack.i.bf16 %v6271_v39, %v6273_v32 }
 0x352   :  { %v2301_v59 = vpop.permute.xlu0 %2300 }
 0x353   :  { %3156 = vmatmul.msk.f32.gmra.mxu3 %vm2034_vm11, %v2301_v59 }
 0x35a   :  { %v6294_v31 = vpop.permute.xlu0 %2445 }
 0x35b   :  { %3157 = vmatmul.msk.f32.gmra.mxu3 %vm2034_vm11, %v2303_v38  ;;  %v2450_v38 = vpop.permute.xlu2 %2449 }
 0x35e   :  { %2320 = vrot.lane.b32.xlu2 %v6158_v9, %s3500_s24  ;;  %2453 = vrot.lane.b32.xlu1 %v2156_v62, %s3500_s24 }
 0x360   :  { %2189 = vadd.xlane.f32.xlu0 %v2188_v4 }
 0x366   :  { %2322 = vrot.lane.b32.xlu2 %v6173_v63, %s3500_s24  ;;  %2310 = vrot.lane.b32.xlu1 %v6079_v50, %s3500_s24  ;;  %v2191_v63 = vsel %vm2034_vm11, %v6179_v58, 0.0 }
 0x36e   :  { %2467 = vrot.lane.b32.xlu2 %v6287_v42, %s3500_s24 }
 0x374   :  { %2457 = vrot.lane.b32.xlu0 %v2158_v1, %s3500_s24  ;;  %v2159_v1 = vmul.f32 %v6114_v16, %v6114_v16 }
 0x375   :  { %v2181_v41 = vpop.xlane.xlu1 %2180 }
 0x376   :  { %v2217_v33 = vmul.f32 0.5, %v2181_v41 }
 0x378   :  { %v2233_v19 = vsub.f32 %v2115_v18, %v2217_v33  ;;  %v2500_v33 = vsel %vm2034_vm11, %v2448_v5, 0.0  ;;  %v2485_v5 = vsel %vm2034_vm11, %v6227_v14, 0.0 }
 0x37a   :  { %v2254_v59 = vmul.f32 1.442695, %v2233_v19 }
 0x385   :  { %v2178_v6 = vpop.xlane.xlu0 %2177 }
 0x386   :  { %v2216_v50 = vmul.f32 0.5, %v2178_v6 }
 0x388   :  { %v2232_v3 = vsub.f32 %v2112_v30, %v2216_v50  ;;  %v2309_v30 = vpop.permute.xlu2 %2308  ;;  %v2118_v50 = vpop.f32.mrf.mxu2 }
 0x38a   :  { %v2252_v54 = vmul.f32 1.442695, %v2232_v3 }
 0x38c   :  { %3416 = vpow2.f32 %v2252_v54 }
 0x38d   :  { %v2305_v37 = vpop.permute.xlu1 %2304  ;;  %v2184_v0 = vpop.xlane.xlu0 %2183  ;;  %3418 = vpow2.f32 %v2254_v59 }
 0x38e   :  { %3158 = vmatmul.msk.f32.gmra.mxu3 %vm2034_vm11, %v2305_v37  ;;  %v2218_v18 = vmul.f32 0.5, %v2184_v0  ;;  %v2209_v0 = vsel %vm2034_vm11, %v6287_v42, 0.0  ;;  %v2503_v42 = vsel %vm2034_vm11, %v2450_v38, 0.0 }
 0x390   :  { %2192 = vadd.xlane.f32.xlu1 %v2191_v63  ;;  %v6317_v63 = vpop.permute.xlu2 %2455  ;;  %v2234_v59 = vsub.f32 %v2118_v50, %v2218_v18 }
 0x392   :  { %v3417_v58 = vpop.eup %3416 }
 0x393   :  { %v3419_v62 = vpop.eup %3418  ;;  %v6303_v4 = vmul.f32 0.17677669, %v3417_v58 }
 0x394   :  { %v2281_v41 = vmul.f32 0.17677669, %v3419_v62 }
 0x396   :  { %v3304_v6 = vpack.i.bf16 %v2281_v41, %v6303_v4  ;;  %v2494_v41 = vsel %vm2034_vm11, %v6246_v55, 0.0 }
 0x397   :  { %2492 = vadd.xlane.f32.xlu2 %v2491_v25  ;;  %v2121_v25 = vpop.f32.mrf.mxu2 }
 0x39e   :  { %2195 = vadd.xlane.f32.xlu0 %v2194_v34 }
 0x39f   :  { %v2124_v14 = vpop.f32.mrf.mxu2 }
 0x3a0   :  { %v2307_v35 = vpop.permute.xlu0 %2306 }
 0x3a1   :  { %3159 = vmatmul.msk.f32.gmra.mxu3 %vm2034_vm11, %v2307_v35  ;;  %v2256_v35 = vmul.f32 1.442695, %v2234_v59 }
 0x3a6   :  { %2201 = vadd.xlane.f32.xlu0 %v2200_v46  ;;  %v2162_v46 = vmul.f32 %v6158_v9, %v6158_v9 }
 0x3a9   :  { %2314 = vrot.lane.b32.xlu1 %v6114_v16, %s3500_s24  ;;  %3160 = vmatmul.msk.f32.gmra.mxu3 %vm2034_vm11, %v2309_v30 }
 0x3af   :  { %3295 = vrot.lane.b32.xlu2 %v3294_v13, %s3501_s4  ;;  %v2197_v13 = vsel %vm2034_vm11, %v2159_v1, 0.0 }
 0x3b1   :  { %2459 = vrot.lane.b32.xlu1 %v2159_v1, %s3500_s24 }
 0x3b8   :  { %v2187_v11 = vpop.xlane.xlu1 %2186 }
 0x3b9   :  { %v2219_v16 = vmul.f32 0.5, %v2187_v11  ;;  %v6335_v11 = vpop.permute.xlu0 %2451 }
 0x3ba   :  { %2463 = vrot.lane.b32.xlu0 %v6254_v53, %s3500_s24  ;;  %v2313_v53 = vpop.permute.xlu2 %2312 }
 0x3bb   :  { %v2235_v54 = vsub.f32 %v2121_v25, %v2219_v16 }
 0x3bd   :  { %v2258_v34 = vmul.f32 1.442695, %v2235_v54 }
 0x3bf   :  { %3420 = vpow2.f32 %v2258_v34 }
 0x3c0   :  { %3422 = vpow2.f32 %v2256_v35  ;;  %v2206_v35 = vsel %vm2034_vm11, %v2162_v46, 0.0 }
 0x3c2   :  { %v2317_v50 = vpop.permute.xlu2 %2316 }
 0x3c5   :  { %v3421_v58 = vpop.eup %3420 }
 0x3c6   :  { %v3423_v62 = vpop.eup %3422  ;;  %v2283_v4 = vmul.f32 0.17677669, %v3421_v58 }
 0x3c7   :  { %v2282_v30 = vmul.f32 0.17677669, %v3423_v62 }
 0x3c9   :  { %v3309_v1 = vpack.i.bf16 %v2283_v4, %v2282_v30 }
 0x3ca   :  { %v2462_v18 = vpop.permute.xlu2 %2461 }
 0x3d0   :  { %v2454_v37 = vpop.permute.xlu1 %2453 }
 0x3d1   :  { %v2509_v19 = vsel %vm2034_vm11, %v2454_v37, 0.0  ;;  %v2127_v37 = vpop.f32.mrf.mxu2 }
 0x3d8   :  { %2501 = vadd.xlane.f32.xlu2 %v2500_v33  ;;  %v2311_v3 = vpop.permute.xlu1 %2310  ;;  %v2190_v33 = vpop.xlane.xlu0 %2189 }
 0x3d9   :  { %3161 = vmatmul.msk.f32.gmra.mxu3 %vm2034_vm11, %v2311_v3  ;;  %v6337_v9 = vpop.f32.mrf.mxu2  ;;  %v2220_v16 = vmul.f32 0.5, %v2190_v33 }
 0x3db   :  { %2198 = vadd.xlane.f32.xlu1 %v2197_v13  ;;  %v2236_v25 = vsub.f32 %v2124_v14, %v2220_v16 }
 0x3dd   :  { %v2260_v59 = vmul.f32 1.442695, %v2236_v25 }
 0x3e0   :  { %2510 = vadd.xlane.f32.xlu2 %v2509_v19 }
 0x3e1   :  { %3162 = vmatmul.msk.f32.gmra.mxu3 %vm2034_vm11, %v2313_v53  ;;  %v6342_v53 = vpop.f32.mrf.mxu2 }
 0x3e4   :  { %2486 = vadd.xlane.f32.xlu0 %v2485_v5  ;;  %v2319_v5 = vpop.permute.xlu2 %2318 }
 0x3e6   :  { %v6339_v13 = vpop.permute.xlu0 %2457 }
 0x3ec   :  { %2210 = vadd.xlane.f32.xlu0 %v2209_v0  ;;  %v2136_v0 = vpop.f32.mrf.mxu2  ;;  %v2205_v4 = vpop.xlane.xlu2 %2204 }
 0x3f4   :  { %2495 = vadd.xlane.f32.xlu0 %v2494_v41  ;;  %2465 = vrot.lane.b32.xlu1 %v2162_v46, %s3500_s24  ;;  %v2488_v46 = vsel %vm2034_vm11, %v6231_v61, 0.0 }
 0x3f8   :  { %3310 = vrot.lane.b32.xlu2 %v3309_v1, %s3501_s4 }
 0x3fc   :  { %2504 = vadd.xlane.f32.xlu0 %v2503_v42 }
 0x403   :  { %v2193_v3 = vpop.xlane.xlu1 %2192 }
 0x404   :  { %v2221_v55 = vmul.f32 0.5, %v2193_v3 }
 0x406   :  { %v2237_v19 = vsub.f32 %v2127_v37, %v2221_v55  ;;  %v2225_v37 = vmul.f32 0.5, %v2205_v4  ;;  %v2139_v55 = vpop.f32.mrf.mxu2 }
 0x408   :  { %v2262_v38 = vmul.f32 1.442695, %v2237_v19  ;;  %v2241_v16 = vsub.f32 %v2139_v55, %v2225_v37 }
 0x40a   :  { %3424 = vpow2.f32 %v2262_v38  ;;  %v2270_v25 = vmul.f32 1.442695, %v2241_v16  ;;  %v2321_v38 = vpop.permute.xlu2 %2320 }
 0x40b   :  { %3426 = vpow2.f32 %v2260_v59 }
 0x410   :  { %3305 = vrot.lane.b32.xlu0 %v3304_v6, %s3501_s4  ;;  %v3425_v58 = vpop.eup %3424 }
 0x411   :  { %v2196_v54 = vpop.xlane.xlu0 %2195  ;;  %v3427_v6 = vpop.eup %3426  ;;  %v6346_v41 = vmul.f32 0.17677669, %v3425_v58  ;;  %v2521_v58 = vsel %vm2034_vm11, %v2462_v18, 0.0 }
 0x412   :  { %v6348_v1 = vmul.f32 0.17677669, %v3427_v6 }
 0x414   :  { %v3314_v33 = vpack.i.bf16 %v6346_v41, %v6348_v1 }
 0x419   :  { %v2202_v62 = vpop.xlane.xlu0 %2201 }
 0x41a   :  { %v2224_v30 = vmul.f32 0.5, %v2202_v62  ;;  %v6370_v62 = vpop.f32.mrf.mxu3 }
 0x41b   :  { %v2315_v34 = vpop.permute.xlu1 %2314 }
 0x41c   :  { %3163 = vmatmul.msk.f32.gmra.mxu3 %vm2034_vm11, %v2315_v34  ;;  %v2240_v3 = vsub.f32 %v2136_v0, %v2224_v30 }
 0x41e   :  { %2207 = vadd.xlane.f32.xlu1 %v2206_v35  ;;  %v2268_v19 = vmul.f32 1.442695, %v2240_v3  ;;  %v2512_v35 = vsel %vm2034_vm11, %v6317_v63, 0.0 }
 0x420   :  { %3428 = vpow2.f32 %v2268_v19 }
 0x421   :  { %3430 = vpow2.f32 %v2270_v25 }
 0x422   :  { %v6377_v4 = vpop.f32.mrf.mxu3 }
 0x423   :  { %v2460_v14 = vpop.permute.xlu1 %2459 }
 0x424   :  { %3164 = vmatmul.msk.f32.gmra.mxu3 %vm2034_vm11, %v2317_v50  ;;  %v2518_v42 = vsel %vm2034_vm11, %v2460_v14, 0.0  ;;  %v2497_v50 = vsel %vm2034_vm11, %v6294_v31, 0.0 }
 0x425   :  { %2519 = vadd.xlane.f32.xlu2 %v2518_v42 }
 0x426   :  { %2489 = vadd.xlane.f32.xlu1 %v2488_v46  ;;  %v3429_v61 = vpop.eup %3428  ;;  %v2222_v46 = vmul.f32 0.5, %v2196_v54 }
 0x427   :  { %v3431_v59 = vpop.eup %3430  ;;  %v6360_v34 = vmul.f32 0.17677669, %v3429_v61 }
 0x428   :  { %v6364_v0 = vmul.f32 0.17677669, %v3431_v59  ;;  %v2238_v39 = vsub.f32 %v6337_v9, %v2222_v46  ;;  %v2506_v46 = vsel %vm2034_vm11, %v6335_v11, 0.0 }
 0x42a   :  { %v6381_v14 = vpop.f32.mrf.mxu3  ;;  %v2264_v16 = vmul.f32 1.442695, %v2238_v39 }
 0x42c   :  { %3165 = vmatmul.msk.f32.gmra.mxu3 %vm2034_vm11, %v2319_v5  ;;  %v2323_v5 = vpop.permute.xlu2 %2322  ;;  %v6379_v30 = vpop.permute.xlu0 %2463 }
 0x42e   :  { %2498 = vadd.xlane.f32.xlu1 %v2497_v50 }
 0x432   :  { %v2379_v3 = vpop.f32.mrf.mxu3 }
 0x434   :  { %3166 = vmatmul.msk.f32.gmra.mxu3 %vm2034_vm11, %v2321_v38  ;;  %v2468_v6 = vpop.permute.xlu2 %2467 }
 0x435   :  { %v2530_v63 = vsel %vm2034_vm11, %v2468_v6, 0.0 }
 0x43a   :  { %2513 = vadd.xlane.f32.xlu0 %v2512_v35  ;;  %v2382_v25 = vpop.f32.mrf.mxu3 }
 0x43c   :  { %3167 = vmatmul.msk.f32.gmra.mxu3 %vm2034_vm11, %v2323_v5  ;;  %v2493_v19 = vpop.xlane.xlu2 %2492 }
 0x43d   :  { %v2535_v38 = vmul.f32 0.5, %v2493_v19 }
 0x442   :  { %2522 = vadd.xlane.f32.xlu0 %v2521_v58  ;;  %v2551_v58 = vsub.f32 %v2379_v3, %v2535_v38  ;;  %v2515_v3 = vsel %vm2034_vm11, %v6339_v13, 0.0 }
 0x447   :  { %3300 = vrot.lane.b32.xlu1 %v3299_v21, %s3501_s4 }
 0x44a   :  { %2531 = vadd.xlane.f32.xlu0 %v2530_v63  ;;  %v2385_v63 = vpop.f32.mrf.mxu3 }
 0x44e   :  { %v2199_v42 = vpop.xlane.xlu1 %2198 }
 0x44f   :  { %v2223_v37 = vmul.f32 0.5, %v2199_v42  ;;  %v2569_v42 = vmul.f32 1.442695, %v2551_v58 }
 0x451   :  { %v2239_v55 = vsub.f32 %v6342_v53, %v2223_v37 }
 0x453   :  { %v2266_v21 = vmul.f32 1.442695, %v2239_v55 }
 0x455   :  { %3432 = vpow2.f32 %v2266_v21 }
 0x456   :  { %3434 = vpow2.f32 %v2264_v16  ;;  %v2388_v16 = vpop.f32.mrf.mxu3 }
 0x457   :  { %v6383_v18 = vpop.xlane.xlu0 %2486 }
 0x45b   :  { %v3433_v54 = vpop.eup %3432 }
 0x45c   :  { %v3435_v53 = vpop.eup %3434  ;;  %v6388_v6 = vmul.f32 0.17677669, %v3433_v54 }
 0x45d   :  { %v6390_v37 = vmul.f32 0.17677669, %v3435_v53 }
 0x45e   :  { %v6399_v38 = vpop.f32.mrf.mxu3 }
 0x45f   :  { %v2211_v32 = vpop.xlane.xlu0 %2210 }
 0x466   :  { %v2466_v50 = vpop.permute.xlu1 %2465  ;;  %v6401_v11 = vpop.f32.mrf.mxu3 }
 0x467   :  { %v2496_v61 = vpop.xlane.xlu0 %2495  ;;  %v2527_v59 = vsel %vm2034_vm11, %v2466_v50, 0.0 }
 0x468   :  { %v2536_v35 = vmul.f32 0.5, %v2496_v61  ;;  %2528 = vadd.xlane.f32.xlu2 %v2527_v59  ;;  %v6403_v61 = vpop.permute.xlu2 %3295 }
 0x46a   :  { %v2552_v5 = vsub.f32 %v2382_v25, %v2536_v35  ;;  %v2142_v35 = vpop.f32.mrf.mxu2 }
 0x46c   :  { %v2571_v9 = vmul.f32 1.442695, %v2552_v5 }
 0x46e   :  { %3436 = vpow2.f32 %v2571_v9  ;;  %v2397_v13 = vpop.f32.mrf.mxu3 }
 0x46f   :  { %3438 = vpow2.f32 %v2569_v42  ;;  %v2227_v42 = vmul.f32 0.5, %v2211_v32 }
 0x470   :  { %v2502_v54 = vpop.xlane.xlu2 %2501 }
 0x471   :  { %2507 = vadd.xlane.f32.xlu1 %v2506_v46  ;;  %v2538_v58 = vmul.f32 0.5, %v2502_v54  ;;  %v6409_v46 = vpop.xlane.xlu0 %2504 }
 0x474   :  { %v3437_v39 = vpop.eup %3436 }
 0x475   :  { %v3439_v21 = vpop.eup %3438  ;;  %v2600_v19 = vmul.f32 0.17677669, %v3437_v39  ;;  %v2554_v39 = vsub.f32 %v2388_v16, %v2538_v58 }
 0x476   :  { %v2599_v25 = vmul.f32 0.17677669, %v3439_v21  ;;  %v2400_v53 = vpop.f32.mrf.mxu3  ;;  %v2145_v21 = vpop.f32.mrf.mxu2 }
 0x478   :  { %v3324_v50 = vpack.i.bf16 %v2600_v19, %v2599_v25  ;;  %v2243_v19 = vsub.f32 %v2145_v21, %v2227_v42  ;;  %v2511_v55 = vpop.xlane.xlu2 %2510 }
 0x479   :  { %2516 = vadd.xlane.f32.xlu1 %v2515_v3 }
 0x47e   :  { %v6411_v29 = vpop.f32.mrf.mxu3 }
 0x480   :  { %3325 = vrot.lane.b32.xlu2 %v3324_v50, %s3500_s24  ;;  %v2575_v50 = vmul.f32 1.442695, %v2554_v39 }
 0x482   :  { %v6413_v52 = vpop.permute.xlu0 %3305  ;;  %3440 = vpow2.f32 %v2575_v50 }
 0x491   :  { %v2208_v59 = vpop.xlane.xlu1 %2207 }
 0x492   :  { %3315 = vrot.lane.b32.xlu1 %v3314_v33, %s3501_s4  ;;  %v2226_v9 = vmul.f32 0.5, %v2208_v59  ;;  %v2274_v33 = vmul.f32 1.442695, %v2243_v19  ;;  %v2541_v59 = vmul.f32 0.5, %v2511_v55 }
 0x494   :  { %v2242_v3 = vsub.f32 %v2142_v35, %v2226_v9  ;;  %v2557_v16 = vsub.f32 %v2397_v13, %v2541_v59  ;;  %v3441_v35 = vpop.eup %3440 }
 0x496   :  { %v2272_v41 = vmul.f32 1.442695, %v2242_v3  ;;  %v2581_v39 = vmul.f32 1.442695, %v2557_v16  ;;  %v2602_v3 = vmul.f32 0.17677669, %v3441_v35 }
 0x498   :  { %3442 = vpow2.f32 %v2272_v41 }
 0x499   :  { %v2490_v5 = vpop.xlane.xlu1 %2489 }
 0x49a   :  { %v2534_v35 = vmul.f32 0.5, %v2490_v5  ;;  %v6438_v5 = vpop.permute.xlu2 %3310 }
 0x49e   :  { %v3443_v54 = vpop.eup %3442 }
 0x49f   :  { %v6415_v58 = vpop.f32.mrf.mxu3  ;;  %v6417_v19 = vmul.f32 0.17677669, %v3443_v54 }
 0x4a1   :  { %v2499_v25 = vpop.xlane.xlu1 %2498 }
 0x4a2   :  { %v2537_v31 = vmul.f32 0.5, %v2499_v25 }
 0x4a4   :  { %v2553_v1 = vsub.f32 %v2385_v63, %v2537_v31 }
 0x4a6   :  { %v2573_v32 = vmul.f32 1.442695, %v2553_v1 }
 0x4a7   :  { %v6426_v59 = vpop.f32.mrf.mxu3 }
 0x4a8   :  { %3444 = vpow2.f32 %v2573_v32 }
 0x4a9   :  { %3446 = vpow2.f32 %v2274_v33 }
 0x4aa   :  { %3448 = vpow2.f32 %v2581_v39  ;;  %v2533_v39 = vmul.f32 0.5, %v6383_v18 }
 0x4ad   :  { %v2514_v9 = vpop.xlane.xlu0 %2513 }
 0x4ae   :  { %v3445_v42 = vpop.eup %3444  ;;  %v2542_v31 = vmul.f32 0.5, %v2514_v9 }
 0x4af   :  { %v3447_v63 = vpop.eup %3446  ;;  %v2601_v21 = vmul.f32 0.17677669, %v3445_v42  ;;  %v2524_v42 = vsel %vm2034_vm11, %v6379_v30, 0.0 }
 0x4b0   :  { %v2558_v25 = vsub.f32 %v2400_v53, %v2542_v31  ;;  %v6419_v50 = vmul.f32 0.17677669, %v3447_v63  ;;  %v3449_v32 = vpop.eup %3448  ;;  %v2550_v63 = vsub.f32 %v6381_v14, %v2534_v35 }
 0x4b1   :  { %v3329_v55 = vpack.i.bf16 %v2602_v3, %v2601_v21  ;;  %v2605_v54 = vmul.f32 0.17677669, %v3449_v32  ;;  %v2549_v3 = vsub.f32 %v6377_v4, %v2533_v39  ;;  %v6436_v21 = vpop.f32.mrf.mxu3  ;;  %v2539_v39 = vmul.f32 0.5, %v6409_v46 }
 0x4b2   :  { %v2583_v41 = vmul.f32 1.442695, %v2558_v25  ;;  %v3369_v13 = vpack.i.bf16 %v6419_v50, %v6417_v19  ;;  %v2567_v25 = vmul.f32 1.442695, %v2550_v63  ;;  %v1926_v19 = vadd.f32 %v6370_v62, %v6188_v28 }
 0x4b3   :  { %3330 = vrot.lane.b32.xlu0 %v3329_v55, %s3500_s24  ;;  %v2565_v55 = vmul.f32 1.442695, %v2549_v3 }
 0x4b4   :  { %3450 = vpow2.f32 %v2583_v41 }
 0x4b5   :  { %v2523_v1 = vpop.xlane.xlu0 %2522  ;;  %3452 = vpow2.f32 %v2567_v25  ;;  %v1894_v25 = vadd.f32 %v5985_v47, %v5987_v7 }
 0x4b6   :  { %v6424_v33 = vmul.f32 0.5, %v2523_v1  ;;  %3454 = vpow2.f32 %v2565_v55  ;;  %v1896_v55 = vadd.f32 %v5995_v2, %v5997_v44 }
 0x4b8   :  { %v2561_v53 = vsub.f32 %v6426_v59, %v6424_v33 }
 0x4b9   :  { %v2415_v41 = vpop.f32.mrf.mxu3 }
 0x4ba   :  { %v3451_v16 = vpop.eup %3450 }
 0x4bb   :  { %v2606_v9 = vmul.f32 0.17677669, %v3451_v16  ;;  %v3453_v30 = vpop.eup %3452 }
 0x4bc   :  { %2525 = vadd.xlane.f32.xlu1 %v2524_v42  ;;  %v3455_v1 = vpop.eup %3454  ;;  %v2598_v18 = vmul.f32 0.17677669, %v3453_v30 }
 0x4bd   :  { %v3339_v31 = vpack.i.bf16 %v2606_v9, %v2605_v54  ;;  %v2597_v32 = vmul.f32 0.17677669, %v3455_v1  ;;  %v2532_v16 = vpop.xlane.xlu0 %2531  ;;  %v2520_v54 = vpop.xlane.xlu2 %2519  ;;  %v1943_v1 = vadd.f32 %v6203_v22, %v1894_v25 }
 0x4be   :  { %v2548_v35 = vmul.f32 0.5, %v2532_v16 }
 0x4bf   :  { %3340 = vrot.lane.b32.xlu0 %v3339_v31, %s3500_s24  ;;  %v3319_v14 = vpack.i.bf16 %v2598_v18, %v2597_v32  ;;  %v3301_v31 = vpop.permute.xlu1 %3300  ;;  %v1945_v18 = vadd.f32 %v6214_v15, %v1896_v55  ;;  %v2555_v32 = vsub.f32 %v6399_v38, %v2539_v39  ;;  %v1992_v46 = vadd.f32 %v6205_v56, %v1943_v1 }
 0x4c0   :  { %v3303_v44 = vunpack.i.h.bf16 %v3301_v31 }
 0x4c1   :  { %v2418_v9 = vpop.f32.mrf.mxu3 }
 0x4c2   :  { %v2564_v4 = vsub.f32 %v2418_v9, %v2548_v35  ;;  %v2577_v9 = vmul.f32 1.442695, %v2555_v32 }
 0x4c4   :  { %v2595_v63 = vmul.f32 1.442695, %v2564_v4 }
 0x4c6   :  { %3456 = vpow2.f32 %v2595_v63 }
 0x4cc   :  { %v3457_v4 = vpop.eup %3456 }
 0x4cd   :  { %v2612_v55 = vmul.f32 0.17677669, %v3457_v4  ;;  %v1957_v4 = vpop.f32.mrf.mxu0 }
 0x4d5   :  { %3320 = vrot.lane.b32.xlu1 %v3319_v14, %s3500_s24  ;;  %v1994_v14 = vadd.f32 %v6216_v8, %v1945_v18 }
 0x4db   :  { %v2529_v42 = vpop.xlane.xlu2 %2528 }
 0x4dc   :  { %v2547_v3 = vmul.f32 0.5, %v2529_v42  ;;  %v2544_v42 = vmul.f32 0.5, %v2520_v54 }
 0x4de   :  { %v2563_v30 = vsub.f32 %v2415_v41, %v2547_v3  ;;  %v3302_v41 = vunpack.i.l.bf16 %v3301_v31  ;;  %v2560_v25 = vsub.f32 %v6415_v58, %v2544_v42 }
 0x4e0   :  { %v2593_v16 = vmul.f32 1.442695, %v2563_v30  ;;  %v2587_v32 = vmul.f32 1.442695, %v2560_v25 }
 0x4e2   :  { %3458 = vpow2.f32 %v2593_v16 }
 0x4e3   :  { %v3326_v35 = vpop.permute.xlu2 %3325  ;;  %3460 = vpow2.f32 %v2577_v9 }
 0x4e4   :  { %v3328_v47 = vunpack.i.h.bf16 %v3326_v35  ;;  %v3327_v7 = vunpack.i.l.bf16 %v3326_v35  ;;  %v2508_v2 = vpop.xlane.xlu1 %2507 }
 0x4e5   :  { %v2540_v22 = vmul.f32 0.5, %v2508_v2 }
 0x4e6   :  { %v2744_v15 = vsel %vm2034_vm11, %v1994_v14, %v3328_v47  ;;  %v2743_v38 = vsel %vm2034_vm11, %v1992_v46, %v3327_v7  ;;  %v6946_v47 = vpack.i.bf16 %v6388_v6, %v6390_v37  ;;  %v1899_v6 = vadd.f32 %v6021_v43, %v6023_v23 }
 0x4e7   :  { %v2760_v39 = vsel %vm2757_vm0, %v2743_v38, %v3302_v41  ;;  %v2761_v56 = vsel %vm2757_vm0, %v2744_v15, %v3303_v44  ;;  %v2556_v8 = vsub.f32 %v6401_v11, %v2540_v22  ;;  %v2006_v15 = vpop.f32.mrf.mxu1  ;;  %v1959_v38 = vpop.f32.mrf.mxu0  ;;  %v1901_v37 = vadd.f32 %v6032_v51, %v6034_v12 }
 0x4e8   :  { %v3459_v63 = vpop.eup %3458  ;;  %v3250_v3 = vpack.c.bf16 %v2761_v56, %v2760_v39  ;;  %v1948_v42 = vadd.f32 %v6223_v36, %v1899_v6  ;;  %v3307_v43 = vunpack.i.l.bf16 %v6413_v52 }
 0x4e9   :  { %v2611_v31 = vmul.f32 0.17677669, %v3459_v63  ;;  %v2579_v30 = vmul.f32 1.442695, %v2556_v8  ;;  %v3461_v16 = vpop.eup %3460  ;;  %v1950_v39 = vadd.f32 %v6229_v45, %v1901_v37 }
 0x4ea   :  { %3282 = vst [vmem:[#allocation2 + $0x8] sm:$0xff] %v3250_v3   ;;  %v2603_v35 = vmul.f32 0.17677669, %v3461_v16  ;;  %v1997_v63 = vadd.f32 %v6225_v48, %v1948_v42  ;;  %v3298_v42 = vunpack.i.h.bf16 %v6403_v61 }
 0x4eb   :  { %3462 = vpow2.f32 %v2579_v30  ;;  %v3354_v1 = vpack.i.bf16 %v2612_v55, %v2611_v31  ;;  %v3308_v55 = vunpack.i.h.bf16 %v6413_v52  ;;  %v1960_v30 = vadd.f32 %v1959_v38, %v6097_v49 }
 0x4ec   :  { %v2517_v18 = vpop.xlane.xlu1 %2516  ;;  %3464 = vpow2.f32 %v2587_v32  ;;  %v2589_v52 = vmul.f32 1.442695, %v2561_v53 }
 0x4ed   :  { %v2543_v54 = vmul.f32 0.5, %v2517_v18  ;;  %3355 = vrot.lane.b32.xlu0 %v3354_v1, %s3500_s24 }
 0x4ef   :  { %v2559_v46 = vsub.f32 %v6411_v29, %v2543_v54  ;;  %v6947_v29 = vpack.i.bf16 %v6364_v0, %v6360_v34  ;;  %v2008_v56 = vpop.f32.mrf.mxu1  ;;  %v1999_v34 = vadd.f32 %v6233_v40, %v1950_v39  ;;  %v6477_v25 = vpop.f32.mrf.mxu0  ;;  %v1958_v40 = vadd.f32 %v1957_v4, %v6081_v57 }
 0x4f0   :  { %v3297_v39 = vunpack.i.l.bf16 %v6403_v61 }
 0x4f1   :  { %v3463_v11 = vpop.eup %3462  ;;  %v2585_v14 = vmul.f32 1.442695, %v2559_v46  ;;  %v2007_v32 = vadd.f32 %v2006_v15, %v1958_v40  ;;  %v2009_v46 = vadd.f32 %v2008_v56, %v1960_v30  ;;  %v1963_v30 = vadd.f32 %v6477_v25, %v6116_v17 }
 0x4f2   :  { %v2604_v9 = vmul.f32 0.17677669, %v3463_v11  ;;  %v3465_v7 = vpop.eup %3464  ;;  %v3312_v17 = vunpack.i.l.bf16 %v6438_v5 }
 0x4f3   :  { %3466 = vpow2.f32 %v2585_v14  ;;  %v2608_v44 = vmul.f32 0.17677669, %v3465_v7 }
 0x4f4   :  { %v3334_v58 = vpack.i.bf16 %v2604_v9, %v2603_v35  ;;  %3468 = vpow2.f32 %v2589_v52 }
 0x4f5   :  { %3360 = vrot.lane.b32.xlu0 %v6946_v47, %s3501_s4 }
 0x4f6   :  { %3335 = vrot.lane.b32.xlu1 %v3334_v58, %s3500_s24 }
 0x4f7   :  { %v6486_v31 = vpop.f32.mrf.mxu1  ;;  %v1964_v54 = vpop.f32.mrf.mxu0 }
 0x4f9   :  { %v3467_v2 = vpop.eup %3466 }
 0x4fa   :  { %v2607_v41 = vmul.f32 0.17677669, %v3467_v2  ;;  %v3469_v2 = vpop.eup %3468 }
 0x4fc   :  { %v3344_v22 = vpack.i.bf16 %v2608_v44, %v2607_v41  ;;  %v2609_v41 = vmul.f32 0.17677669, %v3469_v2 }
 0x4fe   :  { %3345 = vrot.lane.b32.xlu2 %v3344_v22, %s3500_s24 }
 0x4ff   :  { %v2013_v7 = vpop.f32.mrf.mxu1 }
 0x504   :  { %v3316_v23 = vpop.permute.xlu1 %3315 }
 0x505   :  { %v3318_v9 = vunpack.i.h.bf16 %v3316_v23  ;;  %v3317_v57 = vunpack.i.l.bf16 %v3316_v23 }
 0x506   :  { %3365 = vrot.lane.b32.xlu2 %v6947_v29, %s3501_s4 }
 0x507   :  { %v2016_v4 = vpop.f32.mrf.mxu1 }
 0x525   :  { %v3331_v8 = vpop.permute.xlu0 %3330 }
 0x526   :  { %v3333_v0 = vunpack.i.h.bf16 %v3331_v8  ;;  %v3332_v3 = vunpack.i.l.bf16 %v3331_v8 }
 0x528   :  { %v2746_v51 = vsel %vm2034_vm11, %v1999_v34, %v3333_v0  ;;  %v2745_v12 = vsel %vm2034_vm11, %v1997_v63, %v3332_v3  ;;  %v2018_v63 = vpop.f32.mrf.mxu1 }
 0x529   :  { %v2763_v36 = vsel %vm2757_vm0, %v2746_v51, %v3308_v55  ;;  %v2762_v45 = vsel %vm2757_vm0, %v2745_v12, %v3307_v43 }
 0x52a   :  { %v3255_v48 = vpack.c.bf16 %v2763_v36, %v2762_v45 }
 0x52c   :  { %3283 = vst [vmem:[#allocation2 + $0x10] sm:$0xff] %v3255_v48  }
 0x52f   :  { %v2526_v1 = vpop.xlane.xlu1 %2525 }
 0x530   :  { %v2546_v18 = vmul.f32 0.5, %v2526_v1  ;;  %v2021_v61 = vpop.f32.mrf.mxu1  ;;  %v1965_v1 = vadd.f32 %v1964_v54, %v6129_v26 }
 0x531   :  { %v3341_v16 = vpop.permute.xlu0 %3340 }
 0x532   :  { %v2562_v11 = vsub.f32 %v6436_v21, %v2546_v18  ;;  %v3343_v14 = vunpack.i.h.bf16 %v3341_v16  ;;  %v3342_v35 = vunpack.i.l.bf16 %v3341_v16  ;;  %v1967_v21 = vpop.f32.mrf.mxu0  ;;  %v2014_v52 = vadd.f32 %v2013_v7, %v1965_v1 }
 0x534   :  { %v2591_v58 = vmul.f32 1.442695, %v2562_v11  ;;  %v2750_v49 = vsel %vm2034_vm11, %v2009_v46, %v3343_v14  ;;  %v2749_v47 = vsel %vm2034_vm11, %v2007_v32, %v3342_v35 }
 0x535   :  { %v2766_v33 = vsel %vm2757_vm0, %v2749_v47, %v3317_v57  ;;  %v2767_v59 = vsel %vm2757_vm0, %v2750_v49, %v3318_v9  ;;  %v3313_v57 = vunpack.i.h.bf16 %v6438_v5 }
 0x536   :  { %3470 = vpow2.f32 %v2591_v58  ;;  %v3265_v53 = vpack.c.bf16 %v2767_v59, %v2766_v33  ;;  %v6948_v59 = vld [vmem:[#allocation34_spill] sm:$0xff] }
 0x537   :  { %v1968_v5 = vadd.f32 %v1967_v21, %v6948_v59 }
 0x538   :  { %3285 = vst [vmem:[#allocation2 + $0x20] sm:$0xff] %v3265_v53   ;;  %v6949_v53 = vld [vmem:[#allocation35_spill] sm:$0xff] }
 0x53a   :  { %v1969_v15 = vpop.f32.mrf.mxu0 }
 0x53b   :  { %v1970_v7 = vadd.f32 %v1969_v15, %v6949_v53 }
 0x53c   :  { %v3471_v44 = vpop.eup %3470 }
 0x53d   :  { %v2610_v22 = vmul.f32 0.17677669, %v3471_v44 }
 0x53f   :  { %v3349_v29 = vpack.i.bf16 %v2610_v22, %v2609_v41  ;;  %v2017_v41 = vadd.f32 %v2016_v4, %v1968_v5  ;;  %v2019_v22 = vadd.f32 %v2018_v63, %v1970_v7 }
 0x541   :  { %3350 = vrot.lane.b32.xlu1 %v3349_v29, %s3500_s24 }
 0x542   :  { %v1972_v55 = vpop.f32.mrf.mxu0 }
 0x543   :  { %v1973_v50 = vadd.f32 %v1972_v55, %v6175_v60  ;;  %v2012_v60 = vadd.f32 %v6486_v31, %v1963_v30 }
 0x545   :  { %v2022_v51 = vadd.f32 %v2021_v61, %v1973_v50 }
 0x547   :  { %v3321_v38 = vpop.permute.xlu1 %3320 }
 0x548   :  { %v3323_v6 = vunpack.i.h.bf16 %v3321_v38  ;;  %v3322_v37 = vunpack.i.l.bf16 %v3321_v38 }
 0x549   :  { %3370 = vrot.lane.b32.xlu1 %v3369_v13, %s3501_s4 }
 0x54a   :  { %v2742_v56 = vsel %vm2034_vm11, %v6198_v10, %v3323_v6  ;;  %v2741_v8 = vsel %vm2034_vm11, %v6192_v20, %v3322_v37  ;;  %v1974_v43 = vpop.f32.mrf.mxu0  ;;  %v2023_v10 = vpop.f32.mrf.mxu1 }
 0x54b   :  { %v2759_v34 = vsel %vm2757_vm0, %v2742_v56, %v3298_v42  ;;  %v2758_v0 = vsel %vm2757_vm0, %v2741_v8, %v3297_v39  ;;  %v1975_v13 = vadd.f32 %v1974_v43, %v1926_v19 }
 0x54c   :  { %v3245_v3 = vpack.c.bf16 %v2759_v34, %v2758_v0 }
 0x54d   :  { %v2024_v20 = vadd.f32 %v2023_v10, %v1975_v13 }
 0x54e   :  { %3246 = vst [vmem:[#allocation2] sm:$0xff] %v3245_v3  }
 0x558   :  { %v3346_v45 = vpop.permute.xlu2 %3345 }
 0x559   :  { %v3348_v28 = vunpack.i.h.bf16 %v3346_v45  ;;  %v3347_v62 = vunpack.i.l.bf16 %v3346_v45 }
 0x55b   :  { %v2752_v11 = vsel %vm2034_vm11, %v2014_v52, %v3348_v28  ;;  %v2751_v14 = vsel %vm2034_vm11, %v2012_v60, %v3347_v62 }
 0x55f   :  { %v3356_v23 = vpop.permute.xlu0 %3355 }
 0x560   :  { %v3358_v12 = vunpack.i.h.bf16 %v3356_v23  ;;  %v3357_v36 = vunpack.i.l.bf16 %v3356_v23  ;;  %v3366_v2 = vpop.permute.xlu2 %3365 }
 0x561   :  { %v3368_v38 = vunpack.i.h.bf16 %v3366_v2  ;;  %v3367_v6 = vunpack.i.l.bf16 %v3366_v2 }
 0x562   :  { %v2756_v48 = vsel %vm2034_vm11, %v2024_v20, %v3358_v12  ;;  %v2755_v40 = vsel %vm2034_vm11, %v2022_v51, %v3357_v36 }
 0x567   :  { %v3361_v18 = vpop.permute.xlu0 %3360 }
 0x568   :  { %v3363_v32 = vunpack.i.h.bf16 %v3361_v18  ;;  %v3362_v16 = vunpack.i.l.bf16 %v3361_v18  ;;  %v3336_v46 = vpop.permute.xlu1 %3335 }
 0x569   :  { %v3338_v35 = vunpack.i.h.bf16 %v3336_v46  ;;  %v3337_v9 = vunpack.i.l.bf16 %v3336_v46 }
 0x56a   :  { %v2768_v26 = vsel %vm2757_vm0, %v2751_v14, %v3362_v16  ;;  %v2769_v25 = vsel %vm2757_vm0, %v2752_v11, %v3363_v32 }
 0x56b   :  { %v3270_v31 = vpack.c.bf16 %v2769_v25, %v2768_v26  ;;  %v2748_v54 = vsel %vm2034_vm11, %v6250_v24, %v3338_v35  ;;  %v2747_v58 = vsel %vm2034_vm11, %v6239_v27, %v3337_v9 }
 0x56c   :  { %v2765_v49 = vsel %vm2757_vm0, %v2748_v54, %v3313_v57  ;;  %v2764_v47 = vsel %vm2757_vm0, %v2747_v58, %v3312_v17 }
 0x56d   :  { %3286 = vst [vmem:[#allocation2 + $0x28] sm:$0xff] %v3270_v31   ;;  %v3260_v33 = vpack.c.bf16 %v2765_v49, %v2764_v47 }
 0x56f   :  { %3284 = vst [vmem:[#allocation2 + $0x18] sm:$0xff] %v3260_v33  }
 0x5b3   :  { %v3351_v44 = vpop.permute.xlu1 %3350 }
 0x5b4   :  { %v3353_v29 = vunpack.i.h.bf16 %v3351_v44  ;;  %v3352_v24 = vunpack.i.l.bf16 %v3351_v44 }
 0x5b6   :  { %v2754_v27 = vsel %vm2034_vm11, %v2019_v22, %v3353_v29  ;;  %v2753_v37 = vsel %vm2034_vm11, %v2017_v41, %v3352_v24 }
 0x5b7   :  { %v2771_v42 = vsel %vm2757_vm0, %v2754_v27, %v3368_v38  ;;  %v2770_v39 = vsel %vm2757_vm0, %v2753_v37, %v3367_v6 }
 0x5b8   :  { %v3275_v56 = vpack.c.bf16 %v2771_v42, %v2770_v39 }
 0x5ba   :  { %3287 = vst [vmem:[#allocation2 + $0x30] sm:$0xff] %v3275_v56  }
 0x5bb   :  { %v3371_v21 = vpop.permute.xlu1 %3370 }
 0x5bc   :  { %v3373_v4 = vunpack.i.h.bf16 %v3371_v21  ;;  %v3372_v15 = vunpack.i.l.bf16 %v3371_v21 }
 0x5be   :  { %v2773_v8 = vsel %vm2757_vm0, %v2756_v48, %v3373_v4  ;;  %v2772_v63 = vsel %vm2757_vm0, %v2755_v40, %v3372_v15 }
 0x5bf   :  { %v3280_v34 = vpack.c.bf16 %v2773_v8, %v2772_v63 }
 0x5c1   :  { %3288 = vst [vmem:[#allocation2 + $0x38] sm:$0xff] %v3280_v34  }
 0x5c2   :  { %2818 = dma.vmem_to_hbm [thread:$0]  %s2811_s27, 1024, %s2813_s1, [#allocation3], %s3500_s24, %s3500_s24, %s3503_s28  }
 0x5c3   :  { %3497 = dma.done.wait [#allocation3], 1024  }
 0x5c4   :  { %3498 = vsyncadd [#allocation3], 4294966272 }
 0x5c5   :  { %2823 = vsyncpa [#allocation3], 1 }

</bundles_post_ra>
